<compile_context>
chip_gen: v5e
topology: v5e:2x2
jax: 0.10.0
libtpu: 0.0.40
codegen_flags: <defaults>
</compile_context>

<pallas_src>
import math
import jax
import jax.numpy as jnp
from jax import lax
from jax.experimental import pallas as pl
from jax.experimental.pallas import tpu as pltpu

# ---------------- small GPTConfig (shapes consistent with the module) -------
BLOCK_SIZE = 16     # config.block_size
VOCAB      = 256    # config.vocab_size
N_LAYER    = 2      # config.n_layer
N_HEAD     = 4      # config.n_head
N_EMBD     = 128    # config.n_embd
HEAD_DIM   = N_EMBD // N_HEAD
LN_EPS     = 1e-5   # torch.nn.LayerNorm default eps

_GELU_K = math.sqrt(2.0 / math.pi)


# ---------------- in-kernel math helpers ------------------------------------
def _gelu_tanh(x):
    # tanh-approx GELU: the transcendental runs on the (otherwise idle) EUP.
    return 0.5 * x * (1.0 + jnp.tanh(_GELU_K * (x + 0.044715 * x * x * x)))


def _layernorm(x, w, b):
    mu = jnp.mean(x, axis=-1, keepdims=True)
    xc = x - mu
    var = jnp.mean(xc * xc, axis=-1, keepdims=True)
    return xc * lax.rsqrt(var + LN_EPS) * w + b


# ---------------- fused Pallas kernel ----------------------------------------
def _make_gpt_kernel(batches_per_block, T):
    rows = batches_per_block * T        # rows processed per grid step
    C = N_EMBD
    V = VOCAB

    def kernel(idx_ref, wte_ref, wte_t_ref, wpe_ref, lnfw_ref, lnfb_ref, *rest):
        y_scr = rest[-1]                # (rows, C) f32 scratch for head outputs
        o_ref = rest[-2]
        layer_refs = rest[:-2]

        # ---- token embedding: exact gather via one-hot matmul on the MXU ----
        # Kept in f32 so it is bit-exact vs. an embedding gather.
        tcol = lax.broadcasted_iota(jnp.int32, (rows, V), 1)
        tok_oh = jnp.where(tcol == idx_ref[...], 1.0, 0.0)               # (rows, V)
        x = jnp.dot(tok_oh, wte_ref[...], preferred_element_type=jnp.float32)

        # ---- position embedding: sublane tile of wpe[:T] (no matmul) --------
        pe = wpe_ref[:T, :]                                              # (T, C)
        if batches_per_block > 1:
            pe = jnp.tile(pe, (batches_per_block, 1))                    # (rows, C)
        x = x + pe

        # ---- block-diagonal causal mask over the folded rows (built once) ---
        row = lax.broadcasted_iota(jnp.int32, (rows, rows), 0)
        col = lax.broadcasted_iota(jnp.int32, (rows, rows), 1)
        mask = None
        for b in range(batches_per_block):   # static unroll; no int div/mod
            lo_r = b * T
            in_blk = (row >= lo_r) & (row < lo_r + T) & (col >= lo_r) & (col <= row)
            mask = in_blk if mask is None else (mask | in_blk)

        # ---- transformer blocks: static unroll keeps the body straight-line -
        for li in range(N_LAYER):
            (l1w, l1b, wqkv, bqkv, wpr, bpr,
             l2w, l2b, wfc, bfc, wfp, bfp) = layer_refs[li * 12:(li + 1) * 12]

            # --- causal self attention (batch folded into rows) ---
            h = _layernorm(x, l1w[...], l1b[...])
            # bf16 operands, f32 accumulation.  1/sqrt(hd) already folded into
            # the Q columns of wqkv (prepare_kernel_params).
            qkv = jnp.dot(h.astype(jnp.bfloat16), wqkv[...],
                          preferred_element_type=jnp.float32) + bqkv[...]  # (rows,3C)

            for hi in range(N_HEAD):                  # static unroll over heads
                lo = hi * HEAD_DIM
                qh = qkv[:, lo:lo + HEAD_DIM].astype(jnp.bfloat16)
                kh = qkv[:, C + lo:C + lo + HEAD_DIM].astype(jnp.bfloat16)
                vh = qkv[:, 2 * C + lo:2 * C + lo + HEAD_DIM].astype(jnp.bfloat16)
                s = lax.dot_general(qh, kh, (((1,), (1,)), ((), ())),
                                    preferred_element_type=jnp.float32)   # f32 scores
                s = jnp.where(mask, s, -1e30)          # f32 fill (safe, not bf16)
                s = s - jnp.max(s, axis=-1, keepdims=True)
                p = jnp.exp(s)
                p = p * pl.reciprocal(jnp.sum(p, axis=-1, keepdims=True),
                                      approx=True)
                yh = jnp.dot(p.astype(jnp.bfloat16), vh,
                             preferred_element_type=jnp.float32)          # (rows, hd)
                # masked vst into the lane slot of this head -- no relayout,
                # no per-head c_proj matmul.
                y_scr[:, lo:lo + HEAD_DIM] = yh

            # ONE full-width c_proj matmul for all heads.
            att = jnp.dot(y_scr[...].astype(jnp.bfloat16), wpr[...],
                          preferred_element_type=jnp.float32)
            x = x + att + bpr[...]

            # --- MLP ---
            h2 = _layernorm(x, l2w[...], l2b[...])
            ff = jnp.dot(h2.astype(jnp.bfloat16), wfc[...],
                         preferred_element_type=jnp.float32) + bfc[...]
            ff = _gelu_tanh(ff)
            x = x + jnp.dot(ff.astype(jnp.bfloat16), wfp[...],
                            preferred_element_type=jnp.float32) + bfp[...]

        # ---- ln_f + tied lm_head (pre-transposed bf16 wte: plain [K,N] dot) -
        xn = _layernorm(x, lnfw_ref[...], lnfb_ref[...])
        o_ref[...] = jnp.dot(xn.astype(jnp.bfloat16), wte_t_ref[...],
                             preferred_element_type=jnp.float32)

    return kernel


# ---------------- one-time parameter transform for the kernel ----------------
def prepare_kernel_params(params):
    """bf16 GEMM weights, scale folded into Q, transposed tied lm_head weight.
    Done ONCE (not per call)."""
    scale = 1.0 / math.sqrt(HEAD_DIM)
    blocks = []
    for (l1w, l1b, wqkv, bqkv, wpr, bpr,
         l2w, l2b, wfc, bfc, wfp, bfp) in params["blocks"]:
        wqkv_s = wqkv.at[:, :N_EMBD].multiply(scale)      # fold 1/sqrt(hd) into Q
        bqkv_s = bqkv.at[:, :N_EMBD].multiply(scale)
        blocks.append((
            l1w, l1b,
            wqkv_s.astype(jnp.bfloat16), bqkv_s,
            wpr.astype(jnp.bfloat16), bpr,
            l2w, l2b,
            wfc.astype(jnp.bfloat16), bfc,
            wfp.astype(jnp.bfloat16), bfp,
        ))
    return {
        "wte": params["wte"],                              # f32: exact token gather
        "wte_t": params["wte"].T.astype(jnp.bfloat16),     # tied lm_head, [K, N]
        "wpe": params["wpe"],
        "lnf_w": params["lnf_w"],
        "lnf_b": params["lnf_b"],
        "blocks": blocks,
    }


def _num_row_blocks(B):
    """2 on v7x-class chips (2 TensorCores) when the batch splits evenly;
    1 on v5e/v6e (single TC -- a serial 2-step grid would only shrink M)."""
    try:
        kind = jax.devices()[0].device_kind.lower()
    except Exception:
        kind = ""
    if (("v7" in kind) or ("tpu7" in kind)) and B % 2 == 0:
        return 2
    return 1


# ---------------- wrapper -----------------------------------------------------
def gpt_forward(idx, kparams):
    """idx: int [B, T] token ids. kparams: output of prepare_kernel_params.
    Returns logits [B, T, vocab]."""
    B, T = idx.shape
    assert T <= BLOCK_SIZE
    BT = B * T

    flat_layers = [w for layer in kparams["blocks"] for w in layer]
    inputs = [idx.reshape(BT, 1).astype(jnp.int32),
              kparams["wte"], kparams["wte_t"], kparams["wpe"],
              kparams["lnf_w"], kparams["lnf_b"],
              *flat_layers]

    G = _num_row_blocks(B)
    rows = BT // G                    # rows per grid step
    bpb = B // G                      # batches per grid step

    vmem_full = pl.BlockSpec(memory_space=pltpu.MemorySpace.VMEM)
    in_specs = ([pl.BlockSpec((rows, 1), lambda g: (g, 0))]      # idx: split rows
                + [vmem_full] * (len(inputs) - 1))               # weights: resident
    out_spec = pl.BlockSpec((rows, VOCAB), lambda g: (g, 0))     # lane-dense output

    logits2d = pl.pallas_call(
        _make_gpt_kernel(bpb, T),
        out_shape=jax.ShapeDtypeStruct((BT, VOCAB), jnp.float32),
        grid=(G,),
        in_specs=in_specs,
        out_specs=out_spec,
        scratch_shapes=[pltpu.VMEM((rows, N_EMBD), jnp.float32)],  # head outputs
        compiler_params=pltpu.CompilerParams(
            dimension_semantics=("parallel",),   # shards across TCs on v7x
            # ~1 MB resident today.  Explicit budget so scaling fails loudly;
            # keep < ~56 MiB when targeting v7x (64 MiB VMEM/core), can go
            # toward ~100 MiB on v5e/v6e (128 MiB).
            vmem_limit_bytes=32 * 1024 * 1024),
    )(*inputs)
    return logits2d.reshape(B, T, VOCAB)


# ---------------- deterministic parameter init (matches GPT._init_weights) ---
def init_params(key):
    std = 0.02
    scaled_std = 0.02 * (2 * N_LAYER) ** -0.5     # NANOGPT_SCALE_INIT layers
    keys = iter(jax.random.split(key, 64))

    def normal(shape, s):
        return jax.random.normal(next(keys), shape, dtype=jnp.float32) * s

    params = {
        "wte": normal((VOCAB, N_EMBD), std),          # tied with lm_head
        "wpe": normal((BLOCK_SIZE, N_EMBD), std),
        "lnf_w": jnp.ones((1, N_EMBD), jnp.float32),
        "lnf_b": jnp.zeros((1, N_EMBD), jnp.float32),
        "blocks": [],
    }
    for _ in range(N_LAYER):
        layer = (
            jnp.ones((1, N_EMBD), jnp.float32),                 # ln1 weight
            jnp.zeros((1, N_EMBD), jnp.float32),                # ln1 bias
            normal((N_EMBD, 3 * N_EMBD), std),                  # c_attn weight [in,out]
            jnp.zeros((1, 3 * N_EMBD), jnp.float32),            # c_attn bias
            normal((N_EMBD, N_EMBD), scaled_std),               # attn c_proj weight
            jnp.zeros((1, N_EMBD), jnp.float32),                # attn c_proj bias
            jnp.ones((1, N_EMBD), jnp.float32),                 # ln2 weight
            jnp.zeros((1, N_EMBD), jnp.float32),                # ln2 bias
            normal((N_EMBD, 4 * N_EMBD), std),                  # mlp c_fc weight
            jnp.zeros((1, 4 * N_EMBD), jnp.float32),            # mlp c_fc bias
            normal((4 * N_EMBD, N_EMBD), scaled_std),           # mlp c_proj weight
            jnp.zeros((1, N_EMBD), jnp.float32),                # mlp c_proj bias
        )
        params["blocks"].append(layer)
    return params


# ---------------- pure-JAX reference (exact erf GELU / exact softmax, f32) ---
def _ref_forward(idx, params):
    B, T = idx.shape
    x = jnp.take(params["wte"], idx, axis=0) + params["wpe"][:T][None]

    def ln(v, w, b):
        mu = jnp.mean(v, -1, keepdims=True)
        var = jnp.mean((v - mu) ** 2, -1, keepdims=True)
        return (v - mu) / jnp.sqrt(var + LN_EPS) * w + b

    for (l1w, l1b, wqkv, bqkv, wpr, bpr, l2w, l2b, wfc, bfc, wfp, bfp) in params["blocks"]:
        h = ln(x, l1w, l1b)
        qkv = h @ wqkv + bqkv
        q, k, v = jnp.split(qkv, 3, axis=-1)
        q = q.reshape(B, T, N_HEAD, HEAD_DIM).transpose(0, 2, 1, 3)
        k = k.reshape(B, T, N_HEAD, HEAD_DIM).transpose(0, 2, 1, 3)
        v = v.reshape(B, T, N_HEAD, HEAD_DIM).transpose(0, 2, 1, 3)
        s = jnp.einsum("bhqd,bhkd->bhqk", q, k) / math.sqrt(HEAD_DIM)
        mask = jnp.tril(jnp.ones((T, T), bool))
        s = jnp.where(mask, s, -jnp.inf)
        p = jax.nn.softmax(s, axis=-1)
        y = jnp.einsum("bhqk,bhkd->bhqd", p, v).transpose(0, 2, 1, 3).reshape(B, T, N_EMBD)
        x = x + (y @ wpr + bpr)
        h2 = ln(x, l2w, l2b)
        ff = jax.nn.gelu(h2 @ wfc + bfc, approximate=False)
        x = x + (ff @ wfp + bfp)
    xn = ln(x, params["lnf_w"], params["lnf_b"])
    return jnp.einsum("btc,vc->btv", xn, params["wte"])


# ---------------- main --------------------------------------------------------
if __name__ == "__main__":
    key = jax.random.PRNGKey(0)
    k_param, k_idx = jax.random.split(key)

    params = init_params(k_param)
    kparams = prepare_kernel_params(params)    # one-time transform (bf16 / .T / scale)

    B, T = 2, 8
    idx = jax.random.randint(k_idx, (B, T), 0, VOCAB, dtype=jnp.int32)

    logits = gpt_forward(idx, kparams)
    logits = jax.block_until_ready(logits)
    assert logits.shape == (B, T, VOCAB)

    ref = _ref_forward(idx, params)
    # Kernel deviates from the exact f32 reference via bf16 GEMM operands
    # (f32 accumulation), tanh-approx GELU and the EUP approximate-reciprocal
    # softmax normalization; total deviation at the logits is well under 2e-2
    # at these shapes/magnitudes.
    assert jnp.allclose(logits, ref, atol=2e-2, rtol=2e-2), "mismatch vs reference"

    # TODO(synk): targets / cross-entropy loss branch of GPT.forward is not
    # exercised (targets=None path only).
    print("KERNEL_OK")
</pallas_src>

<mosaic_0001>
module attributes {stable_mosaic.version = 11 : i64} {
  func.func @kernel(%arg0: i32, %arg1: memref<16x1xi32, #tpu.memory_space<vmem>>, %arg2: memref<256x128xf32, #tpu.memory_space<vmem>>, %arg3: memref<128x256xbf16, #tpu.memory_space<vmem>>, %arg4: memref<16x128xf32, #tpu.memory_space<vmem>>, %arg5: memref<1x128xf32, #tpu.memory_space<vmem>>, %arg6: memref<1x128xf32, #tpu.memory_space<vmem>>, %arg7: memref<1x128xf32, #tpu.memory_space<vmem>>, %arg8: memref<1x128xf32, #tpu.memory_space<vmem>>, %arg9: memref<128x384xbf16, #tpu.memory_space<vmem>>, %arg10: memref<1x384xf32, #tpu.memory_space<vmem>>, %arg11: memref<128x128xbf16, #tpu.memory_space<vmem>>, %arg12: memref<1x128xf32, #tpu.memory_space<vmem>>, %arg13: memref<1x128xf32, #tpu.memory_space<vmem>>, %arg14: memref<1x128xf32, #tpu.memory_space<vmem>>, %arg15: memref<128x512xbf16, #tpu.memory_space<vmem>>, %arg16: memref<1x512xf32, #tpu.memory_space<vmem>>, %arg17: memref<512x128xbf16, #tpu.memory_space<vmem>>, %arg18: memref<1x128xf32, #tpu.memory_space<vmem>>, %arg19: memref<1x128xf32, #tpu.memory_space<vmem>>, %arg20: memref<1x128xf32, #tpu.memory_space<vmem>>, %arg21: memref<128x384xbf16, #tpu.memory_space<vmem>>, %arg22: memref<1x384xf32, #tpu.memory_space<vmem>>, %arg23: memref<128x128xbf16, #tpu.memory_space<vmem>>, %arg24: memref<1x128xf32, #tpu.memory_space<vmem>>, %arg25: memref<1x128xf32, #tpu.memory_space<vmem>>, %arg26: memref<1x128xf32, #tpu.memory_space<vmem>>, %arg27: memref<128x512xbf16, #tpu.memory_space<vmem>>, %arg28: memref<1x512xf32, #tpu.memory_space<vmem>>, %arg29: memref<512x128xbf16, #tpu.memory_space<vmem>>, %arg30: memref<1x128xf32, #tpu.memory_space<vmem>>, %arg31: memref<16x256xf32, #tpu.memory_space<vmem>>, %arg32: memref<16x128xf32, #tpu.memory_space<vmem>>) attributes {dimension_semantics = [#tpu.dimension_semantics<parallel>], iteration_bounds = array<i64: 1>, scalar_prefetch = 0 : i64, scratch_operands = 1 : i64, tpu.core_type = #tpu.core_type<tc>, window_params = [{transform_indices = @transform_0, window_bounds = array<i64: 16, 1>}, {pipeline_mode = #tpu.pipeline_mode<synchronous>, transform_indices = @transform_1, window_bounds = array<i64: 256, 128>}, {pipeline_mode = #tpu.pipeline_mode<synchronous>, transform_indices = @transform_2, window_bounds = array<i64: 128, 256>}, {pipeline_mode = #tpu.pipeline_mode<synchronous>, transform_indices = @transform_3, window_bounds = array<i64: 16, 128>}, {pipeline_mode = #tpu.pipeline_mode<synchronous>, transform_indices = @transform_4, window_bounds = array<i64: 1, 128>}, {pipeline_mode = #tpu.pipeline_mode<synchronous>, transform_indices = @transform_5, window_bounds = array<i64: 1, 128>}, {pipeline_mode = #tpu.pipeline_mode<synchronous>, transform_indices = @transform_6, window_bounds = array<i64: 1, 128>}, {pipeline_mode = #tpu.pipeline_mode<synchronous>, transform_indices = @transform_7, window_bounds = array<i64: 1, 128>}, {pipeline_mode = #tpu.pipeline_mode<synchronous>, transform_indices = @transform_8, window_bounds = array<i64: 128, 384>}, {pipeline_mode = #tpu.pipeline_mode<synchronous>, transform_indices = @transform_9, window_bounds = array<i64: 1, 384>}, {pipeline_mode = #tpu.pipeline_mode<synchronous>, transform_indices = @transform_10, window_bounds = array<i64: 128, 128>}, {pipeline_mode = #tpu.pipeline_mode<synchronous>, transform_indices = @transform_11, window_bounds = array<i64: 1, 128>}, {pipeline_mode = #tpu.pipeline_mode<synchronous>, transform_indices = @transform_12, window_bounds = array<i64: 1, 128>}, {pipeline_mode = #tpu.pipeline_mode<synchronous>, transform_indices = @transform_13, window_bounds = array<i64: 1, 128>}, {pipeline_mode = #tpu.pipeline_mode<synchronous>, transform_indices = @transform_14, window_bounds = array<i64: 128, 512>}, {pipeline_mode = #tpu.pipeline_mode<synchronous>, transform_indices = @transform_15, window_bounds = array<i64: 1, 512>}, {pipeline_mode = #tpu.pipeline_mode<synchronous>, transform_indices = @transform_16, window_bounds = array<i64: 512, 128>}, {pipeline_mode = #tpu.pipeline_mode<synchronous>, transform_indices = @transform_17, window_bounds = array<i64: 1, 128>}, {pipeline_mode = #tpu.pipeline_mode<synchronous>, transform_indices = @transform_18, window_bounds = array<i64: 1, 128>}, {pipeline_mode = #tpu.pipeline_mode<synchronous>, transform_indices = @transform_19, window_bounds = array<i64: 1, 128>}, {pipeline_mode = #tpu.pipeline_mode<synchronous>, transform_indices = @transform_20, window_bounds = array<i64: 128, 384>}, {pipeline_mode = #tpu.pipeline_mode<synchronous>, transform_indices = @transform_21, window_bounds = array<i64: 1, 384>}, {pipeline_mode = #tpu.pipeline_mode<synchronous>, transform_indices = @transform_22, window_bounds = array<i64: 128, 128>}, {pipeline_mode = #tpu.pipeline_mode<synchronous>, transform_indices = @transform_23, window_bounds = array<i64: 1, 128>}, {pipeline_mode = #tpu.pipeline_mode<synchronous>, transform_indices = @transform_24, window_bounds = array<i64: 1, 128>}, {pipeline_mode = #tpu.pipeline_mode<synchronous>, transform_indices = @transform_25, window_bounds = array<i64: 1, 128>}, {pipeline_mode = #tpu.pipeline_mode<synchronous>, transform_indices = @transform_26, window_bounds = array<i64: 128, 512>}, {pipeline_mode = #tpu.pipeline_mode<synchronous>, transform_indices = @transform_27, window_bounds = array<i64: 1, 512>}, {pipeline_mode = #tpu.pipeline_mode<synchronous>, transform_indices = @transform_28, window_bounds = array<i64: 512, 128>}, {pipeline_mode = #tpu.pipeline_mode<synchronous>, transform_indices = @transform_29, window_bounds = array<i64: 1, 128>}, {transform_indices = @transform_30, window_bounds = array<i64: 16, 256>}]} {
    %0 = tpu.iota {dimensions = array<i32: 1>} : vector<16x256xi32>
    %c0 = arith.constant 0 : index
    %c0_0 = arith.constant 0 : index
    %1 = vector.load %arg1[%c0, %c0_0] : memref<16x1xi32, #tpu.memory_space<vmem>>, vector<16x1xi32>
    %2 = vector.broadcast %1 : vector<16x1xi32> to vector<16x256xi32>
    %3 = arith.cmpi eq, %0, %2 : vector<16x256xi32>
    %cst = arith.constant 1.000000e+00 : f32
    %cst_1 = arith.constant 0.000000e+00 : f32
    %4 = vector.broadcast %cst : f32 to vector<16x256xf32>
    %5 = vector.broadcast %cst_1 : f32 to vector<16x256xf32>
    %6 = arith.select %3, %4, %5 : vector<16x256xi1>, vector<16x256xf32>
    %c0_2 = arith.constant 0 : index
    %c0_3 = arith.constant 0 : index
    %7 = vector.load %arg2[%c0_2, %c0_3] : memref<256x128xf32, #tpu.memory_space<vmem>>, vector<256x128xf32>
    %cst_4 = arith.constant dense<0.000000e+00> : vector<16x128xf32>
    %8 = tpu.matmul %6, %7, %cst_4 {dimension_numbers = #tpu.dot_dimension_numbers<[1], [0], [0], [1], [0, 0, 1, 1], [], []>} : vector<16x256xf32>, vector<256x128xf32>, vector<16x128xf32> -> vector<16x128xf32>
    %c0_5 = arith.constant 0 : index
    %c0_6 = arith.constant 0 : index
    %9 = vector.load %arg4[%c0_5, %c0_6] : memref<16x128xf32, #tpu.memory_space<vmem>>, vector<8x128xf32>
    %10 = tpu.concatenate %9, %9 in 0 : vector<8x128xf32>, vector<8x128xf32> -> vector<16x128xf32>
    %11 = arith.addf %8, %10 : vector<16x128xf32>
    %12 = tpu.iota {dimensions = array<i32: 0>} : vector<16x16xi32>
    %13 = tpu.iota {dimensions = array<i32: 1>} : vector<16x16xi32>
    %c0_i32 = arith.constant 0 : i32
    %14 = vector.broadcast %c0_i32 : i32 to vector<16x16xi32>
    %15 = arith.cmpi sge, %12, %14 : vector<16x16xi32>
    %c8_i32 = arith.constant 8 : i32
    %16 = vector.broadcast %c8_i32 : i32 to vector<16x16xi32>
    %17 = arith.cmpi slt, %12, %16 : vector<16x16xi32>
    %18 = arith.andi %15, %17 : vector<16x16xi1>
    %c0_i32_7 = arith.constant 0 : i32
    %19 = vector.broadcast %c0_i32_7 : i32 to vector<16x16xi32>
    %20 = arith.cmpi sge, %13, %19 : vector<16x16xi32>
    %21 = arith.andi %18, %20 : vector<16x16xi1>
    %22 = arith.cmpi sle, %13, %12 : vector<16x16xi32>
    %23 = arith.andi %21, %22 : vector<16x16xi1>
    %c8_i32_8 = arith.constant 8 : i32
    %24 = vector.broadcast %c8_i32_8 : i32 to vector<16x16xi32>
    %25 = arith.cmpi sge, %12, %24 : vector<16x16xi32>
    %c16_i32 = arith.constant 16 : i32
    %26 = vector.broadcast %c16_i32 : i32 to vector<16x16xi32>
    %27 = arith.cmpi slt, %12, %26 : vector<16x16xi32>
    %28 = arith.andi %25, %27 : vector<16x16xi1>
    %c8_i32_9 = arith.constant 8 : i32
    %29 = vector.broadcast %c8_i32_9 : i32 to vector<16x16xi32>
    %30 = arith.cmpi sge, %13, %29 : vector<16x16xi32>
    %31 = arith.andi %28, %30 : vector<16x16xi1>
    %32 = arith.cmpi sle, %13, %12 : vector<16x16xi32>
    %33 = arith.andi %31, %32 : vector<16x16xi1>
    %34 = arith.ori %23, %33 : vector<16x16xi1>
    %c0_10 = arith.constant 0 : index
    %c0_11 = arith.constant 0 : index
    %35 = vector.load %arg7[%c0_10, %c0_11] : memref<1x128xf32, #tpu.memory_space<vmem>>, vector<1x128xf32>
    %c0_12 = arith.constant 0 : index
    %c0_13 = arith.constant 0 : index
    %36 = vector.load %arg8[%c0_12, %c0_13] : memref<1x128xf32, #tpu.memory_space<vmem>>, vector<1x128xf32>
    %cst_14 = arith.constant dense<0.000000e+00> : vector<16xf32>
    %37 = vector.multi_reduction <add>, %11, %cst_14 [1] : vector<16x128xf32> to vector<16xf32>
    %38 = vector.shape_cast %37 : vector<16xf32> to vector<16x1xf32>
    %cst_15 = arith.constant 1.280000e+02 : f32
    %39 = vector.broadcast %cst_15 : f32 to vector<16x1xf32>
    %40 = arith.divf %38, %39 : vector<16x1xf32>
    %41 = vector.broadcast %40 : vector<16x1xf32> to vector<16x128xf32>
    %42 = arith.subf %11, %41 : vector<16x128xf32>
    %43 = arith.mulf %42, %42 : vector<16x128xf32>
    %cst_16 = arith.constant dense<0.000000e+00> : vector<16xf32>
    %44 = vector.multi_reduction <add>, %43, %cst_16 [1] : vector<16x128xf32> to vector<16xf32>
    %45 = vector.shape_cast %44 : vector<16xf32> to vector<16x1xf32>
    %cst_17 = arith.constant 1.280000e+02 : f32
    %46 = vector.broadcast %cst_17 : f32 to vector<16x1xf32>
    %47 = arith.divf %45, %46 : vector<16x1xf32>
    %cst_18 = arith.constant 9.99999974E-6 : f32
    %48 = vector.broadcast %cst_18 : f32 to vector<16x1xf32>
    %49 = arith.addf %47, %48 : vector<16x1xf32>
    %50 = math.rsqrt %49 : vector<16x1xf32>
    %51 = vector.broadcast %50 : vector<16x1xf32> to vector<16x128xf32>
    %52 = arith.mulf %42, %51 : vector<16x128xf32>
    %53 = vector.broadcast %35 : vector<1x128xf32> to vector<16x128xf32>
    %54 = arith.mulf %52, %53 : vector<16x128xf32>
    %55 = vector.broadcast %36 : vector<1x128xf32> to vector<16x128xf32>
    %56 = arith.addf %54, %55 : vector<16x128xf32>
    %57 = arith.truncf %56 : vector<16x128xf32> to vector<16x128xbf16>
    %c0_19 = arith.constant 0 : index
    %c0_20 = arith.constant 0 : index
    %58 = vector.load %arg9[%c0_19, %c0_20] : memref<128x384xbf16, #tpu.memory_space<vmem>>, vector<128x384xbf16>
    %cst_21 = arith.constant dense<0.000000e+00> : vector<16x384xf32>
    %59 = tpu.matmul %57, %58, %cst_21 {dimension_numbers = #tpu.dot_dimension_numbers<[1], [0], [0], [1], [0, 0, 1, 1], [], []>} : vector<16x128xbf16>, vector<128x384xbf16>, vector<16x384xf32> -> vector<16x384xf32>
    %c0_22 = arith.constant 0 : index
    %c0_23 = arith.constant 0 : index
    %60 = vector.load %arg10[%c0_22, %c0_23] : memref<1x384xf32, #tpu.memory_space<vmem>>, vector<1x384xf32>
    %61 = vector.broadcast %60 : vector<1x384xf32> to vector<16x384xf32>
    %62 = arith.addf %59, %61 : vector<16x384xf32>
    %63 = vector.extract_strided_slice %62 {offsets = [0, 0], sizes = [16, 32], strides = [1, 1]} : vector<16x384xf32> to vector<16x32xf32>
    %64 = arith.truncf %63 : vector<16x32xf32> to vector<16x32xbf16>
    %65 = vector.extract_strided_slice %62 {offsets = [0, 128], sizes = [16, 32], strides = [1, 1]} : vector<16x384xf32> to vector<16x32xf32>
    %66 = arith.truncf %65 : vector<16x32xf32> to vector<16x32xbf16>
    %67 = vector.extract_strided_slice %62 {offsets = [0, 256], sizes = [16, 32], strides = [1, 1]} : vector<16x384xf32> to vector<16x32xf32>
    %68 = arith.truncf %67 : vector<16x32xf32> to vector<16x32xbf16>
    %cst_24 = arith.constant dense<0.000000e+00> : vector<16x16xf32>
    %69 = tpu.matmul %64, %66, %cst_24 {dimension_numbers = #tpu.dot_dimension_numbers<[1], [1], [0], [0], [0, 0, 1, 0], [], []>} : vector<16x32xbf16>, vector<16x32xbf16>, vector<16x16xf32> -> vector<16x16xf32>
    %cst_25 = arith.constant -1.000000e+30 : f32
    %70 = vector.broadcast %cst_25 : f32 to vector<16x16xf32>
    %71 = arith.select %34, %69, %70 : vector<16x16xi1>, vector<16x16xf32>
    %cst_26 = arith.constant dense<0xFF800000> : vector<16xf32>
    %72 = vector.multi_reduction <maximumf>, %71, %cst_26 [1] : vector<16x16xf32> to vector<16xf32>
    %73 = vector.shape_cast %72 : vector<16xf32> to vector<16x1xf32>
    %74 = vector.broadcast %73 : vector<16x1xf32> to vector<16x16xf32>
    %75 = arith.subf %71, %74 : vector<16x16xf32>
    %76 = math.exp %75 : vector<16x16xf32>
    %cst_27 = arith.constant dense<0.000000e+00> : vector<16xf32>
    %77 = vector.multi_reduction <add>, %76, %cst_27 [1] : vector<16x16xf32> to vector<16xf32>
    %78 = vector.shape_cast %77 : vector<16xf32> to vector<16x1xf32>
    %79 = tpu.reciprocal %78 {approx = true} : vector<16x1xf32> -> vector<16x1xf32>
    %80 = vector.broadcast %79 : vector<16x1xf32> to vector<16x16xf32>
    %81 = arith.mulf %76, %80 : vector<16x16xf32>
    %82 = arith.truncf %81 : vector<16x16xf32> to vector<16x16xbf16>
    %cst_28 = arith.constant dense<0.000000e+00> : vector<16x32xf32>
    %83 = tpu.matmul %82, %68, %cst_28 {dimension_numbers = #tpu.dot_dimension_numbers<[1], [0], [0], [1], [0, 0, 1, 1], [], []>} : vector<16x16xbf16>, vector<16x32xbf16>, vector<16x32xf32> -> vector<16x32xf32>
    %c0_29 = arith.constant 0 : index
    %c0_30 = arith.constant 0 : index
    %84 = vector.load %arg32[%c0_29, %c0_30] : memref<16x128xf32, #tpu.memory_space<vmem>>, vector<16x32xf32>
    tpu.vector_store %arg32[%c0_29, %c0_30], %83 {strides = array<i32>} : memref<16x128xf32, #tpu.memory_space<vmem>>, vector<16x32xf32>,
    %85 = vector.extract_strided_slice %62 {offsets = [0, 32], sizes = [16, 32], strides = [1, 1]} : vector<16x384xf32> to vector<16x32xf32>
    %86 = arith.truncf %85 : vector<16x32xf32> to vector<16x32xbf16>
    %87 = vector.extract_strided_slice %62 {offsets = [0, 160], sizes = [16, 32], strides = [1, 1]} : vector<16x384xf32> to vector<16x32xf32>
    %88 = arith.truncf %87 : vector<16x32xf32> to vector<16x32xbf16>
    %89 = vector.extract_strided_slice %62 {offsets = [0, 288], sizes = [16, 32], strides = [1, 1]} : vector<16x384xf32> to vector<16x32xf32>
    %90 = arith.truncf %89 : vector<16x32xf32> to vector<16x32xbf16>
    %cst_31 = arith.constant dense<0.000000e+00> : vector<16x16xf32>
    %91 = tpu.matmul %86, %88, %cst_31 {dimension_numbers = #tpu.dot_dimension_numbers<[1], [1], [0], [0], [0, 0, 1, 0], [], []>} : vector<16x32xbf16>, vector<16x32xbf16>, vector<16x16xf32> -> vector<16x16xf32>
    %cst_32 = arith.constant -1.000000e+30 : f32
    %92 = vector.broadcast %cst_32 : f32 to vector<16x16xf32>
    %93 = arith.select %34, %91, %92 : vector<16x16xi1>, vector<16x16xf32>
    %cst_33 = arith.constant dense<0xFF800000> : vector<16xf32>
    %94 = vector.multi_reduction <maximumf>, %93, %cst_33 [1] : vector<16x16xf32> to vector<16xf32>
    %95 = vector.shape_cast %94 : vector<16xf32> to vector<16x1xf32>
    %96 = vector.broadcast %95 : vector<16x1xf32> to vector<16x16xf32>
    %97 = arith.subf %93, %96 : vector<16x16xf32>
    %98 = math.exp %97 : vector<16x16xf32>
    %cst_34 = arith.constant dense<0.000000e+00> : vector<16xf32>
    %99 = vector.multi_reduction <add>, %98, %cst_34 [1] : vector<16x16xf32> to vector<16xf32>
    %100 = vector.shape_cast %99 : vector<16xf32> to vector<16x1xf32>
    %101 = tpu.reciprocal %100 {approx = true} : vector<16x1xf32> -> vector<16x1xf32>
    %102 = vector.broadcast %101 : vector<16x1xf32> to vector<16x16xf32>
    %103 = arith.mulf %98, %102 : vector<16x16xf32>
    %104 = arith.truncf %103 : vector<16x16xf32> to vector<16x16xbf16>
    %cst_35 = arith.constant dense<0.000000e+00> : vector<16x32xf32>
    %105 = tpu.matmul %104, %90, %cst_35 {dimension_numbers = #tpu.dot_dimension_numbers<[1], [0], [0], [1], [0, 0, 1, 1], [], []>} : vector<16x16xbf16>, vector<16x32xbf16>, vector<16x32xf32> -> vector<16x32xf32>
    %c0_36 = arith.constant 0 : index
    %c32 = arith.constant 32 : index
    %106 = vector.load %arg32[%c0_36, %c32] : memref<16x128xf32, #tpu.memory_space<vmem>>, vector<16x32xf32>
    tpu.vector_store %arg32[%c0_36, %c32], %105 {strides = array<i32>} : memref<16x128xf32, #tpu.memory_space<vmem>>, vector<16x32xf32>,
    %107 = vector.extract_strided_slice %62 {offsets = [0, 64], sizes = [16, 32], strides = [1, 1]} : vector<16x384xf32> to vector<16x32xf32>
    %108 = arith.truncf %107 : vector<16x32xf32> to vector<16x32xbf16>
    %109 = vector.extract_strided_slice %62 {offsets = [0, 192], sizes = [16, 32], strides = [1, 1]} : vector<16x384xf32> to vector<16x32xf32>
    %110 = arith.truncf %109 : vector<16x32xf32> to vector<16x32xbf16>
    %111 = vector.extract_strided_slice %62 {offsets = [0, 320], sizes = [16, 32], strides = [1, 1]} : vector<16x384xf32> to vector<16x32xf32>
    %112 = arith.truncf %111 : vector<16x32xf32> to vector<16x32xbf16>
    %cst_37 = arith.constant dense<0.000000e+00> : vector<16x16xf32>
    %113 = tpu.matmul %108, %110, %cst_37 {dimension_numbers = #tpu.dot_dimension_numbers<[1], [1], [0], [0], [0, 0, 1, 0], [], []>} : vector<16x32xbf16>, vector<16x32xbf16>, vector<16x16xf32> -> vector<16x16xf32>
    %cst_38 = arith.constant -1.000000e+30 : f32
    %114 = vector.broadcast %cst_38 : f32 to vector<16x16xf32>
    %115 = arith.select %34, %113, %114 : vector<16x16xi1>, vector<16x16xf32>
    %cst_39 = arith.constant dense<0xFF800000> : vector<16xf32>
    %116 = vector.multi_reduction <maximumf>, %115, %cst_39 [1] : vector<16x16xf32> to vector<16xf32>
    %117 = vector.shape_cast %116 : vector<16xf32> to vector<16x1xf32>
    %118 = vector.broadcast %117 : vector<16x1xf32> to vector<16x16xf32>
    %119 = arith.subf %115, %118 : vector<16x16xf32>
    %120 = math.exp %119 : vector<16x16xf32>
    %cst_40 = arith.constant dense<0.000000e+00> : vector<16xf32>
    %121 = vector.multi_reduction <add>, %120, %cst_40 [1] : vector<16x16xf32> to vector<16xf32>
    %122 = vector.shape_cast %121 : vector<16xf32> to vector<16x1xf32>
    %123 = tpu.reciprocal %122 {approx = true} : vector<16x1xf32> -> vector<16x1xf32>
    %124 = vector.broadcast %123 : vector<16x1xf32> to vector<16x16xf32>
    %125 = arith.mulf %120, %124 : vector<16x16xf32>
    %126 = arith.truncf %125 : vector<16x16xf32> to vector<16x16xbf16>
    %cst_41 = arith.constant dense<0.000000e+00> : vector<16x32xf32>
    %127 = tpu.matmul %126, %112, %cst_41 {dimension_numbers = #tpu.dot_dimension_numbers<[1], [0], [0], [1], [0, 0, 1, 1], [], []>} : vector<16x16xbf16>, vector<16x32xbf16>, vector<16x32xf32> -> vector<16x32xf32>
    %c0_42 = arith.constant 0 : index
    %c64 = arith.constant 64 : index
    %128 = vector.load %arg32[%c0_42, %c64] : memref<16x128xf32, #tpu.memory_space<vmem>>, vector<16x32xf32>
    tpu.vector_store %arg32[%c0_42, %c64], %127 {strides = array<i32>} : memref<16x128xf32, #tpu.memory_space<vmem>>, vector<16x32xf32>,
    %129 = vector.extract_strided_slice %62 {offsets = [0, 96], sizes = [16, 32], strides = [1, 1]} : vector<16x384xf32> to vector<16x32xf32>
    %130 = arith.truncf %129 : vector<16x32xf32> to vector<16x32xbf16>
    %131 = vector.extract_strided_slice %62 {offsets = [0, 224], sizes = [16, 32], strides = [1, 1]} : vector<16x384xf32> to vector<16x32xf32>
    %132 = arith.truncf %131 : vector<16x32xf32> to vector<16x32xbf16>
    %133 = vector.extract_strided_slice %62 {offsets = [0, 352], sizes = [16, 32], strides = [1, 1]} : vector<16x384xf32> to vector<16x32xf32>
    %134 = arith.truncf %133 : vector<16x32xf32> to vector<16x32xbf16>
    %cst_43 = arith.constant dense<0.000000e+00> : vector<16x16xf32>
    %135 = tpu.matmul %130, %132, %cst_43 {dimension_numbers = #tpu.dot_dimension_numbers<[1], [1], [0], [0], [0, 0, 1, 0], [], []>} : vector<16x32xbf16>, vector<16x32xbf16>, vector<16x16xf32> -> vector<16x16xf32>
    %cst_44 = arith.constant -1.000000e+30 : f32
    %136 = vector.broadcast %cst_44 : f32 to vector<16x16xf32>
    %137 = arith.select %34, %135, %136 : vector<16x16xi1>, vector<16x16xf32>
    %cst_45 = arith.constant dense<0xFF800000> : vector<16xf32>
    %138 = vector.multi_reduction <maximumf>, %137, %cst_45 [1] : vector<16x16xf32> to vector<16xf32>
    %139 = vector.shape_cast %138 : vector<16xf32> to vector<16x1xf32>
    %140 = vector.broadcast %139 : vector<16x1xf32> to vector<16x16xf32>
    %141 = arith.subf %137, %140 : vector<16x16xf32>
    %142 = math.exp %141 : vector<16x16xf32>
    %cst_46 = arith.constant dense<0.000000e+00> : vector<16xf32>
    %143 = vector.multi_reduction <add>, %142, %cst_46 [1] : vector<16x16xf32> to vector<16xf32>
    %144 = vector.shape_cast %143 : vector<16xf32> to vector<16x1xf32>
    %145 = tpu.reciprocal %144 {approx = true} : vector<16x1xf32> -> vector<16x1xf32>
    %146 = vector.broadcast %145 : vector<16x1xf32> to vector<16x16xf32>
    %147 = arith.mulf %142, %146 : vector<16x16xf32>
    %148 = arith.truncf %147 : vector<16x16xf32> to vector<16x16xbf16>
    %cst_47 = arith.constant dense<0.000000e+00> : vector<16x32xf32>
    %149 = tpu.matmul %148, %134, %cst_47 {dimension_numbers = #tpu.dot_dimension_numbers<[1], [0], [0], [1], [0, 0, 1, 1], [], []>} : vector<16x16xbf16>, vector<16x32xbf16>, vector<16x32xf32> -> vector<16x32xf32>
    %c0_48 = arith.constant 0 : index
    %c96 = arith.constant 96 : index
    %150 = vector.load %arg32[%c0_48, %c96] : memref<16x128xf32, #tpu.memory_space<vmem>>, vector<16x32xf32>
    tpu.vector_store %arg32[%c0_48, %c96], %149 {strides = array<i32>} : memref<16x128xf32, #tpu.memory_space<vmem>>, vector<16x32xf32>,
    %c0_49 = arith.constant 0 : index
    %c0_50 = arith.constant 0 : index
    %151 = vector.load %arg32[%c0_49, %c0_50] : memref<16x128xf32, #tpu.memory_space<vmem>>, vector<16x128xf32>
    %152 = arith.truncf %151 : vector<16x128xf32> to vector<16x128xbf16>
    %c0_51 = arith.constant 0 : index
    %c0_52 = arith.constant 0 : index
    %153 = vector.load %arg11[%c0_51, %c0_52] : memref<128x128xbf16, #tpu.memory_space<vmem>>, vector<128x128xbf16>
    %cst_53 = arith.constant dense<0.000000e+00> : vector<16x128xf32>
    %154 = tpu.matmul %152, %153, %cst_53 {dimension_numbers = #tpu.dot_dimension_numbers<[1], [0], [0], [1], [0, 0, 1, 1], [], []>} : vector<16x128xbf16>, vector<128x128xbf16>, vector<16x128xf32> -> vector<16x128xf32>
    %155 = arith.addf %11, %154 : vector<16x128xf32>
    %c0_54 = arith.constant 0 : index
    %c0_55 = arith.constant 0 : index
    %156 = vector.load %arg12[%c0_54, %c0_55] : memref<1x128xf32, #tpu.memory_space<vmem>>, vector<1x128xf32>
    %157 = vector.broadcast %156 : vector<1x128xf32> to vector<16x128xf32>
    %158 = arith.addf %155, %157 : vector<16x128xf32>
    %c0_56 = arith.constant 0 : index
    %c0_57 = arith.constant 0 : index
    %159 = vector.load %arg13[%c0_56, %c0_57] : memref<1x128xf32, #tpu.memory_space<vmem>>, vector<1x128xf32>
    %c0_58 = arith.constant 0 : index
    %c0_59 = arith.constant 0 : index
    %160 = vector.load %arg14[%c0_58, %c0_59] : memref<1x128xf32, #tpu.memory_space<vmem>>, vector<1x128xf32>
    %cst_60 = arith.constant dense<0.000000e+00> : vector<16xf32>
    %161 = vector.multi_reduction <add>, %158, %cst_60 [1] : vector<16x128xf32> to vector<16xf32>
    %162 = vector.shape_cast %161 : vector<16xf32> to vector<16x1xf32>
    %cst_61 = arith.constant 1.280000e+02 : f32
    %163 = vector.broadcast %cst_61 : f32 to vector<16x1xf32>
    %164 = arith.divf %162, %163 : vector<16x1xf32>
    %165 = vector.broadcast %164 : vector<16x1xf32> to vector<16x128xf32>
    %166 = arith.subf %158, %165 : vector<16x128xf32>
    %167 = arith.mulf %166, %166 : vector<16x128xf32>
    %cst_62 = arith.constant dense<0.000000e+00> : vector<16xf32>
    %168 = vector.multi_reduction <add>, %167, %cst_62 [1] : vector<16x128xf32> to vector<16xf32>
    %169 = vector.shape_cast %168 : vector<16xf32> to vector<16x1xf32>
    %cst_63 = arith.constant 1.280000e+02 : f32
    %170 = vector.broadcast %cst_63 : f32 to vector<16x1xf32>
    %171 = arith.divf %169, %170 : vector<16x1xf32>
    %cst_64 = arith.constant 9.99999974E-6 : f32
    %172 = vector.broadcast %cst_64 : f32 to vector<16x1xf32>
    %173 = arith.addf %171, %172 : vector<16x1xf32>
    %174 = math.rsqrt %173 : vector<16x1xf32>
    %175 = vector.broadcast %174 : vector<16x1xf32> to vector<16x128xf32>
    %176 = arith.mulf %166, %175 : vector<16x128xf32>
    %177 = vector.broadcast %159 : vector<1x128xf32> to vector<16x128xf32>
    %178 = arith.mulf %176, %177 : vector<16x128xf32>
    %179 = vector.broadcast %160 : vector<1x128xf32> to vector<16x128xf32>
    %180 = arith.addf %178, %179 : vector<16x128xf32>
    %181 = arith.truncf %180 : vector<16x128xf32> to vector<16x128xbf16>
    %c0_65 = arith.constant 0 : index
    %c0_66 = arith.constant 0 : index
    %182 = vector.load %arg15[%c0_65, %c0_66] : memref<128x512xbf16, #tpu.memory_space<vmem>>, vector<128x512xbf16>
    %cst_67 = arith.constant dense<0.000000e+00> : vector<16x512xf32>
    %183 = tpu.matmul %181, %182, %cst_67 {dimension_numbers = #tpu.dot_dimension_numbers<[1], [0], [0], [1], [0, 0, 1, 1], [], []>} : vector<16x128xbf16>, vector<128x512xbf16>, vector<16x512xf32> -> vector<16x512xf32>
    %c0_68 = arith.constant 0 : index
    %c0_69 = arith.constant 0 : index
    %184 = vector.load %arg16[%c0_68, %c0_69] : memref<1x512xf32, #tpu.memory_space<vmem>>, vector<1x512xf32>
    %185 = vector.broadcast %184 : vector<1x512xf32> to vector<16x512xf32>
    %186 = arith.addf %183, %185 : vector<16x512xf32>
    %cst_70 = arith.constant 5.000000e-01 : f32
    %187 = vector.broadcast %cst_70 : f32 to vector<16x512xf32>
    %188 = arith.mulf %187, %186 : vector<16x512xf32>
    %cst_71 = arith.constant 4.471500e-02 : f32
    %189 = vector.broadcast %cst_71 : f32 to vector<16x512xf32>
    %190 = arith.mulf %189, %186 : vector<16x512xf32>
    %191 = arith.mulf %190, %186 : vector<16x512xf32>
    %192 = arith.mulf %191, %186 : vector<16x512xf32>
    %193 = arith.addf %186, %192 : vector<16x512xf32>
    %cst_72 = arith.constant 0.797884583 : f32
    %194 = vector.broadcast %cst_72 : f32 to vector<16x512xf32>
    %195 = arith.mulf %194, %193 : vector<16x512xf32>
    %196 = math.tanh %195 : vector<16x512xf32>
    %cst_73 = arith.constant 1.000000e+00 : f32
    %197 = vector.broadcast %cst_73 : f32 to vector<16x512xf32>
    %198 = arith.addf %197, %196 : vector<16x512xf32>
    %199 = arith.mulf %188, %198 : vector<16x512xf32>
    %200 = arith.truncf %199 : vector<16x512xf32> to vector<16x512xbf16>
    %c0_74 = arith.constant 0 : index
    %c0_75 = arith.constant 0 : index
    %201 = vector.load %arg17[%c0_74, %c0_75] : memref<512x128xbf16, #tpu.memory_space<vmem>>, vector<512x128xbf16>
    %cst_76 = arith.constant dense<0.000000e+00> : vector<16x128xf32>
    %202 = tpu.matmul %200, %201, %cst_76 {dimension_numbers = #tpu.dot_dimension_numbers<[1], [0], [0], [1], [0, 0, 1, 1], [], []>} : vector<16x512xbf16>, vector<512x128xbf16>, vector<16x128xf32> -> vector<16x128xf32>
    %203 = arith.addf %158, %202 : vector<16x128xf32>
    %c0_77 = arith.constant 0 : index
    %c0_78 = arith.constant 0 : index
    %204 = vector.load %arg18[%c0_77, %c0_78] : memref<1x128xf32, #tpu.memory_space<vmem>>, vector<1x128xf32>
    %205 = vector.broadcast %204 : vector<1x128xf32> to vector<16x128xf32>
    %206 = arith.addf %203, %205 : vector<16x128xf32>
    %c0_79 = arith.constant 0 : index
    %c0_80 = arith.constant 0 : index
    %207 = vector.load %arg19[%c0_79, %c0_80] : memref<1x128xf32, #tpu.memory_space<vmem>>, vector<1x128xf32>
    %c0_81 = arith.constant 0 : index
    %c0_82 = arith.constant 0 : index
    %208 = vector.load %arg20[%c0_81, %c0_82] : memref<1x128xf32, #tpu.memory_space<vmem>>, vector<1x128xf32>
    %cst_83 = arith.constant dense<0.000000e+00> : vector<16xf32>
    %209 = vector.multi_reduction <add>, %206, %cst_83 [1] : vector<16x128xf32> to vector<16xf32>
    %210 = vector.shape_cast %209 : vector<16xf32> to vector<16x1xf32>
    %cst_84 = arith.constant 1.280000e+02 : f32
    %211 = vector.broadcast %cst_84 : f32 to vector<16x1xf32>
    %212 = arith.divf %210, %211 : vector<16x1xf32>
    %213 = vector.broadcast %212 : vector<16x1xf32> to vector<16x128xf32>
    %214 = arith.subf %206, %213 : vector<16x128xf32>
    %215 = arith.mulf %214, %214 : vector<16x128xf32>
    %cst_85 = arith.constant dense<0.000000e+00> : vector<16xf32>
    %216 = vector.multi_reduction <add>, %215, %cst_85 [1] : vector<16x128xf32> to vector<16xf32>
    %217 = vector.shape_cast %216 : vector<16xf32> to vector<16x1xf32>
    %cst_86 = arith.constant 1.280000e+02 : f32
    %218 = vector.broadcast %cst_86 : f32 to vector<16x1xf32>
    %219 = arith.divf %217, %218 : vector<16x1xf32>
    %cst_87 = arith.constant 9.99999974E-6 : f32
    %220 = vector.broadcast %cst_87 : f32 to vector<16x1xf32>
    %221 = arith.addf %219, %220 : vector<16x1xf32>
    %222 = math.rsqrt %221 : vector<16x1xf32>
    %223 = vector.broadcast %222 : vector<16x1xf32> to vector<16x128xf32>
    %224 = arith.mulf %214, %223 : vector<16x128xf32>
    %225 = vector.broadcast %207 : vector<1x128xf32> to vector<16x128xf32>
    %226 = arith.mulf %224, %225 : vector<16x128xf32>
    %227 = vector.broadcast %208 : vector<1x128xf32> to vector<16x128xf32>
    %228 = arith.addf %226, %227 : vector<16x128xf32>
    %229 = arith.truncf %228 : vector<16x128xf32> to vector<16x128xbf16>
    %c0_88 = arith.constant 0 : index
    %c0_89 = arith.constant 0 : index
    %230 = vector.load %arg21[%c0_88, %c0_89] : memref<128x384xbf16, #tpu.memory_space<vmem>>, vector<128x384xbf16>
    %cst_90 = arith.constant dense<0.000000e+00> : vector<16x384xf32>
    %231 = tpu.matmul %229, %230, %cst_90 {dimension_numbers = #tpu.dot_dimension_numbers<[1], [0], [0], [1], [0, 0, 1, 1], [], []>} : vector<16x128xbf16>, vector<128x384xbf16>, vector<16x384xf32> -> vector<16x384xf32>
    %c0_91 = arith.constant 0 : index
    %c0_92 = arith.constant 0 : index
    %232 = vector.load %arg22[%c0_91, %c0_92] : memref<1x384xf32, #tpu.memory_space<vmem>>, vector<1x384xf32>
    %233 = vector.broadcast %232 : vector<1x384xf32> to vector<16x384xf32>
    %234 = arith.addf %231, %233 : vector<16x384xf32>
    %235 = vector.extract_strided_slice %234 {offsets = [0, 0], sizes = [16, 32], strides = [1, 1]} : vector<16x384xf32> to vector<16x32xf32>
    %236 = arith.truncf %235 : vector<16x32xf32> to vector<16x32xbf16>
    %237 = vector.extract_strided_slice %234 {offsets = [0, 128], sizes = [16, 32], strides = [1, 1]} : vector<16x384xf32> to vector<16x32xf32>
    %238 = arith.truncf %237 : vector<16x32xf32> to vector<16x32xbf16>
    %239 = vector.extract_strided_slice %234 {offsets = [0, 256], sizes = [16, 32], strides = [1, 1]} : vector<16x384xf32> to vector<16x32xf32>
    %240 = arith.truncf %239 : vector<16x32xf32> to vector<16x32xbf16>
    %cst_93 = arith.constant dense<0.000000e+00> : vector<16x16xf32>
    %241 = tpu.matmul %236, %238, %cst_93 {dimension_numbers = #tpu.dot_dimension_numbers<[1], [1], [0], [0], [0, 0, 1, 0], [], []>} : vector<16x32xbf16>, vector<16x32xbf16>, vector<16x16xf32> -> vector<16x16xf32>
    %cst_94 = arith.constant -1.000000e+30 : f32
    %242 = vector.broadcast %cst_94 : f32 to vector<16x16xf32>
    %243 = arith.select %34, %241, %242 : vector<16x16xi1>, vector<16x16xf32>
    %cst_95 = arith.constant dense<0xFF800000> : vector<16xf32>
    %244 = vector.multi_reduction <maximumf>, %243, %cst_95 [1] : vector<16x16xf32> to vector<16xf32>
    %245 = vector.shape_cast %244 : vector<16xf32> to vector<16x1xf32>
    %246 = vector.broadcast %245 : vector<16x1xf32> to vector<16x16xf32>
    %247 = arith.subf %243, %246 : vector<16x16xf32>
    %248 = math.exp %247 : vector<16x16xf32>
    %cst_96 = arith.constant dense<0.000000e+00> : vector<16xf32>
    %249 = vector.multi_reduction <add>, %248, %cst_96 [1] : vector<16x16xf32> to vector<16xf32>
    %250 = vector.shape_cast %249 : vector<16xf32> to vector<16x1xf32>
    %251 = tpu.reciprocal %250 {approx = true} : vector<16x1xf32> -> vector<16x1xf32>
    %252 = vector.broadcast %251 : vector<16x1xf32> to vector<16x16xf32>
    %253 = arith.mulf %248, %252 : vector<16x16xf32>
    %254 = arith.truncf %253 : vector<16x16xf32> to vector<16x16xbf16>
    %cst_97 = arith.constant dense<0.000000e+00> : vector<16x32xf32>
    %255 = tpu.matmul %254, %240, %cst_97 {dimension_numbers = #tpu.dot_dimension_numbers<[1], [0], [0], [1], [0, 0, 1, 1], [], []>} : vector<16x16xbf16>, vector<16x32xbf16>, vector<16x32xf32> -> vector<16x32xf32>
    %c0_98 = arith.constant 0 : index
    %c0_99 = arith.constant 0 : index
    %256 = vector.load %arg32[%c0_98, %c0_99] : memref<16x128xf32, #tpu.memory_space<vmem>>, vector<16x32xf32>
    tpu.vector_store %arg32[%c0_98, %c0_99], %255 {strides = array<i32>} : memref<16x128xf32, #tpu.memory_space<vmem>>, vector<16x32xf32>,
    %257 = vector.extract_strided_slice %234 {offsets = [0, 32], sizes = [16, 32], strides = [1, 1]} : vector<16x384xf32> to vector<16x32xf32>
    %258 = arith.truncf %257 : vector<16x32xf32> to vector<16x32xbf16>
    %259 = vector.extract_strided_slice %234 {offsets = [0, 160], sizes = [16, 32], strides = [1, 1]} : vector<16x384xf32> to vector<16x32xf32>
    %260 = arith.truncf %259 : vector<16x32xf32> to vector<16x32xbf16>
    %261 = vector.extract_strided_slice %234 {offsets = [0, 288], sizes = [16, 32], strides = [1, 1]} : vector<16x384xf32> to vector<16x32xf32>
    %262 = arith.truncf %261 : vector<16x32xf32> to vector<16x32xbf16>
    %cst_100 = arith.constant dense<0.000000e+00> : vector<16x16xf32>
    %263 = tpu.matmul %258, %260, %cst_100 {dimension_numbers = #tpu.dot_dimension_numbers<[1], [1], [0], [0], [0, 0, 1, 0], [], []>} : vector<16x32xbf16>, vector<16x32xbf16>, vector<16x16xf32> -> vector<16x16xf32>
    %cst_101 = arith.constant -1.000000e+30 : f32
    %264 = vector.broadcast %cst_101 : f32 to vector<16x16xf32>
    %265 = arith.select %34, %263, %264 : vector<16x16xi1>, vector<16x16xf32>
    %cst_102 = arith.constant dense<0xFF800000> : vector<16xf32>
    %266 = vector.multi_reduction <maximumf>, %265, %cst_102 [1] : vector<16x16xf32> to vector<16xf32>
    %267 = vector.shape_cast %266 : vector<16xf32> to vector<16x1xf32>
    %268 = vector.broadcast %267 : vector<16x1xf32> to vector<16x16xf32>
    %269 = arith.subf %265, %268 : vector<16x16xf32>
    %270 = math.exp %269 : vector<16x16xf32>
    %cst_103 = arith.constant dense<0.000000e+00> : vector<16xf32>
    %271 = vector.multi_reduction <add>, %270, %cst_103 [1] : vector<16x16xf32> to vector<16xf32>
    %272 = vector.shape_cast %271 : vector<16xf32> to vector<16x1xf32>
    %273 = tpu.reciprocal %272 {approx = true} : vector<16x1xf32> -> vector<16x1xf32>
    %274 = vector.broadcast %273 : vector<16x1xf32> to vector<16x16xf32>
    %275 = arith.mulf %270, %274 : vector<16x16xf32>
    %276 = arith.truncf %275 : vector<16x16xf32> to vector<16x16xbf16>
    %cst_104 = arith.constant dense<0.000000e+00> : vector<16x32xf32>
    %277 = tpu.matmul %276, %262, %cst_104 {dimension_numbers = #tpu.dot_dimension_numbers<[1], [0], [0], [1], [0, 0, 1, 1], [], []>} : vector<16x16xbf16>, vector<16x32xbf16>, vector<16x32xf32> -> vector<16x32xf32>
    %c0_105 = arith.constant 0 : index
    %c32_106 = arith.constant 32 : index
    %278 = vector.load %arg32[%c0_105, %c32_106] : memref<16x128xf32, #tpu.memory_space<vmem>>, vector<16x32xf32>
    tpu.vector_store %arg32[%c0_105, %c32_106], %277 {strides = array<i32>} : memref<16x128xf32, #tpu.memory_space<vmem>>, vector<16x32xf32>,
    %279 = vector.extract_strided_slice %234 {offsets = [0, 64], sizes = [16, 32], strides = [1, 1]} : vector<16x384xf32> to vector<16x32xf32>
    %280 = arith.truncf %279 : vector<16x32xf32> to vector<16x32xbf16>
    %281 = vector.extract_strided_slice %234 {offsets = [0, 192], sizes = [16, 32], strides = [1, 1]} : vector<16x384xf32> to vector<16x32xf32>
    %282 = arith.truncf %281 : vector<16x32xf32> to vector<16x32xbf16>
    %283 = vector.extract_strided_slice %234 {offsets = [0, 320], sizes = [16, 32], strides = [1, 1]} : vector<16x384xf32> to vector<16x32xf32>
    %284 = arith.truncf %283 : vector<16x32xf32> to vector<16x32xbf16>
    %cst_107 = arith.constant dense<0.000000e+00> : vector<16x16xf32>
    %285 = tpu.matmul %280, %282, %cst_107 {dimension_numbers = #tpu.dot_dimension_numbers<[1], [1], [0], [0], [0, 0, 1, 0], [], []>} : vector<16x32xbf16>, vector<16x32xbf16>, vector<16x16xf32> -> vector<16x16xf32>
    %cst_108 = arith.constant -1.000000e+30 : f32
    %286 = vector.broadcast %cst_108 : f32 to vector<16x16xf32>
    %287 = arith.select %34, %285, %286 : vector<16x16xi1>, vector<16x16xf32>
    %cst_109 = arith.constant dense<0xFF800000> : vector<16xf32>
    %288 = vector.multi_reduction <maximumf>, %287, %cst_109 [1] : vector<16x16xf32> to vector<16xf32>
    %289 = vector.shape_cast %288 : vector<16xf32> to vector<16x1xf32>
    %290 = vector.broadcast %289 : vector<16x1xf32> to vector<16x16xf32>
    %291 = arith.subf %287, %290 : vector<16x16xf32>
    %292 = math.exp %291 : vector<16x16xf32>
    %cst_110 = arith.constant dense<0.000000e+00> : vector<16xf32>
    %293 = vector.multi_reduction <add>, %292, %cst_110 [1] : vector<16x16xf32> to vector<16xf32>
    %294 = vector.shape_cast %293 : vector<16xf32> to vector<16x1xf32>
    %295 = tpu.reciprocal %294 {approx = true} : vector<16x1xf32> -> vector<16x1xf32>
    %296 = vector.broadcast %295 : vector<16x1xf32> to vector<16x16xf32>
    %297 = arith.mulf %292, %296 : vector<16x16xf32>
    %298 = arith.truncf %297 : vector<16x16xf32> to vector<16x16xbf16>
    %cst_111 = arith.constant dense<0.000000e+00> : vector<16x32xf32>
    %299 = tpu.matmul %298, %284, %cst_111 {dimension_numbers = #tpu.dot_dimension_numbers<[1], [0], [0], [1], [0, 0, 1, 1], [], []>} : vector<16x16xbf16>, vector<16x32xbf16>, vector<16x32xf32> -> vector<16x32xf32>
    %c0_112 = arith.constant 0 : index
    %c64_113 = arith.constant 64 : index
    %300 = vector.load %arg32[%c0_112, %c64_113] : memref<16x128xf32, #tpu.memory_space<vmem>>, vector<16x32xf32>
    tpu.vector_store %arg32[%c0_112, %c64_113], %299 {strides = array<i32>} : memref<16x128xf32, #tpu.memory_space<vmem>>, vector<16x32xf32>,
    %301 = vector.extract_strided_slice %234 {offsets = [0, 96], sizes = [16, 32], strides = [1, 1]} : vector<16x384xf32> to vector<16x32xf32>
    %302 = arith.truncf %301 : vector<16x32xf32> to vector<16x32xbf16>
    %303 = vector.extract_strided_slice %234 {offsets = [0, 224], sizes = [16, 32], strides = [1, 1]} : vector<16x384xf32> to vector<16x32xf32>
    %304 = arith.truncf %303 : vector<16x32xf32> to vector<16x32xbf16>
    %305 = vector.extract_strided_slice %234 {offsets = [0, 352], sizes = [16, 32], strides = [1, 1]} : vector<16x384xf32> to vector<16x32xf32>
    %306 = arith.truncf %305 : vector<16x32xf32> to vector<16x32xbf16>
    %cst_114 = arith.constant dense<0.000000e+00> : vector<16x16xf32>
    %307 = tpu.matmul %302, %304, %cst_114 {dimension_numbers = #tpu.dot_dimension_numbers<[1], [1], [0], [0], [0, 0, 1, 0], [], []>} : vector<16x32xbf16>, vector<16x32xbf16>, vector<16x16xf32> -> vector<16x16xf32>
    %cst_115 = arith.constant -1.000000e+30 : f32
    %308 = vector.broadcast %cst_115 : f32 to vector<16x16xf32>
    %309 = arith.select %34, %307, %308 : vector<16x16xi1>, vector<16x16xf32>
    %cst_116 = arith.constant dense<0xFF800000> : vector<16xf32>
    %310 = vector.multi_reduction <maximumf>, %309, %cst_116 [1] : vector<16x16xf32> to vector<16xf32>
    %311 = vector.shape_cast %310 : vector<16xf32> to vector<16x1xf32>
    %312 = vector.broadcast %311 : vector<16x1xf32> to vector<16x16xf32>
    %313 = arith.subf %309, %312 : vector<16x16xf32>
    %314 = math.exp %313 : vector<16x16xf32>
    %cst_117 = arith.constant dense<0.000000e+00> : vector<16xf32>
    %315 = vector.multi_reduction <add>, %314, %cst_117 [1] : vector<16x16xf32> to vector<16xf32>
    %316 = vector.shape_cast %315 : vector<16xf32> to vector<16x1xf32>
    %317 = tpu.reciprocal %316 {approx = true} : vector<16x1xf32> -> vector<16x1xf32>
    %318 = vector.broadcast %317 : vector<16x1xf32> to vector<16x16xf32>
    %319 = arith.mulf %314, %318 : vector<16x16xf32>
    %320 = arith.truncf %319 : vector<16x16xf32> to vector<16x16xbf16>
    %cst_118 = arith.constant dense<0.000000e+00> : vector<16x32xf32>
    %321 = tpu.matmul %320, %306, %cst_118 {dimension_numbers = #tpu.dot_dimension_numbers<[1], [0], [0], [1], [0, 0, 1, 1], [], []>} : vector<16x16xbf16>, vector<16x32xbf16>, vector<16x32xf32> -> vector<16x32xf32>
    %c0_119 = arith.constant 0 : index
    %c96_120 = arith.constant 96 : index
    %322 = vector.load %arg32[%c0_119, %c96_120] : memref<16x128xf32, #tpu.memory_space<vmem>>, vector<16x32xf32>
    tpu.vector_store %arg32[%c0_119, %c96_120], %321 {strides = array<i32>} : memref<16x128xf32, #tpu.memory_space<vmem>>, vector<16x32xf32>,
    %c0_121 = arith.constant 0 : index
    %c0_122 = arith.constant 0 : index
    %323 = vector.load %arg32[%c0_121, %c0_122] : memref<16x128xf32, #tpu.memory_space<vmem>>, vector<16x128xf32>
    %324 = arith.truncf %323 : vector<16x128xf32> to vector<16x128xbf16>
    %c0_123 = arith.constant 0 : index
    %c0_124 = arith.constant 0 : index
    %325 = vector.load %arg23[%c0_123, %c0_124] : memref<128x128xbf16, #tpu.memory_space<vmem>>, vector<128x128xbf16>
    %cst_125 = arith.constant dense<0.000000e+00> : vector<16x128xf32>
    %326 = tpu.matmul %324, %325, %cst_125 {dimension_numbers = #tpu.dot_dimension_numbers<[1], [0], [0], [1], [0, 0, 1, 1], [], []>} : vector<16x128xbf16>, vector<128x128xbf16>, vector<16x128xf32> -> vector<16x128xf32>
    %327 = arith.addf %206, %326 : vector<16x128xf32>
    %c0_126 = arith.constant 0 : index
    %c0_127 = arith.constant 0 : index
    %328 = vector.load %arg24[%c0_126, %c0_127] : memref<1x128xf32, #tpu.memory_space<vmem>>, vector<1x128xf32>
    %329 = vector.broadcast %328 : vector<1x128xf32> to vector<16x128xf32>
    %330 = arith.addf %327, %329 : vector<16x128xf32>
    %c0_128 = arith.constant 0 : index
    %c0_129 = arith.constant 0 : index
    %331 = vector.load %arg25[%c0_128, %c0_129] : memref<1x128xf32, #tpu.memory_space<vmem>>, vector<1x128xf32>
    %c0_130 = arith.constant 0 : index
    %c0_131 = arith.constant 0 : index
    %332 = vector.load %arg26[%c0_130, %c0_131] : memref<1x128xf32, #tpu.memory_space<vmem>>, vector<1x128xf32>
    %cst_132 = arith.constant dense<0.000000e+00> : vector<16xf32>
    %333 = vector.multi_reduction <add>, %330, %cst_132 [1] : vector<16x128xf32> to vector<16xf32>
    %334 = vector.shape_cast %333 : vector<16xf32> to vector<16x1xf32>
    %cst_133 = arith.constant 1.280000e+02 : f32
    %335 = vector.broadcast %cst_133 : f32 to vector<16x1xf32>
    %336 = arith.divf %334, %335 : vector<16x1xf32>
    %337 = vector.broadcast %336 : vector<16x1xf32> to vector<16x128xf32>
    %338 = arith.subf %330, %337 : vector<16x128xf32>
    %339 = arith.mulf %338, %338 : vector<16x128xf32>
    %cst_134 = arith.constant dense<0.000000e+00> : vector<16xf32>
    %340 = vector.multi_reduction <add>, %339, %cst_134 [1] : vector<16x128xf32> to vector<16xf32>
    %341 = vector.shape_cast %340 : vector<16xf32> to vector<16x1xf32>
    %cst_135 = arith.constant 1.280000e+02 : f32
    %342 = vector.broadcast %cst_135 : f32 to vector<16x1xf32>
    %343 = arith.divf %341, %342 : vector<16x1xf32>
    %cst_136 = arith.constant 9.99999974E-6 : f32
    %344 = vector.broadcast %cst_136 : f32 to vector<16x1xf32>
    %345 = arith.addf %343, %344 : vector<16x1xf32>
    %346 = math.rsqrt %345 : vector<16x1xf32>
    %347 = vector.broadcast %346 : vector<16x1xf32> to vector<16x128xf32>
    %348 = arith.mulf %338, %347 : vector<16x128xf32>
    %349 = vector.broadcast %331 : vector<1x128xf32> to vector<16x128xf32>
    %350 = arith.mulf %348, %349 : vector<16x128xf32>
    %351 = vector.broadcast %332 : vector<1x128xf32> to vector<16x128xf32>
    %352 = arith.addf %350, %351 : vector<16x128xf32>
    %353 = arith.truncf %352 : vector<16x128xf32> to vector<16x128xbf16>
    %c0_137 = arith.constant 0 : index
    %c0_138 = arith.constant 0 : index
    %354 = vector.load %arg27[%c0_137, %c0_138] : memref<128x512xbf16, #tpu.memory_space<vmem>>, vector<128x512xbf16>
    %cst_139 = arith.constant dense<0.000000e+00> : vector<16x512xf32>
    %355 = tpu.matmul %353, %354, %cst_139 {dimension_numbers = #tpu.dot_dimension_numbers<[1], [0], [0], [1], [0, 0, 1, 1], [], []>} : vector<16x128xbf16>, vector<128x512xbf16>, vector<16x512xf32> -> vector<16x512xf32>
    %c0_140 = arith.constant 0 : index
    %c0_141 = arith.constant 0 : index
    %356 = vector.load %arg28[%c0_140, %c0_141] : memref<1x512xf32, #tpu.memory_space<vmem>>, vector<1x512xf32>
    %357 = vector.broadcast %356 : vector<1x512xf32> to vector<16x512xf32>
    %358 = arith.addf %355, %357 : vector<16x512xf32>
    %cst_142 = arith.constant 5.000000e-01 : f32
    %359 = vector.broadcast %cst_142 : f32 to vector<16x512xf32>
    %360 = arith.mulf %359, %358 : vector<16x512xf32>
    %cst_143 = arith.constant 4.471500e-02 : f32
    %361 = vector.broadcast %cst_143 : f32 to vector<16x512xf32>
    %362 = arith.mulf %361, %358 : vector<16x512xf32>
    %363 = arith.mulf %362, %358 : vector<16x512xf32>
    %364 = arith.mulf %363, %358 : vector<16x512xf32>
    %365 = arith.addf %358, %364 : vector<16x512xf32>
    %cst_144 = arith.constant 0.797884583 : f32
    %366 = vector.broadcast %cst_144 : f32 to vector<16x512xf32>
    %367 = arith.mulf %366, %365 : vector<16x512xf32>
    %368 = math.tanh %367 : vector<16x512xf32>
    %cst_145 = arith.constant 1.000000e+00 : f32
    %369 = vector.broadcast %cst_145 : f32 to vector<16x512xf32>
    %370 = arith.addf %369, %368 : vector<16x512xf32>
    %371 = arith.mulf %360, %370 : vector<16x512xf32>
    %372 = arith.truncf %371 : vector<16x512xf32> to vector<16x512xbf16>
    %c0_146 = arith.constant 0 : index
    %c0_147 = arith.constant 0 : index
    %373 = vector.load %arg29[%c0_146, %c0_147] : memref<512x128xbf16, #tpu.memory_space<vmem>>, vector<512x128xbf16>
    %cst_148 = arith.constant dense<0.000000e+00> : vector<16x128xf32>
    %374 = tpu.matmul %372, %373, %cst_148 {dimension_numbers = #tpu.dot_dimension_numbers<[1], [0], [0], [1], [0, 0, 1, 1], [], []>} : vector<16x512xbf16>, vector<512x128xbf16>, vector<16x128xf32> -> vector<16x128xf32>
    %375 = arith.addf %330, %374 : vector<16x128xf32>
    %c0_149 = arith.constant 0 : index
    %c0_150 = arith.constant 0 : index
    %376 = vector.load %arg30[%c0_149, %c0_150] : memref<1x128xf32, #tpu.memory_space<vmem>>, vector<1x128xf32>
    %377 = vector.broadcast %376 : vector<1x128xf32> to vector<16x128xf32>
    %378 = arith.addf %375, %377 : vector<16x128xf32>
    %c0_151 = arith.constant 0 : index
    %c0_152 = arith.constant 0 : index
    %379 = vector.load %arg5[%c0_151, %c0_152] : memref<1x128xf32, #tpu.memory_space<vmem>>, vector<1x128xf32>
    %c0_153 = arith.constant 0 : index
    %c0_154 = arith.constant 0 : index
    %380 = vector.load %arg6[%c0_153, %c0_154] : memref<1x128xf32, #tpu.memory_space<vmem>>, vector<1x128xf32>
    %cst_155 = arith.constant dense<0.000000e+00> : vector<16xf32>
    %381 = vector.multi_reduction <add>, %378, %cst_155 [1] : vector<16x128xf32> to vector<16xf32>
    %382 = vector.shape_cast %381 : vector<16xf32> to vector<16x1xf32>
    %cst_156 = arith.constant 1.280000e+02 : f32
    %383 = vector.broadcast %cst_156 : f32 to vector<16x1xf32>
    %384 = arith.divf %382, %383 : vector<16x1xf32>
    %385 = vector.broadcast %384 : vector<16x1xf32> to vector<16x128xf32>
    %386 = arith.subf %378, %385 : vector<16x128xf32>
    %387 = arith.mulf %386, %386 : vector<16x128xf32>
    %cst_157 = arith.constant dense<0.000000e+00> : vector<16xf32>
    %388 = vector.multi_reduction <add>, %387, %cst_157 [1] : vector<16x128xf32> to vector<16xf32>
    %389 = vector.shape_cast %388 : vector<16xf32> to vector<16x1xf32>
    %cst_158 = arith.constant 1.280000e+02 : f32
    %390 = vector.broadcast %cst_158 : f32 to vector<16x1xf32>
    %391 = arith.divf %389, %390 : vector<16x1xf32>
    %cst_159 = arith.constant 9.99999974E-6 : f32
    %392 = vector.broadcast %cst_159 : f32 to vector<16x1xf32>
    %393 = arith.addf %391, %392 : vector<16x1xf32>
    %394 = math.rsqrt %393 : vector<16x1xf32>
    %395 = vector.broadcast %394 : vector<16x1xf32> to vector<16x128xf32>
    %396 = arith.mulf %386, %395 : vector<16x128xf32>
    %397 = vector.broadcast %379 : vector<1x128xf32> to vector<16x128xf32>
    %398 = arith.mulf %396, %397 : vector<16x128xf32>
    %399 = vector.broadcast %380 : vector<1x128xf32> to vector<16x128xf32>
    %400 = arith.addf %398, %399 : vector<16x128xf32>
    %401 = arith.truncf %400 : vector<16x128xf32> to vector<16x128xbf16>
    %c0_160 = arith.constant 0 : index
    %c0_161 = arith.constant 0 : index
    %402 = vector.load %arg3[%c0_160, %c0_161] : memref<128x256xbf16, #tpu.memory_space<vmem>>, vector<128x256xbf16>
    %cst_162 = arith.constant dense<0.000000e+00> : vector<16x256xf32>
    %403 = tpu.matmul %401, %402, %cst_162 {dimension_numbers = #tpu.dot_dimension_numbers<[1], [0], [0], [1], [0, 0, 1, 1], [], []>} : vector<16x128xbf16>, vector<128x256xbf16>, vector<16x256xf32> -> vector<16x256xf32>
    %c0_163 = arith.constant 0 : index
    %c0_164 = arith.constant 0 : index
    %404 = vector.load %arg31[%c0_163, %c0_164] : memref<16x256xf32, #tpu.memory_space<vmem>>, vector<16x256xf32>
    tpu.vector_store %arg31[%c0_163, %c0_164], %403 {strides = array<i32>} : memref<16x256xf32, #tpu.memory_space<vmem>>, vector<16x256xf32>,
    return
  }
  func.func @transform_0(%arg0: i32) -> (i32, i32) {
    %c0_i32 = arith.constant 0 : i32
    %c0_i32_0 = arith.constant 0 : i32
    return %arg0, %c0_i32 : i32, i32
  }
  func.func @transform_1(%arg0: i32) -> (i32, i32) {
    %c0_i32 = arith.constant 0 : i32
    %c0_i32_0 = arith.constant 0 : i32
    %c0_i32_1 = arith.constant 0 : i32
    return %c0_i32, %c0_i32_0 : i32, i32
  }
  func.func @transform_2(%arg0: i32) -> (i32, i32) {
    %c0_i32 = arith.constant 0 : i32
    %c0_i32_0 = arith.constant 0 : i32
    %c0_i32_1 = arith.constant 0 : i32
    return %c0_i32, %c0_i32_0 : i32, i32
  }
  func.func @transform_3(%arg0: i32) -> (i32, i32) {
    %c0_i32 = arith.constant 0 : i32
    %c0_i32_0 = arith.constant 0 : i32
    %c0_i32_1 = arith.constant 0 : i32
    return %c0_i32, %c0_i32_0 : i32, i32
  }
  func.func @transform_4(%arg0: i32) -> (i32, i32) {
    %c0_i32 = arith.constant 0 : i32
    %c0_i32_0 = arith.constant 0 : i32
    %c0_i32_1 = arith.constant 0 : i32
    return %c0_i32, %c0_i32_0 : i32, i32
  }
  func.func @transform_5(%arg0: i32) -> (i32, i32) {
    %c0_i32 = arith.constant 0 : i32
    %c0_i32_0 = arith.constant 0 : i32
    %c0_i32_1 = arith.constant 0 : i32
    return %c0_i32, %c0_i32_0 : i32, i32
  }
  func.func @transform_6(%arg0: i32) -> (i32, i32) {
    %c0_i32 = arith.constant 0 : i32
    %c0_i32_0 = arith.constant 0 : i32
    %c0_i32_1 = arith.constant 0 : i32
    return %c0_i32, %c0_i32_0 : i32, i32
  }
  func.func @transform_7(%arg0: i32) -> (i32, i32) {
    %c0_i32 = arith.constant 0 : i32
    %c0_i32_0 = arith.constant 0 : i32
    %c0_i32_1 = arith.constant 0 : i32
    return %c0_i32, %c0_i32_0 : i32, i32
  }
  func.func @transform_8(%arg0: i32) -> (i32, i32) {
    %c0_i32 = arith.constant 0 : i32
    %c0_i32_0 = arith.constant 0 : i32
    %c0_i32_1 = arith.constant 0 : i32
    return %c0_i32, %c0_i32_0 : i32, i32
  }
  func.func @transform_9(%arg0: i32) -> (i32, i32) {
    %c0_i32 = arith.constant 0 : i32
    %c0_i32_0 = arith.constant 0 : i32
    %c0_i32_1 = arith.constant 0 : i32
    return %c0_i32, %c0_i32_0 : i32, i32
  }
  func.func @transform_10(%arg0: i32) -> (i32, i32) {
    %c0_i32 = arith.constant 0 : i32
    %c0_i32_0 = arith.constant 0 : i32
    %c0_i32_1 = arith.constant 0 : i32
    return %c0_i32, %c0_i32_0 : i32, i32
  }
  func.func @transform_11(%arg0: i32) -> (i32, i32) {
    %c0_i32 = arith.constant 0 : i32
    %c0_i32_0 = arith.constant 0 : i32
    %c0_i32_1 = arith.constant 0 : i32
    return %c0_i32, %c0_i32_0 : i32, i32
  }
  func.func @transform_12(%arg0: i32) -> (i32, i32) {
    %c0_i32 = arith.constant 0 : i32
    %c0_i32_0 = arith.constant 0 : i32
    %c0_i32_1 = arith.constant 0 : i32
    return %c0_i32, %c0_i32_0 : i32, i32
  }
  func.func @transform_13(%arg0: i32) -> (i32, i32) {
    %c0_i32 = arith.constant 0 : i32
    %c0_i32_0 = arith.constant 0 : i32
    %c0_i32_1 = arith.constant 0 : i32
    return %c0_i32, %c0_i32_0 : i32, i32
  }
  func.func @transform_14(%arg0: i32) -> (i32, i32) {
    %c0_i32 = arith.constant 0 : i32
    %c0_i32_0 = arith.constant 0 : i32
    %c0_i32_1 = arith.constant 0 : i32
    return %c0_i32, %c0_i32_0 : i32, i32
  }
  func.func @transform_15(%arg0: i32) -> (i32, i32) {
    %c0_i32 = arith.constant 0 : i32
    %c0_i32_0 = arith.constant 0 : i32
    %c0_i32_1 = arith.constant 0 : i32
    return %c0_i32, %c0_i32_0 : i32, i32
  }
  func.func @transform_16(%arg0: i32) -> (i32, i32) {
    %c0_i32 = arith.constant 0 : i32
    %c0_i32_0 = arith.constant 0 : i32
    %c0_i32_1 = arith.constant 0 : i32
    return %c0_i32, %c0_i32_0 : i32, i32
  }
  func.func @transform_17(%arg0: i32) -> (i32, i32) {
    %c0_i32 = arith.constant 0 : i32
    %c0_i32_0 = arith.constant 0 : i32
    %c0_i32_1 = arith.constant 0 : i32
    return %c0_i32, %c0_i32_0 : i32, i32
  }
  func.func @transform_18(%arg0: i32) -> (i32, i32) {
    %c0_i32 = arith.constant 0 : i32
    %c0_i32_0 = arith.constant 0 : i32
    %c0_i32_1 = arith.constant 0 : i32
    return %c0_i32, %c0_i32_0 : i32, i32
  }
  func.func @transform_19(%arg0: i32) -> (i32, i32) {
    %c0_i32 = arith.constant 0 : i32
    %c0_i32_0 = arith.constant 0 : i32
    %c0_i32_1 = arith.constant 0 : i32
    return %c0_i32, %c0_i32_0 : i32, i32
  }
  func.func @transform_20(%arg0: i32) -> (i32, i32) {
    %c0_i32 = arith.constant 0 : i32
    %c0_i32_0 = arith.constant 0 : i32
    %c0_i32_1 = arith.constant 0 : i32
    return %c0_i32, %c0_i32_0 : i32, i32
  }
  func.func @transform_21(%arg0: i32) -> (i32, i32) {
    %c0_i32 = arith.constant 0 : i32
    %c0_i32_0 = arith.constant 0 : i32
    %c0_i32_1 = arith.constant 0 : i32
    return %c0_i32, %c0_i32_0 : i32, i32
  }
  func.func @transform_22(%arg0: i32) -> (i32, i32) {
    %c0_i32 = arith.constant 0 : i32
    %c0_i32_0 = arith.constant 0 : i32
    %c0_i32_1 = arith.constant 0 : i32
    return %c0_i32, %c0_i32_0 : i32, i32
  }
  func.func @transform_23(%arg0: i32) -> (i32, i32) {
    %c0_i32 = arith.constant 0 : i32
    %c0_i32_0 = arith.constant 0 : i32
    %c0_i32_1 = arith.constant 0 : i32
    return %c0_i32, %c0_i32_0 : i32, i32
  }
  func.func @transform_24(%arg0: i32) -> (i32, i32) {
    %c0_i32 = arith.constant 0 : i32
    %c0_i32_0 = arith.constant 0 : i32
    %c0_i32_1 = arith.constant 0 : i32
    return %c0_i32, %c0_i32_0 : i32, i32
  }
  func.func @transform_25(%arg0: i32) -> (i32, i32) {
    %c0_i32 = arith.constant 0 : i32
    %c0_i32_0 = arith.constant 0 : i32
    %c0_i32_1 = arith.constant 0 : i32
    return %c0_i32, %c0_i32_0 : i32, i32
  }
  func.func @transform_26(%arg0: i32) -> (i32, i32) {
    %c0_i32 = arith.constant 0 : i32
    %c0_i32_0 = arith.constant 0 : i32
    %c0_i32_1 = arith.constant 0 : i32
    return %c0_i32, %c0_i32_0 : i32, i32
  }
  func.func @transform_27(%arg0: i32) -> (i32, i32) {
    %c0_i32 = arith.constant 0 : i32
    %c0_i32_0 = arith.constant 0 : i32
    %c0_i32_1 = arith.constant 0 : i32
    return %c0_i32, %c0_i32_0 : i32, i32
  }
  func.func @transform_28(%arg0: i32) -> (i32, i32) {
    %c0_i32 = arith.constant 0 : i32
    %c0_i32_0 = arith.constant 0 : i32
    %c0_i32_1 = arith.constant 0 : i32
    return %c0_i32, %c0_i32_0 : i32, i32
  }
  func.func @transform_29(%arg0: i32) -> (i32, i32) {
    %c0_i32 = arith.constant 0 : i32
    %c0_i32_0 = arith.constant 0 : i32
    %c0_i32_1 = arith.constant 0 : i32
    return %c0_i32, %c0_i32_0 : i32, i32
  }
  func.func @transform_30(%arg0: i32) -> (i32, i32) {
    %c0_i32 = arith.constant 0 : i32
    %c0_i32_0 = arith.constant 0 : i32
    return %arg0, %c0_i32 : i32, i32
  }
}

</mosaic_0001>

<bundles_post_ra>
// kernel: tpu_custom_call.1
= control target key start
LH: loop header
LB: loop body
LE: loop exit
PB: predicated region body
PF: predicated region fallthrough
CT: control target
= control target key end

     0   :  { %s5155_s6 = smov 1   ;;  %s5156_s10 = smov 2   ;;  %s5856_s0 = inlined_call_operand.smem [shape: u32[31], index: -1, kind: input, shape index: {}] }
   0x1   :  { %s5223_s5 = sld [smem:[%s5856_s0]]   ;;  %s5157_s14 = smov 3  }
   0x2   :  { %s5228_s9 = sld [smem:[%s5856_s0 + %s5155_s6]]   ;;  %s5158_s18 = smov 4  }
   0x3   :  { %s5233_s13 = sld [smem:[%s5856_s0 + %s5156_s10]]   ;;  %s5159_s22 = smov 5  }
   0x4   :  { %s5238_s17 = sld [smem:[%s5856_s0 + %s5157_s14]]   ;;  %s5160_s26 = smov 6  }
   0x5   :  { %s5243_s21 = sld [smem:[%s5856_s0 + %s5158_s18]]   ;;  %s5161_s30 = smov 7  }
   0x6   :  { %s5248_s25 = sld [smem:[%s5856_s0 + %s5159_s22]]   ;;  %s5162_s4 = smov 8  }
   0x7   :  { %5859 = sst [smem:[#allocation40_spill]] %s5223_s5  ;;  %s5163_s10 = smov 9  }
   0x8   :  { %s5253_s29 = sld [smem:[%s5856_s0 + %s5160_s26]]   ;;  %s5164_s15 = smov 10  }
   0x9   :  { %s5258_s3 = sld [smem:[%s5856_s0 + %s5161_s30]]   ;;  %s5165_s20 = smov 11  }
   0xa   :  { %5860 = sst [smem:[#allocation41_spill]] %s5238_s17  ;;  %s5166_s26 = smov 12  }
   0xb   :  { %s5263_s8 = sld [smem:[%s5856_s0 + %s5162_s4]]   ;;  %s5167_s1 = smov 13  }
   0xc   :  { %s5268_s14 = sld [smem:[%s5856_s0 + %s5163_s10]]   ;;  %s5168_s7 = smov 14  }
   0xd   :  { %s5273_s19 = sld [smem:[%s5856_s0 + %s5164_s15]]   ;;  %s5169_s15 = smov 15  }
   0xe   :  { %s5278_s24 = sld [smem:[%s5856_s0 + %s5165_s20]]   ;;  %s5170_s22 = smov 16  }
   0xf   :  { %s5283_s30 = sld [smem:[%s5856_s0 + %s5166_s26]]   ;;  %s5171_s28 = smov 17  }
  0x10   :  { %s5288_s6 = sld [smem:[%s5856_s0 + %s5167_s1]]  }
  0x11   :  { %s5293_s12 = sld [smem:[%s5856_s0 + %s5168_s7]]   ;;  %s5172_s7 = smov 18  }
  0x12   :  { %s5298_s20 = sld [smem:[%s5856_s0 + %s5169_s15]]   ;;  %s5173_s15 = smov 19  }
  0x13   :  { %s5303_s27 = sld [smem:[%s5856_s0 + %s5170_s22]]   ;;  %s5174_s22 = smov 20  }
  0x14   :  { %s5308_s4 = sld [smem:[%s5856_s0 + %s5171_s28]]   ;;  %s5175_s28 = smov 21  }
  0x15   :  { %5861 = sst [smem:[#allocation42_spill]] %s5283_s30 }
  0x16   :  { %5862 = sst [smem:[#allocation43_spill]] %s5288_s6 }
  0x17   :  { %s5313_s6 = sld [smem:[%s5856_s0 + %s5172_s7]]   ;;  %s5176_s7 = smov 22  }
  0x18   :  { %5863 = sst [smem:[#allocation44_spill]] %s5298_s20 }
  0x19   :  { %s5318_s20 = sld [smem:[%s5856_s0 + %s5173_s15]]   ;;  %s5177_s15 = smov 23  }
  0x1a   :  { %5864 = sst [smem:[#allocation45_spill]] %s5308_s4 }
  0x1b   :  { %s5323_s30 = sld [smem:[%s5856_s0 + %s5174_s22]]   ;;  %s5178_s22 = smov 24  }
  0x1c   :  { %s5328_s4 = sld [smem:[%s5856_s0 + %s5175_s28]]   ;;  %s5179_s28 = smov 25  }
  0x1d   :  { %5865 = sst [smem:[#allocation46_spill]] %s5313_s6 }
  0x1e   :  { %s5333_s6 = sld [smem:[%s5856_s0 + %s5176_s7]]   ;;  %s5180_s7 = smov 26  }
  0x1f   :  { %5866 = sst [smem:[#allocation47_spill]] %s5318_s20 }
  0x20   :  { %s5338_s20 = sld [smem:[%s5856_s0 + %s5177_s15]]   ;;  %s5181_s15 = smov 27  }
  0x21   :  { %s5343_s17 = sld [smem:[%s5856_s0 + %s5178_s22]]   ;;  %s5182_s22 = smov 28  }
  0x22   :  { %5867 = sst [smem:[#allocation48_spill]] %s5328_s4 }
  0x23   :  { %s5348_s4 = sld [smem:[%s5856_s0 + %s5179_s28]]   ;;  %s5183_s28 = smov 29  }
  0x24   :  { %s5353_s5 = sld [smem:[%s5856_s0 + %s5180_s7]]   ;;  %s5184_s7 = smov 30  }
  0x26   :  { %5868 = sst [smem:[#allocation49_spill]] %s5338_s20 }
  0x27   :  { %5869 = sst [smem:[#allocation50_spill]] %s5343_s17 }
  0x28   :  { %s5358_s20 = sld [smem:[%s5856_s0 + %s5181_s15]]  }
  0x29   :  { %5870 = sst [smem:[#allocation51_spill]] %s5348_s4 }
  0x2a   :  { %5871 = sst [smem:[#allocation52_spill]] %s5353_s5 }
  0x2b   :  { %s5363_s17 = sld [smem:[%s5856_s0 + %s5182_s22]]  }
  0x2c   :  { %s5368_s4 = sld [smem:[%s5856_s0 + %s5183_s28]]  }
  0x2d   :  { %s5373_s5 = sld [smem:[%s5856_s0 + %s5184_s7]]  }
  0x2e   :  { %66 = vsyncpa [#allocation4], 0 }
  0x2f   :  { %67 = vsyncpa [#allocation7], 0 }
  0x30   :  { %68 = vsyncpa [#allocation10], 0 }
  0x31   :  { %69 = vsyncpa [#allocation13], 0 }
  0x32   :  { %70 = vsyncpa [#allocation16], 0 }
  0x33   :  { %71 = vsyncpa [#allocation19], 0 }
  0x34   :  { %72 = vsyncpa [#allocation22], 0 }
  0x35   :  { %73 = vsyncpa [#allocation25], 0 }
  0x36   :  { %74 = vsyncpa [#allocation28], 0 }
  0x37   :  { %75 = vsyncpa [#allocation5], 0  ;;  %s95_s15 = sshll.u32 %s5233_s13, 4  ;;  %s5185_s16 = smov [#allocation6]   ;;  %s96_s15 = int_to_ptr.hbm [resolvable:$true] %s95_s15 }
  0x38   :  { %s97_s18 = sshll.u32 %s5185_s16, 4  ;;  %s122_s0 = sshll.u32 %s5248_s25, 4  ;;  %s98_s18 = int_to_ptr.vmem [resolvable:$true] %s97_s18  ;;  %s123_s0 = int_to_ptr.hbm [resolvable:$true] %s122_s0 }
  0x39   :  { %s4727_s22 = sshra.s32 %s96_s15, 4  ;;  %s4731_s26 = scalar_lea.hbm %s5233_s13, 128  ;;  %s4728_s22 = int_to_ptr.hbm [resolvable:$true] %s4727_s22 }
  0x3a   :  { %s4729_s23 = scalar_lea.hbm %s4728_s22, 128  ;;  %p4732_p1 = scmp.lt.s32.totalorder %s4728_s22, %s5233_s13 }
  0x3b   :  { %p4730_p0 = scmp.ne.s32.totalorder %s4728_s22, %s4729_s23  ;;  %p4733_p2 = scmp.lt.s32.totalorder %s4731_s26, %s4729_s23 }
  0x3d   :  { %p4734_p3 = por %p4733_p2, %p4732_p1 }
  0x3f   :  { %p4735_p4 = pnand %p4734_p3, %p4730_p0 }
  0x41   :  { %4738 = shalt.err (!%p4735_p4)
}
  0x42   :  { %s5186_s28 = smov 128   ;;  %s5187_s1 = smov 8  }
  0x43   :  { %103 = dma.hbm_to_vmem [thread:$0]  %s96_s15, 2048, %s98_s18, [#allocation7], %s5186_s28, %s5186_s28, %s5187_s1  }
  0x44   :  { %s5188_s2 = smov [#allocation9]   ;;  %s144_s10 = sshll.u32 %s5258_s3, 4  ;;  %s145_s10 = int_to_ptr.hbm [resolvable:$true] %s144_s10 }
  0x45   :  { %s124_s7 = sshll.u32 %s5188_s2, 4  ;;  %s4751_s13 = sshra.s32 %s123_s0, 4  ;;  %s125_s7 = int_to_ptr.vmem [resolvable:$true] %s124_s7  ;;  %s4752_s13 = int_to_ptr.hbm [resolvable:$true] %s4751_s13 }
  0x46   :  { %s4753_s11 = scalar_lea.hbm %s4752_s13, 1  ;;  %s4755_s16 = scalar_lea.hbm %s5248_s25, 1 }
  0x47   :  { %p4754_p5 = scmp.ne.s32.totalorder %s4752_s13, %s4753_s11  ;;  %p4756_p6 = scmp.lt.s32.totalorder %s4752_s13, %s5248_s25 }
  0x48   :  { %p4757_p7 = scmp.lt.s32.totalorder %s4755_s16, %s4753_s11 }
  0x4a   :  { %p4758_p8 = por %p4757_p7, %p4756_p6 }
  0x4c   :  { %p4759_p9 = pnand %p4758_p8, %p4754_p5 }
  0x4e   :  { %4762 = shalt.err (!%p4759_p9)
}
  0x4f   :  { %127 = dma.hbm_to_vmem [thread:$0]  %s123_s0, 16, %s125_s7, [#allocation10]  }
  0x50   :  { %s168_s15 = sshll.u32 %s5268_s14, 4  ;;  %s5189_s18 = smov [#allocation12]   ;;  %s169_s15 = int_to_ptr.hbm [resolvable:$true] %s168_s15 }
  0x51   :  { %s146_s22 = sshll.u32 %s5189_s18, 4  ;;  %s4775_s23 = sshra.s32 %s145_s10, 4  ;;  %s147_s22 = int_to_ptr.vmem [resolvable:$true] %s146_s22  ;;  %s4776_s23 = int_to_ptr.hbm [resolvable:$true] %s4775_s23 }
  0x52   :  { %s4777_s26 = scalar_lea.hbm %s4776_s23, 1  ;;  %s4779_s2 = scalar_lea.hbm %s5258_s3, 1 }
  0x53   :  { %p4778_p10 = scmp.ne.s32.totalorder %s4776_s23, %s4777_s26  ;;  %p4780_p11 = scmp.lt.s32.totalorder %s4776_s23, %s5258_s3 }
  0x54   :  { %p4781_p12 = scmp.lt.s32.totalorder %s4779_s2, %s4777_s26 }
  0x56   :  { %p4782_p13 = por %p4781_p12, %p4780_p11 }
  0x58   :  { %p4783_p0 = pnand %p4782_p13, %p4778_p10 }
  0x5a   :  { %4786 = shalt.err (!%p4783_p0)
}
  0x5b   :  { %149 = dma.hbm_to_vmem [thread:$0]  %s145_s10, 16, %s147_s22, [#allocation13]  }
  0x5c   :  { %s5190_s25 = smov [#allocation15]   ;;  %s192_s7 = sshll.u32 %s5278_s24, 4  ;;  %s193_s7 = int_to_ptr.hbm [resolvable:$true] %s192_s7 }
  0x5d   :  { %s170_s0 = sshll.u32 %s5190_s25, 4  ;;  %s4799_s13 = sshra.s32 %s169_s15, 4  ;;  %s171_s0 = int_to_ptr.vmem [resolvable:$true] %s170_s0  ;;  %s4800_s13 = int_to_ptr.hbm [resolvable:$true] %s4799_s13 }
  0x5e   :  { %s4801_s11 = scalar_lea.hbm %s4800_s13, 3  ;;  %s4803_s16 = scalar_lea.hbm %s5268_s14, 3 }
  0x5f   :  { %p4802_p1 = scmp.ne.s32.totalorder %s4800_s13, %s4801_s11  ;;  %p4804_p2 = scmp.lt.s32.totalorder %s4800_s13, %s5268_s14 }
  0x60   :  { %p4805_p3 = scmp.lt.s32.totalorder %s4803_s16, %s4801_s11 }
  0x62   :  { %p4806_p4 = por %p4805_p3, %p4804_p2 }
  0x64   :  { %p4807_p5 = pnand %p4806_p4, %p4802_p1 }
  0x66   :  { %4810 = shalt.err (!%p4807_p5)
}
  0x67   :  { %173 = dma.hbm_to_vmem [thread:$0]  %s169_s15, 48, %s171_s0, [#allocation16]  }
  0x68   :  { %s5191_s3 = smov [#allocation18]   ;;  %s221_s18 = sshll.u32 %s5303_s27, 4  ;;  %s222_s18 = int_to_ptr.hbm [resolvable:$true] %s221_s18 }
  0x69   :  { %s194_s10 = sshll.u32 %s5191_s3, 4  ;;  %s4823_s22 = sshra.s32 %s193_s7, 4  ;;  %s195_s10 = int_to_ptr.vmem [resolvable:$true] %s194_s10  ;;  %s4824_s22 = int_to_ptr.hbm [resolvable:$true] %s4823_s22 }
  0x6a   :  { %s4825_s23 = scalar_lea.hbm %s4824_s22, 1  ;;  %s4827_s26 = scalar_lea.hbm %s5278_s24, 1 }
  0x6b   :  { %p4826_p6 = scmp.ne.s32.totalorder %s4824_s22, %s4825_s23  ;;  %p4828_p7 = scmp.lt.s32.totalorder %s4824_s22, %s5278_s24 }
  0x6c   :  { %p4829_p8 = scmp.lt.s32.totalorder %s4827_s26, %s4825_s23 }
  0x6e   :  { %p4830_p9 = por %p4829_p8, %p4828_p7 }
  0x70   :  { %p4831_p10 = pnand %p4830_p9, %p4826_p6 }
  0x72   :  { %4834 = shalt.err (!%p4831_p10)
}
  0x73   :  { %197 = dma.hbm_to_vmem [thread:$0]  %s193_s7, 16, %s195_s10, [#allocation19]  }
  0x74   :  { %s5192_s14 = smov [#allocation21]   ;;  %s255_s2 = sshll.u32 %s5333_s6, 4  ;;  %s5395_s2 = int_to_ptr.hbm [resolvable:$true] %s255_s2 }
  0x75   :  { %s223_s15 = sshll.u32 %s5192_s14, 4  ;;  %s4847_s25 = sshra.s32 %s222_s18, 4  ;;  %s224_s15 = int_to_ptr.vmem [resolvable:$true] %s223_s15  ;;  %s4848_s25 = int_to_ptr.hbm [resolvable:$true] %s4847_s25 }
  0x76   :  { %s4849_s0 = scalar_lea.hbm %s4848_s25, 256  ;;  %s4851_s24 = scalar_lea.hbm %s5303_s27, 256 }
  0x77   :  { %p4850_p11 = scmp.ne.s32.totalorder %s4848_s25, %s4849_s0  ;;  %p4852_p12 = scmp.lt.s32.totalorder %s4848_s25, %s5303_s27 }
  0x78   :  { %p4853_p13 = scmp.lt.s32.totalorder %s4851_s24, %s4849_s0 }
  0x7a   :  { %p4854_p0 = por %p4853_p13, %p4852_p12 }
  0x7c   :  { %p4855_p1 = pnand %p4854_p0, %p4850_p11 }
  0x7e   :  { %4858 = shalt.err (!%p4855_p1)
}
  0x7f   :  { %s5193_s7 = smov 64   ;;  %s5194_s13 = smov 4  }
  0x80   :  { %229 = dma.hbm_to_vmem [thread:$0]  %s222_s18, 4096, %s224_s15, [#allocation22], %s5193_s7, %s5193_s7, %s5194_s13  }
  0x81   :  { %s82_s11 = sshll.u32 %s5228_s9, 4  ;;  %s5195_s16 = smov [#allocation24]   ;;  %s5403_s11 = int_to_ptr.hbm [resolvable:$true] %s82_s11 }
  0x82   :  { %s257_s3 = sshll.u32 %s5195_s16, 4  ;;  %s4871_s27 = sshra.s32 %s5395_s2, 4  ;;  %s258_s3 = int_to_ptr.vmem [resolvable:$true] %s257_s3  ;;  %s4872_s27 = int_to_ptr.hbm [resolvable:$true] %s4871_s27 }
  0x83   :  { %s4873_s10 = scalar_lea.hbm %s4872_s27, 64  ;;  %s4875_s22 = scalar_lea.hbm %s5333_s6, 64 }
  0x84   :  { %p4874_p2 = scmp.ne.s32.totalorder %s4872_s27, %s4873_s10  ;;  %p4876_p3 = scmp.lt.s32.totalorder %s4872_s27, %s5333_s6 }
  0x85   :  { %p4877_p4 = scmp.lt.s32.totalorder %s4875_s22, %s4873_s10 }
  0x87   :  { %p4878_p5 = por %p4877_p4, %p4876_p3 }
  0x89   :  { %p4879_p6 = pnand %p4878_p5, %p4874_p2 }
  0x8b   :  { %4882 = shalt.err (!%p4879_p6)
}
  0x8c   :  { %263 = dma.hbm_to_vmem [thread:$0]  %s5395_s2, 1024, %s258_s3, [#allocation25], %s5193_s7, %s5193_s7, %s5194_s13  }
  0x8d   :  { %s5196_s18 = smov [#allocation3]   ;;  %s111_s26 = sshll.u32 %s5243_s21, 4  ;;  %s112_s26 = int_to_ptr.hbm [resolvable:$true] %s111_s26 }
  0x8e   :  { %s84_s23 = sshll.u32 %s5196_s18, 4  ;;  %s4895_s14 = sshra.s32 %s5403_s11, 4  ;;  %s85_s23 = int_to_ptr.vmem [resolvable:$true] %s84_s23  ;;  %s4896_s14 = int_to_ptr.hbm [resolvable:$true] %s4895_s14 }
  0x8f   :  { %s4897_s6 = scalar_lea.hbm %s4896_s14, 256  ;;  %s4899_s15 = scalar_lea.hbm %s5228_s9, 256 }
  0x90   :  { %p4898_p7 = scmp.ne.s32.totalorder %s4896_s14, %s4897_s6  ;;  %p4900_p8 = scmp.lt.s32.totalorder %s4896_s14, %s5228_s9 }
  0x91   :  { %p4901_p9 = scmp.lt.s32.totalorder %s4899_s15, %s4897_s6 }
  0x93   :  { %p4902_p10 = por %p4901_p9, %p4900_p8 }
  0x95   :  { %p4903_p11 = pnand %p4902_p10, %p4898_p7 }
  0x97   :  { %4906 = shalt.err (!%p4903_p11)
}
  0x98   :  { %90 = dma.hbm_to_vmem [thread:$0]  %s5403_s11, 4096, %s85_s23, [#allocation4], %s5186_s28, %s5186_s28, %s5187_s1  }
  0x99   :  { %s133_s2 = sshll.u32 %s5253_s29, 4  ;;  %s5197_s25 = smov [#allocation8]   ;;  %s134_s2 = int_to_ptr.hbm [resolvable:$true] %s133_s2 }
  0x9a   :  { %s113_s0 = sshll.u32 %s5197_s25, 4  ;;  %s4919_s24 = sshra.s32 %s112_s26, 4  ;;  %s114_s0 = int_to_ptr.vmem [resolvable:$true] %s113_s0  ;;  %s4920_s24 = int_to_ptr.hbm [resolvable:$true] %s4919_s24 }
  0x9b   :  { %s4921_s9 = scalar_lea.hbm %s4920_s24, 1  ;;  %s4923_s16 = scalar_lea.hbm %s5243_s21, 1 }
  0x9c   :  { %p4922_p12 = scmp.ne.s32.totalorder %s4920_s24, %s4921_s9  ;;  %p4924_p13 = scmp.lt.s32.totalorder %s4920_s24, %s5243_s21 }
  0x9d   :  { %p4925_p0 = scmp.lt.s32.totalorder %s4923_s16, %s4921_s9 }
  0x9f   :  { %p4926_p1 = por %p4925_p0, %p4924_p13 }
  0xa1   :  { %p4927_p2 = pnand %p4926_p1, %p4922_p12 }
  0xa3   :  { %4930 = shalt.err (!%p4927_p2)
}
  0xa4   :  { %116 = dma.hbm_to_vmem [thread:$0]  %s112_s26, 16, %s114_s0, [#allocation7]  }
  0xa5   :  { %s5198_s28 = smov [#allocation11]   ;;  %s154_s11 = sshll.u32 %s5263_s8, 4  ;;  %s5424_s11 = int_to_ptr.hbm [resolvable:$true] %s154_s11 }
  0xa6   :  { %s135_s1 = sshll.u32 %s5198_s28, 4  ;;  %s4943_s3 = sshra.s32 %s134_s2, 4  ;;  %s136_s1 = int_to_ptr.vmem [resolvable:$true] %s135_s1  ;;  %s4944_s3 = int_to_ptr.hbm [resolvable:$true] %s4943_s3 }
  0xa7   :  { %s4945_s27 = scalar_lea.hbm %s4944_s3, 1  ;;  %s4947_s10 = scalar_lea.hbm %s5253_s29, 1 }
  0xa8   :  { %p4946_p3 = scmp.ne.s32.totalorder %s4944_s3, %s4945_s27  ;;  %p4948_p4 = scmp.lt.s32.totalorder %s4944_s3, %s5253_s29 }
  0xa9   :  { %p4949_p5 = scmp.lt.s32.totalorder %s4947_s10, %s4945_s27 }
  0xab   :  { %p4950_p6 = por %p4949_p5, %p4948_p4 }
  0xad   :  { %p4951_p7 = pnand %p4950_p6, %p4946_p3 }
  0xaf   :  { %4954 = shalt.err (!%p4951_p7)
}
  0xb0   :  { %138 = dma.hbm_to_vmem [thread:$0]  %s134_s2, 16, %s136_s1, [#allocation10]  }
  0xb1   :  { %s5199_s21 = smov [#allocation14]   ;;  %s178_s18 = sshll.u32 %s5273_s19, 4  ;;  %s179_s18 = int_to_ptr.hbm [resolvable:$true] %s178_s18 }
  0xb2   :  { %s156_s22 = sshll.u32 %s5199_s21, 4  ;;  %s4967_s23 = sshra.s32 %s5424_s11, 4  ;;  %s157_s22 = int_to_ptr.vmem [resolvable:$true] %s156_s22  ;;  %s4968_s23 = int_to_ptr.hbm [resolvable:$true] %s4967_s23 }
  0xb3   :  { %s4969_s26 = scalar_lea.hbm %s4968_s23, 192  ;;  %s4971_s14 = scalar_lea.hbm %s5263_s8, 192 }
  0xb4   :  { %p4970_p8 = scmp.ne.s32.totalorder %s4968_s23, %s4969_s26  ;;  %p4972_p9 = scmp.lt.s32.totalorder %s4968_s23, %s5263_s8 }
  0xb5   :  { %p4973_p10 = scmp.lt.s32.totalorder %s4971_s14, %s4969_s26 }
  0xb7   :  { %p4974_p11 = por %p4973_p10, %p4972_p9 }
  0xb9   :  { %p4975_p12 = pnand %p4974_p11, %p4970_p8 }
  0xbb   :  { %4978 = shalt.err (!%p4975_p12)
}
  0xbc   :  { %s5200_s29 = smov 192   ;;  %s5201_s6 = smov 12  }
  0xbd   :  { %162 = dma.hbm_to_vmem [thread:$0]  %s5424_s11, 3072, %s157_s22, [#allocation13], %s5200_s29, %s5200_s29, %s5201_s6  }
  0xbe   :  { %s5202_s15 = smov [#allocation17]   ;;  %s206_s25 = sshll.u32 %s5293_s12, 4  ;;  %s5437_s25 = int_to_ptr.hbm [resolvable:$true] %s206_s25 }
  0xbf   :  { %s180_s2 = sshll.u32 %s5202_s15, 4  ;;  %s4991_s8 = sshra.s32 %s179_s18, 4  ;;  %s181_s2 = int_to_ptr.vmem [resolvable:$true] %s180_s2  ;;  %s4992_s8 = int_to_ptr.hbm [resolvable:$true] %s4991_s8 }
  0xc0   :  { %s4993_s0 = scalar_lea.hbm %s4992_s8, 64  ;;  %s4995_s24 = scalar_lea.hbm %s5273_s19, 64 }
  0xc1   :  { %p4994_p13 = scmp.ne.s32.totalorder %s4992_s8, %s4993_s0  ;;  %p4996_p0 = scmp.lt.s32.totalorder %s4992_s8, %s5273_s19 }
  0xc2   :  { %p4997_p1 = scmp.lt.s32.totalorder %s4995_s24, %s4993_s0 }
  0xc4   :  { %p4998_p2 = por %p4997_p1, %p4996_p0 }
  0xc6   :  { %p4999_p3 = pnand %p4998_p2, %p4994_p13 }
  0xc8   :  { %5002 = shalt.err (!%p4999_p3)
}
  0xc9   :  { %186 = dma.hbm_to_vmem [thread:$0]  %s179_s18, 1024, %s181_s2, [#allocation16], %s5193_s7, %s5193_s7, %s5194_s13  }
  0xca   :  { %s5203_s9 = smov [#allocation20]   ;;  %s240_s28 = sshll.u32 %s5323_s30, 4  ;;  %s241_s28 = int_to_ptr.hbm [resolvable:$true] %s240_s28 }
  0xcb   :  { %s208_s16 = sshll.u32 %s5203_s9, 4  ;;  %s5015_s1 = sshra.s32 %s5437_s25, 4  ;;  %s209_s16 = int_to_ptr.vmem [resolvable:$true] %s208_s16  ;;  %s5016_s1 = int_to_ptr.hbm [resolvable:$true] %s5015_s1 }
  0xcc   :  { %s5017_s11 = scalar_lea.hbm %s5016_s1, 256  ;;  %s5019_s19 = scalar_lea.hbm %s5293_s12, 256 }
  0xcd   :  { %p5018_p4 = scmp.ne.s32.totalorder %s5016_s1, %s5017_s11  ;;  %p5020_p5 = scmp.lt.s32.totalorder %s5016_s1, %s5293_s12 }
  0xce   :  { %p5021_p6 = scmp.lt.s32.totalorder %s5019_s19, %s5017_s11 }
  0xd0   :  { %p5022_p7 = por %p5021_p6, %p5020_p5 }
  0xd2   :  { %p5023_p8 = pnand %p5022_p7, %p5018_p4 }
  0xd4   :  { %5026 = shalt.err (!%p5023_p8)
}
  0xd5   :  { %s5204_s3 = smov 256   ;;  %s5872_s27 = sld [smem:[#allocation52_spill]] }
  0xd6   :  { %s5205_s10 = smov 16   ;;  %s5206_s21 = smov [#allocation23]  }
  0xd7   :  { %214 = dma.hbm_to_vmem [thread:$0]  %s5437_s25, 4096, %s209_s16, [#allocation19], %s5204_s3, %s5204_s3, %s5205_s10  }
  0xd8   :  { %s242_s22 = sshll.u32 %s5206_s21, 4  ;;  %s5039_s12 = sshra.s32 %s241_s28, 4  ;;  %s243_s22 = int_to_ptr.vmem [resolvable:$true] %s242_s22  ;;  %s5040_s12 = int_to_ptr.hbm [resolvable:$true] %s5039_s12 }
  0xd9   :  { %s5041_s23 = scalar_lea.hbm %s5040_s12, 192  ;;  %s5043_s26 = scalar_lea.hbm %s5323_s30, 192 }
  0xda   :  { %p5042_p9 = scmp.ne.s32.totalorder %s5040_s12, %s5041_s23  ;;  %p5044_p10 = scmp.lt.s32.totalorder %s5040_s12, %s5323_s30 }
  0xdb   :  { %s274_s18 = sshll.u32 %s5872_s27, 4  ;;  %p5045_p11 = scmp.lt.s32.totalorder %s5043_s26, %s5041_s23  ;;  %s5453_s18 = int_to_ptr.hbm [resolvable:$true] %s274_s18 }
  0xdd   :  { %p5046_p12 = por %p5045_p11, %p5044_p10 }
  0xdf   :  { %p5047_p13 = pnand %p5046_p12, %p5042_p9 }
  0xe1   :  { %5050 = shalt.err (!%p5047_p13)
}
  0xe2   :  { %248 = dma.hbm_to_vmem [thread:$0]  %s241_s28, 3072, %s243_s22, [#allocation22], %s5200_s29, %s5200_s29, %s5201_s6  }
  0xe3   :  { %s289_s14 = sshll.u32 %s5363_s17, 4  ;;  %s5207_s15 = smov [#allocation26]   ;;  %s5461_s14 = int_to_ptr.hbm [resolvable:$true] %s289_s14 }
  0xe4   :  { %s276_s2 = sshll.u32 %s5207_s15, 4  ;;  %s5063_s25 = sshra.s32 %s5453_s18, 4  ;;  %s277_s2 = int_to_ptr.vmem [resolvable:$true] %s276_s2  ;;  %s5064_s25 = int_to_ptr.hbm [resolvable:$true] %s5063_s25 }
  0xe5   :  { %s5065_s30 = scalar_lea.hbm %s5064_s25, 256  ;;  %s5067_s8 = scalar_lea.hbm %s5872_s27, 256 }
  0xe6   :  { %p5066_p0 = scmp.ne.s32.totalorder %s5064_s25, %s5065_s30  ;;  %p5068_p1 = scmp.lt.s32.totalorder %s5064_s25, %s5872_s27 }
  0xe7   :  { %p5069_p2 = scmp.lt.s32.totalorder %s5067_s8, %s5065_s30 }
  0xe9   :  { %p5070_p3 = por %p5069_p2, %p5068_p1 }
  0xeb   :  { %p5071_p4 = pnand %p5070_p3, %p5066_p0 }
  0xed   :  { %5074 = shalt.err (!%p5071_p4)
}
  0xee   :  { %282 = dma.hbm_to_vmem [thread:$0]  %s5453_s18, 4096, %s277_s2, [#allocation25], %s5204_s3, %s5204_s3, %s5205_s10  }
  0xef   :  { %s5208_s29 = smov [#allocation27]   ;;  %s5087_s0 = sshra.s32 %s5461_s14, 4  ;;  %s5088_s0 = int_to_ptr.hbm [resolvable:$true] %s5087_s0 }
  0xf0   :  { %s291_s6 = sshll.u32 %s5208_s29, 4  ;;  %s5089_s24 = scalar_lea.hbm %s5088_s0, 256  ;;  %s292_s6 = int_to_ptr.vmem [resolvable:$true] %s291_s6 }
  0xf1   :  { %p5090_p5 = scmp.ne.s32.totalorder %s5088_s0, %s5089_s24  ;;  %s5091_s9 = scalar_lea.hbm %s5363_s17, 256 }
  0xf2   :  { %p5092_p6 = scmp.lt.s32.totalorder %s5088_s0, %s5363_s17  ;;  %p5093_p7 = scmp.lt.s32.totalorder %s5091_s9, %s5089_s24 }
  0xf4   :  { %p5094_p8 = por %p5093_p7, %p5092_p6 }
  0xf6   :  { %p5095_p9 = pnand %p5094_p8, %p5090_p5 }
  0xf8   :  { %5098 = shalt.err (!%p5095_p9)
}
  0xf9   :  { %297 = dma.hbm_to_vmem [thread:$0]  %s5461_s14, 4096, %s292_s6, [#allocation28], %s5193_s7, %s5193_s7, %s5194_s13  }
  0xfa   :  { %5135 = dma.done.wait [#allocation4], 4096  }
  0xfb   :  { %5136 = vsyncadd [#allocation4], 4294963200 }
  0xfc   :  { %5137 = dma.done.wait [#allocation7], 2064  }
  0xfd   :  { %5138 = vsyncadd [#allocation7], 4294965232 }
  0xfe   :  { %5139 = dma.done.wait [#allocation10], 32  }
  0xff   :  { %5140 = vsyncadd [#allocation10], 4294967264 }
 0x100   :  { %5141 = dma.done.wait [#allocation13], 3088  }
 0x101   :  { %5142 = vsyncadd [#allocation13], 4294964208 }
 0x102   :  { %5143 = dma.done.wait [#allocation16], 1072  }
 0x103   :  { %5144 = vsyncadd [#allocation16], 4294966224 }
 0x104   :  { %5145 = dma.done.wait [#allocation19], 4112  }
 0x105   :  { %5146 = vsyncadd [#allocation19], 4294963184 }
 0x106   :  { %5147 = dma.done.wait [#allocation22], 7168  }
 0x107   :  { %5148 = vsyncadd [#allocation22], 4294960128 }
 0x108   :  { %5149 = dma.done.wait [#allocation25], 5120  }
 0x109   :  { %5150 = vsyncadd [#allocation25], 4294962176 }
 0x10a   :  { %5151 = dma.done.wait [#allocation28], 4096  }
 0x10b   :  { %5152 = vsyncadd [#allocation28], 4294963200  ;;  %s5873_s17 = sld [smem:[#allocation40_spill]]  ;;  %v5209_v0 = vmov 0   ;;  %v399_v2 = vld [vmem:[#allocation3 + $0x78] sm:$0xff]  ;;  %v398_v4 = vld [vmem:[#allocation3 + $0x70] sm:$0xff]  ;;  %v365_v35 = vlaneseq }
 0x10c   :  { %4594 = vset.pattern.permute.xlu0 %v5209_v0  ;;  %417 = vmatpush.msra.mxu0 %v399_v2  ;;  %v415_v3 = vld [vmem:[#allocation3 + $0xf8] sm:$0xff]  ;;  %v414_v5 = vld [vmem:[#allocation3 + $0xf0] sm:$0xff]  ;;  %v397_v6 = vld [vmem:[#allocation3 + $0x68] sm:$0xff]  ;;  %s5874_s13 = sld [smem:[#allocation41_spill]]  ;;  %v5210_v39 = vmov 1.0   ;;  %v5211_v50 = vmov 128.0  }
 0x10d   :  { %440 = vmatpush.msra.mxu1 %v415_v3  ;;  %v413_v7 = vld [vmem:[#allocation3 + $0xe8] sm:$0xff]  ;;  %v396_v8 = vld [vmem:[#allocation3 + $0x60] sm:$0xff]  ;;  %v395_v11 = vld [vmem:[#allocation3 + $0x58] sm:$0xff]  ;;  %v5480_v36 = vand.u32 127, %v365_v35  ;;  %4609 = vrcp.f32 %v5211_v50  ;;  %vm765_vm11 = vcmask 261120   ;;  %s5212_s16 = smov 96  }
 0x10e   :  { %418 = vmatpush.msra.mxu0 %v398_v4  ;;  %v412_v9 = vld [vmem:[#allocation3 + $0xe0] sm:$0xff]  ;;  %v411_v12 = vld [vmem:[#allocation3 + $0xd8] sm:$0xff]  ;;  %v394_v13 = vld [vmem:[#allocation3 + $0x50] sm:$0xff]  ;;  %vm788_vm13 = vcmask 130048   ;;  %s5213_s28 = smov 32   ;;  %s5879_s1 = sld [smem:[#allocation42_spill]] }
 0x10f   :  { %441 = vmatpush.msra.mxu1 %v414_v5  ;;  %v410_v14 = vld [vmem:[#allocation3 + $0xd0] sm:$0xff]  ;;  %v393_v15 = vld [vmem:[#allocation3 + $0x48] sm:$0xff]  ;;  %v392_v17 = vld [vmem:[#allocation3 + $0x40] sm:$0xff]  ;;  %v367_v37 = vadd.s32 128, %v5480_v36  ;;  %vm485_vm15 = vcmp.ge.s32.totalorder %v5480_v36, 8  ;;  %s5880_s11 = sld [smem:[#allocation43_spill]] }
 0x110   :  { %419 = vmatpush.msra.mxu0 %v397_v6  ;;  %v409_v16 = vld [vmem:[#allocation3 + $0xc8] sm:$0xff]  ;;  %v408_v18 = vld [vmem:[#allocation3 + $0xc0] sm:$0xff]  ;;  %v391_v19 = vld [vmem:[#allocation3 + $0x38] sm:$0xff]  ;;  %s5881_s19 = sld [smem:[#allocation44_spill]]  ;;  %s3423_s26 = sshll.u32 %s5373_s5, 4  ;;  %s3424_s26 = int_to_ptr.hbm [resolvable:$true] %s3423_s26 }
 0x111   :  { %v368_v1 = vld [vmem:[%s5873_s17] sm:$0xff]  ;;  %v369_v10 = vld [vmem:[%s5873_s17 + $0x8] sm:$0xff]  ;;  %442 = vmatpush.msra.mxu1 %v413_v7  ;;  %v389_v23 = vld [vmem:[#allocation3 + $0x28] sm:$0xff]  ;;  %s5882_s27 = sld [smem:[#allocation45_spill]]  ;;  %s5123_s14 = sshra.s32 %s3424_s26, 4  ;;  %s5124_s14 = int_to_ptr.hbm [resolvable:$true] %s5123_s14 }
 0x112   :  { %371 = vperm.xlu0 %4594, %v368_v1   ;;  %420 = vmatpush.msra.mxu0 %v396_v8  ;;  %v407_v20 = vld [vmem:[#allocation3 + $0xb8] sm:$0xff]  ;;  %v390_v21 = vld [vmem:[#allocation3 + $0x30] sm:$0xff]  ;;  %v405_v24 = vld [vmem:[#allocation3 + $0xa8] sm:$0xff]  ;;  %s5883_s21 = sld [smem:[#allocation46_spill]]  ;;  %s5125_s15 = scalar_lea.hbm %s5124_s14, 32 }
 0x113   :  { %443 = vmatpush.msra.mxu1 %v412_v9  ;;  %v406_v22 = vld [vmem:[#allocation3 + $0xb0] sm:$0xff]  ;;  %v388_v25 = vld [vmem:[#allocation3 + $0x20] sm:$0xff]  ;;  %v387_v27 = vld [vmem:[#allocation3 + $0x18] sm:$0xff]  ;;  %v4610_v51 = vpop.eup %4609  ;;  %s5884_s22 = sld [smem:[#allocation47_spill]]  ;;  %p5126_p10 = scmp.ne.s32.totalorder %s5124_s14, %s5125_s15 }
 0x114   :  { %421 = vmatpush.msra.mxu0 %v395_v11  ;;  %v404_v26 = vld [vmem:[#allocation3 + $0xa0] sm:$0xff]  ;;  %v403_v28 = vld [vmem:[#allocation3 + $0x98] sm:$0xff]  ;;  %v386_v29 = vld [vmem:[#allocation3 + $0x10] sm:$0xff]  ;;  %v499_v52 = vmul.f32 128.0, %v4610_v51  ;;  %vm503_vm4 = vweird.f32 %v4610_v51  ;;  %s5885_s18 = sld [smem:[#allocation48_spill]]  ;;  %s5127_s2 = scalar_lea.hbm %s5373_s5, 32 }
 0x115   :  { %444 = vmatpush.msra.mxu1 %v411_v12  ;;  %v402_v30 = vld [vmem:[#allocation3 + $0x90] sm:$0xff]  ;;  %v385_v31 = vld [vmem:[#allocation3 + $0x8] sm:$0xff]  ;;  %v384_v33 = vld [vmem:[#allocation3] sm:$0xff]  ;;  %s5887_s12 = sld [smem:[#allocation50_spill]]  ;;  %p5128_p11 = scmp.lt.s32.totalorder %s5124_s14, %s5373_s5 }
 0x116   :  { %422 = vmatpush.msra.mxu0 %v394_v13  ;;  %v401_v32 = vld [vmem:[#allocation3 + $0x88] sm:$0xff]  ;;  %v400_v34 = vld [vmem:[#allocation3 + $0x80] sm:$0xff]  ;;  %v416_v41 = vld [vmem:[%s5874_s13] sm:$0xff]  ;;  %v500_v53 = vsub.f32 1.0, %v499_v52  ;;  %s5888_s23 = sld [smem:[#allocation51_spill]]  ;;  %p5129_p12 = scmp.lt.s32.totalorder %s5127_s2, %s5125_s15 }
 0x117   :  { %445 = vmatpush.msra.mxu1 %v410_v14  ;;  %v3564_v1 = vld [vmem:[#allocation14 + $0xa8] sm:$0xf]  ;;  %v4348_v2 = vld [vmem:[#allocation14 + $0xb0] sm:$0xf0]  ;;  %v4347_v3 = vld [vmem:[#allocation14 + $0xac] sm:$0xf] }
 0x118   :  { %423 = vmatpush.msra.mxu0 %v393_v15  ;;  %v501_v54 = vmul.f32 %v4610_v51, %v500_v53  ;;  %v3565_v4 = vor.u32 %v4348_v2, %v3564_v1  ;;  %v3566_v5 = vld [vmem:[#allocation14 + $0xb4] sm:$0xf0]  ;;  %v3572_v6 = vld [vmem:[#allocation14 + $0xb0] sm:$0xf]  ;;  %v4349_v7 = vld [vmem:[#allocation14 + $0xb8] sm:$0xf0]  ;;  %p5130_p13 = por %p5129_p12, %p5128_p11 }
 0x119   :  { %446 = vmatpush.msra.mxu1 %v409_v16  ;;  %v3569_v8 = vor.u32 %v4347_v3, %v3566_v5  ;;  %v3573_v9 = vor.u32 %v4349_v7, %v3572_v6  ;;  %v4345_v11 = vld [vmem:[#allocation14 + $0x98] sm:$0xf0]  ;;  %v4344_v12 = vld [vmem:[#allocation14 + $0x94] sm:$0xf]  ;;  %v3554_v14 = vld [vmem:[#allocation14 + $0x9c] sm:$0xf0] }
 0x11a   :  { %374 = vperm.xlu0 %4594, %v369_v10   ;;  %424 = vmatpush.msra.mxu0 %v392_v17  ;;  %v502_v55 = vadd.f32 %v4610_v51, %v501_v54  ;;  %v3552_v10 = vld [vmem:[#allocation14 + $0x90] sm:$0xf]  ;;  %v3560_v15 = vld [vmem:[#allocation14 + $0x98] sm:$0xf]  ;;  %v4346_v16 = vld [vmem:[#allocation14 + $0xa0] sm:$0xf0]  ;;  %v3557_v17 = vor.u32 %v4344_v12, %v3554_v14  ;;  %p5131_p0 = pnand %p5130_p13, %p5126_p10 }
 0x11b   :  { %447 = vmatpush.msra.mxu1 %v408_v18  ;;  %720 = vmatpush.bf16.msra.mxu2 %v3565_v4  ;;  %v3553_v13 = vor.u32 %v4345_v11, %v3552_v10  ;;  %v3561_v18 = vor.u32 %v4346_v16, %v3560_v15  ;;  %v3504_v50 = vld [vmem:[#allocation14 + $0x30] sm:$0xf]  ;;  %v4332_v52 = vld [vmem:[#allocation14 + $0x34] sm:$0xf]  ;;  %v3506_v54 = vld [vmem:[#allocation14 + $0x3c] sm:$0xf0] }
 0x11c   :  { %425 = vmatpush.msra.mxu0 %v391_v19  ;;  %v5492_v56 = vsel %vm503_vm4, %v4610_v51, %v502_v55  ;;  %734 = vmatpush.bf16.msra.mxu3 %v3569_v8  ;;  %v3540_v19 = vld [vmem:[#allocation14 + $0x78] sm:$0xf]  ;;  %v4333_v51 = vld [vmem:[#allocation14 + $0x38] sm:$0xf0]  ;;  %v3494_v2 = vld [vmem:[#allocation14 + $0x24] sm:$0xf0] }
 0x11d   :  { %448 = vmatpush.msra.mxu1 %v407_v20  ;;  %v4342_v20 = vld [vmem:[#allocation14 + $0x80] sm:$0xf0]  ;;  %v3505_v53 = vor.u32 %v4333_v51, %v3504_v50  ;;  %v3512_v55 = vld [vmem:[#allocation14 + $0x38] sm:$0xf]  ;;  %v3500_v3 = vld [vmem:[#allocation14 + $0x20] sm:$0xf] }
 0x11e   :  { %426 = vmatpush.msra.mxu0 %v390_v21  ;;  %v4341_v21 = vld [vmem:[#allocation14 + $0x7c] sm:$0xf]  ;;  %v4331_v4 = vld [vmem:[#allocation14 + $0x28] sm:$0xf0]  ;;  %v3480_v7 = vld [vmem:[#allocation14] sm:$0xf] }
 0x11f   :  { %449 = vmatpush.msra.mxu1 %v406_v22  ;;  %721 = vmatpush.bf16.msra.mxu2 %v3553_v13  ;;  %v3541_v22 = vor.u32 %v4342_v20, %v3540_v19  ;;  %v3501_v6 = vor.u32 %v4331_v4, %v3500_v3  ;;  %v4327_v8 = vld [vmem:[#allocation14 + $0x8] sm:$0xf0]  ;;  %v3482_v12 = vld [vmem:[#allocation14 + $0xc] sm:$0xf0]  ;;  %v3488_v13 = vld [vmem:[#allocation14 + $0x8] sm:$0xf] }
 0x120   :  { %427 = vmatpush.msra.mxu0 %v389_v23  ;;  %735 = vmatpush.bf16.msra.mxu3 %v3557_v17  ;;  %v3542_v23 = vld [vmem:[#allocation14 + $0x84] sm:$0xf0]  ;;  %v3481_v11 = vor.u32 %v4327_v8, %v3480_v7  ;;  %v4328_v14 = vld [vmem:[#allocation14 + $0x10] sm:$0xf0]  ;;  %v584_v50 = vld [vmem:[#allocation15] sm:$0x7] }
 0x121   :  { %450 = vmatpush.msra.mxu1 %v405_v24  ;;  %v3548_v24 = vld [vmem:[#allocation14 + $0x80] sm:$0xf]  ;;  %v3489_v17 = vor.u32 %v4328_v14, %v3488_v13  ;;  %v588_v51 = vperm.slane %v584_v50, 2 }
 0x122   :  { %428 = vmatpush.msra.mxu0 %v388_v25  ;;  %v4343_v25 = vld [vmem:[#allocation14 + $0x88] sm:$0xf0] }
 0x123   :  { %451 = vmatpush.msra.mxu1 %v404_v26  ;;  %v3545_v26 = vor.u32 %v4341_v21, %v3542_v23  ;;  %722 = vmatpush.bf16.msra.mxu2 %v3541_v22 }
 0x124   :  { %429 = vmatpush.msra.mxu0 %v387_v27  ;;  %v3549_v27 = vor.u32 %v4343_v25, %v3548_v24 }
 0x125   :  { %452 = vmatpush.msra.mxu1 %v403_v28  ;;  %736 = vmatpush.bf16.msra.mxu3 %v3545_v26  ;;  %v3528_v28 = vld [vmem:[#allocation14 + $0x60] sm:$0xf] }
 0x126   :  { %430 = vmatpush.msra.mxu0 %v386_v29  ;;  %v4339_v29 = vld [vmem:[#allocation14 + $0x68] sm:$0xf0] }
 0x127   :  { %453 = vmatpush.msra.mxu1 %v402_v30  ;;  %v4338_v30 = vld [vmem:[#allocation14 + $0x64] sm:$0xf] }
 0x128   :  { %431 = vmatpush.msra.mxu0 %v385_v31  ;;  %v3529_v31 = vor.u32 %v4339_v29, %v3528_v28 }
 0x129   :  { %454 = vmatpush.msra.mxu1 %v401_v32  ;;  %v3530_v32 = vld [vmem:[#allocation14 + $0x6c] sm:$0xf0] }
 0x12a   :  { %432 = vmatpush.msra.mxu0 %v384_v33  ;;  %v3536_v33 = vld [vmem:[#allocation14 + $0x68] sm:$0xf]  ;;  %723 = vmatpush.bf16.msra.mxu2 %v3529_v31 }
 0x12b   :  { %455 = vmatpush.msra.mxu1 %v400_v34  ;;  %v4340_v34 = vld [vmem:[#allocation14 + $0x70] sm:$0xf0] }
 0x12c   :  { %748 = vmatpush.bf16.msrb.mxu0 %v3573_v9  ;;  %v4326_v9 = vld [vmem:[#allocation14 + $0x4] sm:$0xf] }
 0x12d   :  { %v3485_v16 = vor.u32 %v4326_v9, %v3482_v12  ;;  %v464_v9 = vshrl.u32 %v365_v35, 7 }
 0x12f   :  { %vm5525_vm12 = vcmp.le.s32.totalorder %v5480_v36, %v464_v9 }
 0x130   :  { %749 = vmatpush.bf16.msrb.mxu0 %v3561_v18 }
 0x134   :  { %750 = vmatpush.bf16.msrb.mxu0 %v3549_v27 }
 0x184   :  { %v372_v38 = vpop.permute.xlu0 %371 }
 0x185   :  { %vm376_vm0 = vcmp.eq.s32.totalorder %v5480_v36, %v372_v38  ;;  %vm377_vm1 = vcmp.eq.s32.totalorder %v367_v37, %v372_v38  ;;  %v3537_v38 = vor.u32 %v4340_v34, %v3536_v33 }
 0x186   :  { %3474 = vmatmul.msk.f32.vlgmr.msra.gmra.mxu0 %vm376_vm0, %v5210_v39  ;;  %3476 = vmatmul.msk.f32.vlgmr.msra.gmra.mxu1 %vm377_vm1, %v5210_v39  ;;  %vm911_vm1 = vcmask 523520  }
 0x187   :  { %751 = vmatpush.bf16.msrb.mxu0 %v3537_v38 }
 0x18c   :  { %v375_v40 = vpop.permute.xlu0 %374 }
 0x18d   :  { %vm378_vm2 = vcmp.eq.s32.totalorder %v5480_v36, %v375_v40  ;;  %vm379_vm3 = vcmp.eq.s32.totalorder %v367_v37, %v375_v40  ;;  %v3533_v37 = vor.u32 %v4338_v30, %v3530_v32  ;;  %v4336_v40 = vld [vmem:[#allocation14 + $0x50] sm:$0xf0] }
 0x18e   :  { %3475 = vmatmul.msk.f32.gmra.mxu0 %vm378_vm2, %v5210_v39  ;;  %3477 = vmatmul.msk.f32.gmra.mxu1 %vm379_vm3, %v5210_v39  ;;  %v3516_v39 = vld [vmem:[#allocation14 + $0x48] sm:$0xf]  ;;  %vm991_vm2 = vcmask 785920   ;;  %vm1071_vm3 = vcmask 1048320  }
 0x18f   :  { %737 = vmatpush.bf16.msra.mxu3 %v3533_v37  ;;  %v4595_v37 = vld [vmem:[#allocation11] ss:$0 sm:$0xff] }
 0x203   :  { %v434_v42 = vpop.f32.mrf.mxu0  ;;  %v457_v43 = vpop.f32.mrf.mxu1 }
 0x204   :  { %v435_v44 = vadd.f32 %v434_v42, %v416_v41  ;;  %v3517_v42 = vor.u32 %v4336_v40, %v3516_v39 }
 0x206   :  { %v5486_v45 = vadd.f32 %v457_v43, %v435_v44  ;;  %v3518_v43 = vld [vmem:[#allocation14 + $0x54] sm:$0xf0]  ;;  %v3524_v44 = vld [vmem:[#allocation14 + $0x50] sm:$0xf]  ;;  %724 = vmatpush.bf16.msra.mxu2 %v3517_v42  ;;  %v4596_v42 = vld [vmem:[#allocation12] ss:$0 sm:$0xff] }
 0x208   :  { %494 = vadd.xlane.f32.xlu1 %v5486_v45 }
 0x20a   :  { %725 = vmatpush.bf16.msra.mxu2 %v3505_v53 }
 0x20b   :  { %v437_v46 = vpop.f32.mrf.mxu0  ;;  %v460_v48 = vpop.f32.mrf.mxu1 }
 0x20c   :  { %v438_v47 = vadd.f32 %v437_v46, %v416_v41  ;;  %v4335_v41 = vld [vmem:[#allocation14 + $0x4c] sm:$0xf]  ;;  %v4337_v46 = vld [vmem:[#allocation14 + $0x58] sm:$0xf0] }
 0x20e   :  { %v5489_v49 = vadd.f32 %v460_v48, %v438_v47  ;;  %v3521_v47 = vor.u32 %v4335_v41, %v3518_v43  ;;  %v3525_v48 = vor.u32 %v4337_v46, %v3524_v44 }
 0x210   :  { %496 = vadd.xlane.f32.xlu1 %v5489_v49  ;;  %738 = vmatpush.bf16.msra.mxu3 %v3521_v47 }
 0x211   :  { %752 = vmatpush.bf16.msrb.mxu0 %v3525_v48 }
 0x27b   :  { %v495_v57 = vpop.xlane.xlu1 %494 }
 0x27c   :  { %v505_v58 = vmul.f32 %v5492_v56, %v495_v57  ;;  %v4334_v57 = vld [vmem:[#allocation14 + $0x40] sm:$0xf0] }
 0x27e   :  { %v5496_v59 = vsub.f32 %v5486_v45, %v505_v58  ;;  %v3509_v58 = vor.u32 %v4332_v52, %v3506_v54 }
 0x280   :  { %v509_v60 = vmul.f32 %v5496_v59, %v5496_v59  ;;  %739 = vmatpush.bf16.msra.mxu3 %v3509_v58  ;;  %v587_v58 = vperm.slane %v584_v50, 1 }
 0x282   :  { %511 = vadd.xlane.f32.xlu2 %v509_v60  ;;  %v3513_v60 = vor.u32 %v4334_v57, %v3512_v55  ;;  %v586_v57 = vperm.slane %v584_v50, 0 }
 0x283   :  { %v497_v61 = vpop.xlane.xlu1 %496 }
 0x284   :  { %v506_v62 = vmul.f32 %v5492_v56, %v497_v61  ;;  %753 = vmatpush.bf16.msrb.mxu0 %v3513_v60  ;;  %v3492_v61 = vld [vmem:[#allocation14 + $0x18] sm:$0xf] }
 0x286   :  { %v5502_v63 = vsub.f32 %v5489_v49, %v506_v62  ;;  %v4330_v62 = vld [vmem:[#allocation14 + $0x20] sm:$0xf0] }
 0x287   :  { %v3493_v1 = vor.u32 %v4330_v62, %v3492_v61 }
 0x288   :  { %v510_v0 = vmul.f32 %v5502_v63, %v5502_v63  ;;  %754 = vmatpush.bf16.msrb.mxu0 %v3501_v6 }
 0x289   :  { %726 = vmatpush.bf16.msra.mxu2 %v3493_v1 }
 0x28a   :  { %513 = vadd.xlane.f32.xlu2 %v510_v0  ;;  %v4329_v0 = vld [vmem:[#allocation14 + $0x1c] sm:$0xf] }
 0x28b   :  { %v3497_v5 = vor.u32 %v4329_v0, %v3494_v2 }
 0x28c   :  { %755 = vmatpush.bf16.msrb.mxu0 %v3489_v17 }
 0x28d   :  { %740 = vmatpush.bf16.msra.mxu3 %v3497_v5  ;;  %727 = vmatpush.bf16.msra.mxu2 %v3481_v11  ;;  %v465_v11 = vadd.s32 8, %v464_v9 }
 0x28f   :  { %vm476_vm14 = vcmp.le.s32.totalorder %v5480_v36, %v465_v11 }
 0x290   :  { %vm5534_vm0 = vmand %vm485_vm15, %vm476_vm14 }
 0x291   :  { %741 = vmatpush.bf16.msra.mxu3 %v3485_v16 }
 0x2f5   :  { %v512_v10 = vpop.xlane.xlu2 %511 }
 0x2f6   :  { %v515_v15 = vmul.f32 %v512_v10, %v5492_v56 }
 0x2f8   :  { %v517_v18 = vadd.f32 1e-05, %v515_v15 }
 0x2fa   :  { %4611 = vrsqrt.f32 %v517_v18  ;;  %vm525_vm6 = vweird.f32 %v517_v18 }
 0x2fd   :  { %v514_v19 = vpop.xlane.xlu2 %513 }
 0x2fe   :  { %v516_v20 = vmul.f32 %v514_v19, %v5492_v56 }
 0x300   :  { %v4612_v21 = vpop.eup %4611  ;;  %v518_v22 = vadd.f32 1e-05, %v516_v20 }
 0x301   :  { %v520_v23 = vmul.f32 %v4612_v21, %v517_v18  ;;  %vm526_vm5 = vweird.f32 %v4612_v21 }
 0x302   :  { %4613 = vrsqrt.f32 %v518_v22  ;;  %vm527_vm7 = vmor %vm525_vm6, %vm526_vm5  ;;  %vm535_vm9 = vweird.f32 %v518_v22 }
 0x303   :  { %v521_v24 = vmul.f32 %v4612_v21, %v520_v23 }
 0x305   :  { %v522_v25 = vmul.f32 0.5, %v521_v24 }
 0x307   :  { %v523_v26 = vsub.f32 1.5, %v522_v25 }
 0x308   :  { %v4614_v27 = vpop.eup %4613 }
 0x309   :  { %v524_v28 = vmul.f32 %v4612_v21, %v523_v26  ;;  %v530_v29 = vmul.f32 %v4614_v27, %v518_v22  ;;  %vm536_vm8 = vweird.f32 %v4614_v27 }
 0x30a   :  { %vm537_vm10 = vmor %vm535_vm9, %vm536_vm8 }
 0x30b   :  { %v531_v30 = vmul.f32 %v4614_v27, %v530_v29  ;;  %v528_v31 = vsel %vm527_vm7, %v4612_v21, %v524_v28 }
 0x30c   :  { %v539_v34 = vmul.f32 %v528_v31, %v5496_v59 }
 0x30d   :  { %v532_v32 = vmul.f32 0.5, %v531_v30 }
 0x30e   :  { %v544_v41 = vmul.f32 %v4595_v37, %v539_v34 }
 0x30f   :  { %v533_v33 = vsub.f32 1.5, %v532_v32 }
 0x310   :  { %v549_v44 = vadd.f32 %v4596_v42, %v544_v41 }
 0x311   :  { %v534_v38 = vmul.f32 %v4614_v27, %v533_v33 }
 0x313   :  { %v538_v39 = vsel %vm537_vm10, %v4614_v27, %v534_v38 }
 0x314   :  { %v540_v40 = vmul.f32 %v538_v39, %v5502_v63 }
 0x316   :  { %v545_v43 = vmul.f32 %v4595_v37, %v540_v40 }
 0x318   :  { %v550_v46 = vadd.f32 %v4596_v42, %v545_v43 }
 0x31a   :  { %v551_v47 = vpack.c.bf16 %v550_v46, %v549_v44 }
 0x31c   :  { %728 = vmatmul.bf16.vlgmr.msra.gmra.mxu2 %v551_v47  ;;  %742 = vmatmul.bf16.vlgmr.msra.gmra.mxu3 %v551_v47 }
 0x31d   :  { %756 = vmatmul.bf16.vlgmr.msrb.gmra.mxu0 %v551_v47 }
 0x39a   :  { %v757_v48 = vpop.f32.mrf.mxu0 }
 0x39b   :  { %v758_v54 = vadd.f32 %v757_v48, %v588_v51 }
 0x39f   :  { %v729_v59 = vpop.f32.mrf.mxu2  ;;  %v743_v52 = vpop.f32.mrf.mxu3 }
 0x3a0   :  { %v730_v62 = vadd.f32 %v729_v59, %v586_v57  ;;  %v744_v0 = vadd.f32 %v743_v52, %v587_v58 }
 0x3a2   :  { %v759_v53 = vpop.f32.mrf.mxu0 }
 0x3a3   :  { %v760_v55 = vadd.f32 %v759_v53, %v588_v51 }
 0x3a5   :  { %v5510_v63 = vpack.c.bf16 %v760_v55, %v758_v54 }
 0x3a7   :  { %822 = vmatpush.bf16.msrb.mxu2 %v5510_v63  ;;  %v731_v60 = vpop.f32.mrf.mxu2  ;;  %v745_v61 = vpop.f32.mrf.mxu3 }
 0x3a8   :  { %v732_v1 = vadd.f32 %v731_v60, %v586_v57  ;;  %v746_v2 = vadd.f32 %v745_v61, %v587_v58 }
 0x3aa   :  { %v5513_v3 = vpack.c.bf16 %v732_v1, %v730_v62  ;;  %v763_v4 = vpack.c.bf16 %v746_v2, %v744_v0 }
 0x3ac   :  { %835 = vrot.lane.b32.xlu0 %v763_v4, %s5212_s16  ;;  %832 = vrot.lane.b32.xlu1 %v5513_v3, %s5212_s16  ;;  %v770_v5 = vsel %vm765_vm11, %v763_v4, 0 }
 0x3ad   :  { %779 = vmatpush.bf16.xpose.msrb.mxu1 %v770_v5 }
 0x3b4   :  { %3574 = vmatmul.msk.bf16.vlgmr.msrb.gmra.mxu1 %vm765_vm11, %v5513_v3 }
 0x41e   :  { %v836_v6 = vpop.permute.xlu0 %835  ;;  %v833_v8 = vpop.permute.xlu1 %832 }
 0x41f   :  { %v841_v7 = vsel %vm765_vm11, %v836_v6, 0 }
 0x420   :  { %850 = vmatpush.bf16.xpose.msrb.mxu3 %v841_v7 }
 0x427   :  { %3576 = vmatmul.msk.bf16.vlgmr.msrb.gmra.mxu3 %vm765_vm11, %v833_v8 }
 0x431   :  { %v781_v12 = vpop.f32.mrf.mxu1 }
 0x432   :  { %v786_v13 = vsel %vm5525_vm12, %v781_v12, -1e+30 }
 0x433   :  { %v789_v14 = vsel %vm788_vm13, %v786_v13, -inf }
 0x434   :  { %790 = vmax.xlane.f32.xlu2 %v789_v14 }
 0x439   :  { %v783_v15 = vpop.f32.mrf.mxu1 }
 0x43a   :  { %v787_v16 = vsel %vm5534_vm0, %v783_v15, -1e+30 }
 0x43b   :  { %v792_v17 = vsel %vm788_vm13, %v787_v16, -inf }
 0x43c   :  { %793 = vmax.xlane.f32.xlu0 %v792_v17 }
 0x450   :  { %883 = vrot.lane.b32.xlu0 %v5510_v63, %s5212_s16 }
 0x458   :  { %996 = vrot.lane.b32.xlu0 %v763_v4, %s5213_s28 }
 0x4a7   :  { %v791_v18 = vpop.xlane.xlu2 %790 }
 0x4a8   :  { %v795_v19 = vsub.f32 %v786_v13, %v791_v18 }
 0x4aa   :  { %v797_v36 = vmul.f32 1.442695, %v795_v19  ;;  %v852_v20 = vpop.f32.mrf.mxu3 }
 0x4ab   :  { %v857_v21 = vsel %vm5525_vm12, %v852_v20, -1e+30 }
 0x4ac   :  { %4615 = vpow2.f32 %v797_v36  ;;  %v859_v22 = vsel %vm788_vm13, %v857_v21, -inf }
 0x4ad   :  { %860 = vmax.xlane.f32.xlu2 %v859_v22 }
 0x4af   :  { %v794_v23 = vpop.xlane.xlu0 %793 }
 0x4b0   :  { %v796_v24 = vsub.f32 %v787_v16, %v794_v23 }
 0x4b2   :  { %v4616_v25 = vpop.eup %4615  ;;  %v799_v26 = vmul.f32 1.442695, %v796_v24  ;;  %v854_v28 = vpop.f32.mrf.mxu3 }
 0x4b3   :  { %v801_v27 = vsel %vm788_vm13, %v4616_v25, 0.0  ;;  %v858_v29 = vsel %vm5534_vm0, %v854_v28, -1e+30 }
 0x4b4   :  { %4617 = vpow2.f32 %v799_v26  ;;  %v862_v32 = vsel %vm788_vm13, %v858_v29, -inf }
 0x4b5   :  { %802 = vadd.xlane.f32.xlu2 %v801_v27 }
 0x4ba   :  { %v4618_v30 = vpop.eup %4617 }
 0x4bb   :  { %v804_v31 = vsel %vm788_vm13, %v4618_v30, 0.0 }
 0x4bc   :  { %805 = vadd.xlane.f32.xlu1 %v804_v31 }
 0x4bd   :  { %863 = vmax.xlane.f32.xlu2 %v862_v32 }
 0x4c2   :  { %v884_v33 = vpop.permute.xlu0 %883 }
 0x4c3   :  { %896 = vmatpush.bf16.msra.mxu1 %v884_v33 }
 0x4ca   :  { %v997_v34 = vpop.permute.xlu0 %996 }
 0x4cb   :  { %v1002_v37 = vsel %vm765_vm11, %v997_v34, 0 }
 0x4cc   :  { %1011 = vmatpush.bf16.xpose.msrb.mxu1 %v1002_v37 }
 0x4d5   :  { %916 = vrot.lane.b32.xlu2 %v763_v4, %s5193_s7  ;;  %914 = vrot.lane.b32.xlu1 %v5513_v3, %s5193_s7 }
 0x520   :  { %v861_v38 = vpop.xlane.xlu2 %860 }
 0x521   :  { %v865_v39 = vsub.f32 %v857_v21, %v861_v38 }
 0x523   :  { %v867_v40 = vmul.f32 1.442695, %v865_v39 }
 0x525   :  { %4619 = vpow2.f32 %v867_v40 }
 0x528   :  { %v803_v41 = vpop.xlane.xlu2 %802 }
 0x529   :  { %4621 = vrcp.f32 %v803_v41 }
 0x52b   :  { %v4620_v42 = vpop.eup %4619 }
 0x52c   :  { %v871_v43 = vsel %vm788_vm13, %v4620_v42, 0.0 }
 0x52d   :  { %872 = vadd.xlane.f32.xlu2 %v871_v43 }
 0x52f   :  { %v806_v44 = vpop.xlane.xlu1 %805  ;;  %v4622_v50 = vpop.eup %4621 }
 0x530   :  { %4623 = vrcp.f32 %v806_v44  ;;  %v864_v46 = vpop.xlane.xlu2 %863  ;;  %v809_v59 = vmul.f32 %v4622_v50, %v4616_v25 }
 0x531   :  { %v866_v47 = vsub.f32 %v858_v29, %v864_v46 }
 0x533   :  { %v869_v48 = vmul.f32 1.442695, %v866_v47 }
 0x535   :  { %4625 = vpow2.f32 %v869_v48 }
 0x536   :  { %v4624_v51 = vpop.eup %4623 }
 0x537   :  { %v810_v52 = vmul.f32 %v4624_v51, %v4618_v30 }
 0x538   :  { %v917_v53 = vpop.permute.xlu2 %916 }
 0x539   :  { %v922_v54 = vsel %vm765_vm11, %v917_v53, 0  ;;  %v811_v55 = vpack.c.bf16 %v810_v52, %v809_v59 }
 0x53a   :  { %931 = vmatpush.bf16.xpose.msra.mxu2 %v922_v54 }
 0x53b   :  { %v4626_v57 = vpop.eup %4625  ;;  %3575 = vmatmul.msk.bf16.vlgmr.msrb.gmra.mxu2 %vm788_vm13, %v811_v55 }
 0x53c   :  { %v874_v58 = vsel %vm788_vm13, %v4626_v57, 0.0 }
 0x53d   :  { %875 = vadd.xlane.f32.xlu2 %v874_v58 }
 0x547   :  { %v915_v60 = vpop.permute.xlu1 %914 }
 0x54b   :  { %3578 = vmatmul.msk.bf16.vlgmr.msra.gmra.mxu2 %vm765_vm11, %v915_v60 }
 0x555   :  { %994 = vrot.lane.b32.xlu2 %v5513_v3, %s5213_s28 }
 0x5a0   :  { %v873_v61 = vpop.xlane.xlu2 %872 }
 0x5a1   :  { %4627 = vrcp.f32 %v873_v61 }
 0x5a7   :  { %v4628_v0 = vpop.eup %4627 }
 0x5a8   :  { %v879_v2 = vmul.f32 %v4628_v0, %v4620_v42 }
 0x5b0   :  { %v876_v62 = vpop.xlane.xlu2 %875 }
 0x5b1   :  { %4629 = vrcp.f32 %v876_v62 }
 0x5b7   :  { %v4630_v1 = vpop.eup %4629 }
 0x5b8   :  { %v880_v4 = vmul.f32 %v4630_v1, %v4626_v57  ;;  %v995_v8 = vpop.permute.xlu2 %994 }
 0x5ba   :  { %v881_v5 = vpack.c.bf16 %v880_v4, %v879_v2 }
 0x5bc   :  { %3577 = vmatmul.msk.bf16.vlgmr.msra.gmra.mxu1 %vm788_vm13, %v881_v5  ;;  %v4357_v5 = vld [vmem:[#allocation17 + $0x38] sm:$0xff] }
 0x5bd   :  { %1141 = vmatpush.bf16.msrb.mxu2 %v4357_v5  ;;  %v4381_v5 = vld [vmem:[#allocation20 + $0xb4] sm:$0xf0] }
 0x5be   :  { %v824_v6 = vpop.f32.mrf.mxu2 }
 0x5bf   :  { %829 = vst.msk [vmem:[#allocation2] sm:$0xff] %vm765_vm11, %v824_v6  ;;  %v4356_v6 = vld [vmem:[#allocation17 + $0x30] sm:$0xff] }
 0x5c1   :  { %1142 = vmatpush.bf16.msrb.mxu2 %v4356_v6 }
 0x5c6   :  { %v826_v7 = vpop.f32.mrf.mxu2 }
 0x5c7   :  { %830 = vst.msk [vmem:[#allocation2 + $0x8] sm:$0xff] %vm765_vm11, %v826_v7 }
 0x5cc   :  { %3580 = vmatmul.msk.bf16.vlgmr.msrb.gmra.mxu1 %vm765_vm11, %v995_v8 }
 0x5ce   :  { %v933_v3 = vpop.f32.mrf.mxu2 }
 0x5cf   :  { %v938_v9 = vsel %vm5525_vm12, %v933_v3, -1e+30 }
 0x5d0   :  { %v940_v11 = vsel %vm788_vm13, %v938_v9, -inf }
 0x5d1   :  { %941 = vmax.xlane.f32.xlu0 %v940_v11  ;;  %v4354_v11 = vld [vmem:[#allocation17 + $0x20] sm:$0xff] }
 0x5d6   :  { %v935_v12 = vpop.f32.mrf.mxu2 }
 0x5d7   :  { %v939_v13 = vsel %vm5534_vm0, %v935_v12, -1e+30  ;;  %v4353_v12 = vld [vmem:[#allocation17 + $0x18] sm:$0xff] }
 0x5d8   :  { %v943_v14 = vsel %vm788_vm13, %v939_v13, -inf }
 0x5d9   :  { %944 = vmax.xlane.f32.xlu2 %v943_v14  ;;  %v4351_v14 = vld [vmem:[#allocation17 + $0x8] sm:$0xff] }
 0x639   :  { %v898_v15 = vpop.f32.mrf.mxu1 }
 0x641   :  { %v900_v16 = vpop.f32.mrf.mxu1 }
 0x644   :  { %v942_v17 = vpop.xlane.xlu0 %941 }
 0x645   :  { %v946_v18 = vsub.f32 %v938_v9, %v942_v17  ;;  %v4355_v9 = vld [vmem:[#allocation17 + $0x28] sm:$0xff] }
 0x646   :  { %1143 = vmatpush.bf16.msrb.mxu2 %v4355_v9 }
 0x647   :  { %v948_v19 = vmul.f32 1.442695, %v946_v18 }
 0x649   :  { %4631 = vpow2.f32 %v948_v19  ;;  %v1013_v36 = vpop.f32.mrf.mxu1 }
 0x64a   :  { %v1018_v20 = vsel %vm5525_vm12, %v1013_v36, -1e+30  ;;  %1144 = vmatpush.bf16.msrb.mxu2 %v4354_v11  ;;  %v3680_v11 = vld [vmem:[#allocation20 + $0x80] sm:$0xf] }
 0x64b   :  { %v1020_v21 = vsel %vm788_vm13, %v1018_v20, -inf }
 0x64c   :  { %v945_v22 = vpop.xlane.xlu2 %944  ;;  %1021 = vmax.xlane.f32.xlu1 %v1020_v21 }
 0x64d   :  { %v947_v23 = vsub.f32 %v939_v13, %v945_v22  ;;  %v4352_v13 = vld [vmem:[#allocation17 + $0x10] sm:$0xff] }
 0x64e   :  { %1145 = vmatpush.bf16.msrb.mxu2 %v4353_v12  ;;  %v4376_v12 = vld [vmem:[#allocation20 + $0x8c] sm:$0xf0] }
 0x64f   :  { %v4632_v24 = vpop.eup %4631  ;;  %v950_v25 = vmul.f32 1.442695, %v947_v23 }
 0x650   :  { %v952_v26 = vsel %vm788_vm13, %v4632_v24, 0.0 }
 0x651   :  { %v1015_v27 = vpop.f32.mrf.mxu1  ;;  %953 = vadd.xlane.f32.xlu2 %v952_v26  ;;  %4633 = vpow2.f32 %v950_v25 }
 0x652   :  { %v1019_v28 = vsel %vm5534_vm0, %v1015_v27, -1e+30  ;;  %1146 = vmatpush.bf16.msrb.mxu2 %v4352_v13  ;;  %v4374_v13 = vld [vmem:[#allocation20 + $0x84] sm:$0xf] }
 0x653   :  { %v1023_v29 = vsel %vm788_vm13, %v1019_v28, -inf }
 0x654   :  { %1024 = vmax.xlane.f32.xlu0 %v1023_v29 }
 0x656   :  { %1147 = vmatpush.bf16.msrb.mxu2 %v4351_v14  ;;  %v3681_v14 = vor.u32 %v4376_v12, %v3680_v11  ;;  %v4361_v11 = vld [vmem:[#allocation20 + $0x14] sm:$0xf0]  ;;  %v4359_v12 = vld [vmem:[#allocation20 + $0xc] sm:$0xf] }
 0x657   :  { %v4634_v30 = vpop.eup %4633 }
 0x658   :  { %v955_v31 = vsel %vm788_vm13, %v4634_v30, 0.0 }
 0x65c   :  { %956 = vadd.xlane.f32.xlu0 %v955_v31 }
 0x670   :  { %963 = vrot.lane.b32.xlu0 %v5510_v63, %s5193_s7 }
 0x678   :  { %907 = vrot.lane.b32.xlu0 %v900_v16, %s5213_s28 }
 0x6bf   :  { %v1022_v32 = vpop.xlane.xlu1 %1021 }
 0x6c0   :  { %v1026_v33 = vsub.f32 %v1018_v20, %v1022_v32  ;;  %v4597_v20 = vld [vmem:[#allocation18] ss:$0 sm:$0xff] }
 0x6c2   :  { %v1028_v34 = vmul.f32 1.442695, %v1026_v33  ;;  %v3728_v33 = vld [vmem:[#allocation20 + $0xe0] sm:$0xf] }
 0x6c4   :  { %4635 = vpow2.f32 %v1028_v34  ;;  %v954_v46 = vpop.xlane.xlu2 %953  ;;  %v4388_v34 = vld [vmem:[#allocation20 + $0xec] sm:$0xf0] }
 0x6c7   :  { %v1025_v37 = vpop.xlane.xlu0 %1024 }
 0x6c8   :  { %v1027_v38 = vsub.f32 %v1019_v28, %v1025_v37  ;;  %v4386_v37 = vld [vmem:[#allocation20 + $0xe4] sm:$0xf] }
 0x6ca   :  { %v4636_v39 = vpop.eup %4635  ;;  %v1030_v40 = vmul.f32 1.442695, %v1027_v38  ;;  %v3729_v38 = vor.u32 %v4388_v34, %v3728_v33  ;;  %v4371_v33 = vld [vmem:[#allocation20 + $0x6c] sm:$0xf]  ;;  %v3674_v34 = vld [vmem:[#allocation20 + $0x78] sm:$0xf0] }
 0x6cb   :  { %v1032_v41 = vsel %vm788_vm13, %v4636_v39, 0.0 }
 0x6cc   :  { %4637 = vpow2.f32 %v1030_v40  ;;  %1033 = vadd.xlane.f32.xlu2 %v1032_v41  ;;  %v3736_v40 = vld [vmem:[#allocation20 + $0xe8] sm:$0xf]  ;;  %v4389_v41 = vld [vmem:[#allocation20 + $0xf4] sm:$0xf0] }
 0x6cf   :  { %v957_v44 = vpop.xlane.xlu0 %956 }
 0x6d0   :  { %4639 = vrcp.f32 %v957_v44  ;;  %v4387_v44 = vld [vmem:[#allocation20 + $0xec] sm:$0xf] }
 0x6d1   :  { %4641 = vrcp.f32 %v954_v46  ;;  %v3738_v46 = vld [vmem:[#allocation20 + $0xf8] sm:$0xf0] }
 0x6d2   :  { %v4638_v42 = vpop.eup %4637 }
 0x6d3   :  { %v1035_v43 = vsel %vm788_vm13, %v4638_v42, 0.0 }
 0x6d4   :  { %1036 = vadd.xlane.f32.xlu1 %v1035_v43  ;;  %v3737_v43 = vor.u32 %v4389_v41, %v3736_v40  ;;  %v4366_v40 = vld [vmem:[#allocation20 + $0x44] sm:$0xf] }
 0x6d6   :  { %v4640_v47 = vpop.eup %4639 }
 0x6d7   :  { %v4642_v48 = vpop.eup %4641  ;;  %v961_v50 = vmul.f32 %v4640_v47, %v4634_v30  ;;  %v3741_v47 = vor.u32 %v4387_v44, %v3738_v46  ;;  %v4369_v44 = vld [vmem:[#allocation20 + $0x54] sm:$0xf0] }
 0x6d8   :  { %v960_v51 = vmul.f32 %v4642_v48, %v4632_v24  ;;  %v3712_v48 = vld [vmem:[#allocation20 + $0xc0] sm:$0xf] }
 0x6da   :  { %v962_v52 = vpack.c.bf16 %v961_v50, %v960_v51  ;;  %v4384_v50 = vld [vmem:[#allocation20 + $0xcc] sm:$0xf0]  ;;  %v4382_v51 = vld [vmem:[#allocation20 + $0xc4] sm:$0xf] }
 0x6e2   :  { %v964_v59 = vpop.permute.xlu0 %963 }
 0x6e3   :  { %976 = vmatpush.bf16.msra.mxu3 %v964_v59  ;;  %v3713_v59 = vor.u32 %v4384_v50, %v3712_v48  ;;  %v4367_v48 = vld [vmem:[#allocation20 + $0x4c] sm:$0xf]  ;;  %v3658_v50 = vld [vmem:[#allocation20 + $0x58] sm:$0xf0] }
 0x6e4   :  { %1043 = vrot.lane.b32.xlu2 %v5510_v63, %s5213_s28 }
 0x6e6   :  { %3579 = vmatmul.msk.bf16.vlgmr.msra.gmra.mxu3 %vm788_vm13, %v962_v52  ;;  %v3714_v52 = vld [vmem:[#allocation20 + $0xd0] sm:$0xf0] }
 0x6e7   :  { %1418 = vmatpush.bf16.msrb.mxu3 %v3729_v38  ;;  %v3648_v38 = vld [vmem:[#allocation20 + $0x40] sm:$0xf] }
 0x6ea   :  { %v908_v53 = vpop.permute.xlu0 %907 }
 0x6eb   :  { %913 = vst.msk [vmem:[#allocation2 + $0x8] sm:$0xff] %vm911_vm1, %v908_v53  ;;  %v3720_v53 = vld [vmem:[#allocation20 + $0xc8] sm:$0xf]  ;;  %1419 = vmatpush.bf16.msrb.mxu3 %v3713_v59  ;;  %v3632_v59 = vld [vmem:[#allocation20 + $0x20] sm:$0xf] }
 0x6ed   :  { %905 = vrot.lane.b32.xlu1 %v898_v15, %s5213_s28  ;;  %v4350_v15 = vld [vmem:[#allocation17] sm:$0xff] }
 0x6ee   :  { %1148 = vmatpush.bf16.msrb.mxu2 %v4350_v15  ;;  %v3682_v15 = vld [vmem:[#allocation20 + $0x90] sm:$0xf0] }
 0x6f2   :  { %1460 = vmatpush.bf16.msra.mxu2 %v3741_v47 }
 0x73f   :  { %v1034_v54 = vpop.xlane.xlu2 %1033 }
 0x740   :  { %4643 = vrcp.f32 %v1034_v54  ;;  %v4385_v54 = vld [vmem:[#allocation20 + $0xd4] sm:$0xf0] }
 0x746   :  { %v4644_v58 = vpop.eup %4643 }
 0x747   :  { %v1044_v55 = vpop.permute.xlu2 %1043  ;;  %v1037_v57 = vpop.xlane.xlu1 %1036  ;;  %v1040_v61 = vmul.f32 %v4644_v58, %v4636_v39  ;;  %v3730_v39 = vld [vmem:[#allocation20 + $0xf0] sm:$0xf0]  ;;  %v4383_v58 = vld [vmem:[#allocation20 + $0xcc] sm:$0xf] }
 0x748   :  { %4645 = vrcp.f32 %v1037_v57  ;;  %1056 = vmatpush.bf16.msra.mxu1 %v1044_v55  ;;  %v3717_v55 = vor.u32 %v4382_v51, %v3714_v52  ;;  %v3721_v57 = vor.u32 %v4385_v54, %v3720_v53  ;;  %v3661_v51 = vor.u32 %v4367_v48, %v3658_v50  ;;  %v4364_v52 = vld [vmem:[#allocation20 + $0x2c] sm:$0xf0]  ;;  %v4362_v53 = vld [vmem:[#allocation20 + $0x24] sm:$0xf]  ;;  %v4413_v48 = vld [vmem:[#allocation21 + $0xb8] sm:$0xff] }
 0x749   :  { %v3633_v54 = vor.u32 %v4364_v52, %v3632_v59  ;;  %v4412_v50 = vld [vmem:[#allocation21 + $0xb0] sm:$0xff]  ;;  %v4403_v59 = vld [vmem:[#allocation21 + $0x68] sm:$0xff] }
 0x74a   :  { %v4411_v52 = vld [vmem:[#allocation21 + $0xa8] sm:$0xff] }
 0x74c   :  { %1446 = vmatpush.bf16.msrb.mxu1 %v3737_v43  ;;  %v3656_v43 = vld [vmem:[#allocation20 + $0x48] sm:$0xf] }
 0x74d   :  { %v3657_v47 = vor.u32 %v4369_v44, %v3656_v43 }
 0x74e   :  { %v4646_v60 = vpop.eup %4645 }
 0x74f   :  { %v1041_v62 = vmul.f32 %v4646_v60, %v4638_v42  ;;  %v3733_v42 = vor.u32 %v4386_v37, %v3730_v39  ;;  %v3722_v60 = vld [vmem:[#allocation20 + $0xd8] sm:$0xf0]  ;;  %v3677_v37 = vor.u32 %v4371_v33, %v3674_v34  ;;  %v4368_v39 = vld [vmem:[#allocation20 + $0x4c] sm:$0xf0]  ;;  %v4598_v34 = vld [vmem:[%s5879_s1] ss:$0 sm:$0xff] }
 0x750   :  { %1447 = vmatpush.bf16.msrb.mxu1 %v3721_v57  ;;  %v3649_v41 = vor.u32 %v4368_v39, %v3648_v38  ;;  %v3640_v57 = vld [vmem:[#allocation20 + $0x28] sm:$0xf] }
 0x751   :  { %v1042_v0 = vpack.c.bf16 %v1041_v62, %v1040_v61  ;;  %1432 = vmatpush.bf16.msra.mxu0 %v3733_v42  ;;  %v3725_v61 = vor.u32 %v4383_v58, %v3722_v60  ;;  %v3696_v62 = vld [vmem:[#allocation20 + $0xa0] sm:$0xf]  ;;  %v3650_v42 = vld [vmem:[#allocation20 + $0x50] sm:$0xf0]  ;;  %v4365_v58 = vld [vmem:[#allocation20 + $0x34] sm:$0xf0] }
 0x752   :  { %v3653_v46 = vor.u32 %v4366_v40, %v3650_v42 }
 0x753   :  { %3581 = vmatmul.msk.bf16.vlgmr.msra.gmra.mxu1 %vm788_vm13, %v1042_v0  ;;  %v4380_v0 = vld [vmem:[#allocation20 + $0xac] sm:$0xf0]  ;;  %1461 = vmatpush.bf16.msra.mxu2 %v3725_v61 }
 0x755   :  { %1433 = vmatpush.bf16.msra.mxu0 %v3717_v55  ;;  %v3634_v55 = vld [vmem:[#allocation20 + $0x30] sm:$0xf0] }
 0x756   :  { %v3637_v61 = vor.u32 %v4362_v53, %v3634_v55  ;;  %v4396_v53 = vld [vmem:[#allocation21 + $0x30] sm:$0xff]  ;;  %v4402_v55 = vld [vmem:[#allocation21 + $0x60] sm:$0xff] }
 0x75f   :  { %v906_v63 = vpop.permute.xlu1 %905 }
 0x760   :  { %912 = vst.msk [vmem:[#allocation2] sm:$0xff] %vm911_vm1, %v906_v63  ;;  %v4378_v63 = vld [vmem:[#allocation20 + $0xa4] sm:$0xf] }
 0x769   :  { %v978_v1 = vpop.f32.mrf.mxu3 }
 0x76a   :  { %985 = vrot.lane.b32.xlu2 %v978_v1, %s5193_s7  ;;  %v3697_v1 = vor.u32 %v4380_v0, %v3696_v62  ;;  %v3641_v62 = vor.u32 %v4365_v58, %v3640_v57  ;;  %v4363_v0 = vld [vmem:[#allocation20 + $0x2c] sm:$0xf]  ;;  %v4410_v57 = vld [vmem:[#allocation21 + $0xa0] sm:$0xff] }
 0x76b   :  { %v4395_v58 = vld [vmem:[#allocation21 + $0x28] sm:$0xff] }
 0x76c   :  { %1420 = vmatpush.bf16.msrb.mxu3 %v3697_v1  ;;  %v3616_v1 = vld [vmem:[#allocation20] sm:$0xf] }
 0x770   :  { %1421 = vmatpush.bf16.msrb.mxu3 %v3681_v14 }
 0x771   :  { %v980_v2 = vpop.f32.mrf.mxu3 }
 0x772   :  { %987 = vrot.lane.b32.xlu0 %v980_v2, %s5193_s7  ;;  %v3698_v2 = vld [vmem:[#allocation20 + $0xb0] sm:$0xf0] }
 0x773   :  { %v3701_v6 = vor.u32 %v4378_v63, %v3698_v2  ;;  %v3642_v63 = vld [vmem:[#allocation20 + $0x38] sm:$0xf0] }
 0x775   :  { %1434 = vmatpush.bf16.msra.mxu0 %v3701_v6  ;;  %v4358_v6 = vld [vmem:[#allocation20 + $0x4] sm:$0xf] }
 0x7c4   :  { %v986_v4 = vpop.permute.xlu2 %985 }
 0x7c5   :  { %992 = vst.msk [vmem:[#allocation2] sm:$0xff] %vm991_vm2, %v986_v4  ;;  %v3704_v4 = vld [vmem:[#allocation20 + $0xa8] sm:$0xf] }
 0x7d0   :  { %v1058_v7 = vpop.f32.mrf.mxu1 }
 0x7d1   :  { %1065 = vrot.lane.b32.xlu1 %v1058_v7, %s5212_s16  ;;  %v3705_v7 = vor.u32 %v4381_v5, %v3704_v4  ;;  %v3645_v4 = vor.u32 %v4363_v0, %v3642_v63  ;;  %v4360_v5 = vld [vmem:[#allocation20 + $0xc] sm:$0xf0]  ;;  %v4394_v0 = vld [vmem:[#allocation21 + $0x20] sm:$0xff] }
 0x7d2   :  { %v4418_v63 = vld [vmem:[#allocation21 + $0xe0] sm:$0xff] }
 0x7d3   :  { %1448 = vmatpush.bf16.msrb.mxu1 %v3705_v7  ;;  %v3618_v7 = vld [vmem:[#allocation20 + $0x10] sm:$0xf0] }
 0x7d8   :  { %v1060_v8 = vpop.f32.mrf.mxu1 }
 0x7d9   :  { %1067 = vrot.lane.b32.xlu2 %v1060_v8, %s5212_s16  ;;  %v4379_v8 = vld [vmem:[#allocation20 + $0xac] sm:$0xf] }
 0x7e4   :  { %v988_v3 = vpop.permute.xlu0 %987 }
 0x7e5   :  { %993 = vst.msk [vmem:[#allocation2 + $0x8] sm:$0xff] %vm991_vm2, %v988_v3  ;;  %v3706_v3 = vld [vmem:[#allocation20 + $0xb8] sm:$0xf0] }
 0x7e6   :  { %v3709_v9 = vor.u32 %v4379_v8, %v3706_v3  ;;  %v3617_v8 = vor.u32 %v4360_v5, %v3616_v1  ;;  %v3621_v3 = vor.u32 %v4358_v6, %v3618_v7  ;;  %v4400_v1 = vld [vmem:[#allocation21 + $0x50] sm:$0xff]  ;;  %v4417_v5 = vld [vmem:[#allocation21 + $0xd8] sm:$0xff]  ;;  %v5628_v6 = vld [vmem:[%s5881_s19] sm:$0xf] }
 0x7e7   :  { %v4399_v7 = vld [vmem:[#allocation21 + $0x48] sm:$0xff] }
 0x7e8   :  { %1462 = vmatpush.bf16.msra.mxu2 %v3709_v9  ;;  %v3624_v9 = vld [vmem:[#allocation20 + $0x8] sm:$0xf] }
 0x7e9   :  { %v3625_v14 = vor.u32 %v4361_v11, %v3624_v9  ;;  %v4416_v9 = vld [vmem:[#allocation21 + $0xd0] sm:$0xff]  ;;  %v4398_v11 = vld [vmem:[#allocation21 + $0x40] sm:$0xff] }
 0x833   :  { %v1068_v16 = vpop.permute.xlu2 %1067 }
 0x834   :  { %1073 = vst.msk [vmem:[#allocation2 + $0x8] sm:$0xff] %vm1071_vm3, %v1068_v16  ;;  %v3688_v16 = vld [vmem:[#allocation20 + $0x88] sm:$0xf] }
 0x83b   :  { %v1075_v19 = vld [vmem:[#allocation2 + $0x8] sm:$0xff] }
 0x843   :  { %v1066_v17 = vpop.permute.xlu1 %1065 }
 0x844   :  { %1072 = vst.msk [vmem:[#allocation2] sm:$0xff] %vm1071_vm3, %v1066_v17  ;;  %v4377_v17 = vld [vmem:[#allocation20 + $0x94] sm:$0xf0] }
 0x84b   :  { %v1074_v18 = vld [vmem:[#allocation2] sm:$0xff] }
 0x84c   :  { %v1076_v36 = vpack.c.bf16 %v1075_v19, %v1074_v18  ;;  %v3685_v18 = vor.u32 %v4374_v13, %v3682_v15  ;;  %v3689_v19 = vor.u32 %v4377_v17, %v3688_v16  ;;  %v3626_v15 = vld [vmem:[#allocation20 + $0x18] sm:$0xf0] }
 0x84d   :  { %v3629_v16 = vor.u32 %v4359_v12, %v3626_v15  ;;  %v4406_v12 = vld [vmem:[#allocation21 + $0x80] sm:$0xff]  ;;  %v4391_v15 = vld [vmem:[#allocation21 + $0x8] sm:$0xff] }
 0x84e   :  { %1149 = vmatmul.bf16.vlgmr.msrb.gmra.mxu2 %v1076_v36  ;;  %v4375_v36 = vld [vmem:[#allocation20 + $0x8c] sm:$0xf]  ;;  %1435 = vmatpush.bf16.msra.mxu0 %v3685_v18 }
 0x84f   :  { %1449 = vmatpush.bf16.msrb.mxu1 %v3689_v19 }
 0x8d1   :  { %v1150_v21 = vpop.f32.mrf.mxu2 }
 0x8d2   :  { %v1155_v22 = vadd.f32 %v1150_v21, %v5486_v45 }
 0x8d4   :  { %v5602_v23 = vadd.f32 %v4597_v20, %v1155_v22  ;;  %v3664_v22 = vld [vmem:[#allocation20 + $0x60] sm:$0xf] }
 0x8d6   :  { %1165 = vadd.xlane.f32.xlu0 %v5602_v23 }
 0x8d9   :  { %v1152_v24 = vpop.f32.mrf.mxu2 }
 0x8da   :  { %v1156_v25 = vadd.f32 %v1152_v24, %v5489_v49  ;;  %v4372_v24 = vld [vmem:[#allocation20 + $0x6c] sm:$0xf0] }
 0x8dc   :  { %v5606_v26 = vadd.f32 %v4597_v20, %v1156_v25  ;;  %v3690_v20 = vld [vmem:[#allocation20 + $0x98] sm:$0xf0]  ;;  %v4370_v25 = vld [vmem:[#allocation20 + $0x64] sm:$0xf] }
 0x8dd   :  { %v3693_v21 = vor.u32 %v4375_v36, %v3690_v20 }
 0x8de   :  { %1167 = vadd.xlane.f32.xlu1 %v5606_v26 }
 0x8df   :  { %1463 = vmatpush.bf16.msra.mxu2 %v3693_v21 }
 0x8e3   :  { %1464 = vmatpush.bf16.msra.mxu2 %v3677_v37 }
 0x8e7   :  { %1465 = vmatpush.bf16.msra.mxu2 %v3661_v51  ;;  %v4397_v51 = vld [vmem:[#allocation21 + $0x38] sm:$0xff] }
 0x8eb   :  { %1466 = vmatpush.bf16.msra.mxu2 %v3645_v4  ;;  %v4393_v4 = vld [vmem:[#allocation21 + $0x18] sm:$0xff] }
 0x8ef   :  { %1467 = vmatpush.bf16.msra.mxu2 %v3629_v16  ;;  %v4415_v16 = vld [vmem:[#allocation21 + $0xc8] sm:$0xff] }
 0x949   :  { %v1166_v27 = vpop.xlane.xlu0 %1165 }
 0x94a   :  { %v1169_v28 = vmul.f32 %v1166_v27, %v5492_v56  ;;  %v3665_v27 = vor.u32 %v4372_v24, %v3664_v22 }
 0x94c   :  { %v5611_v29 = vsub.f32 %v5602_v23, %v1169_v28  ;;  %v3666_v28 = vld [vmem:[#allocation20 + $0x70] sm:$0xf0]  ;;  %1422 = vmatpush.bf16.msrb.mxu3 %v3665_v27 }
 0x94e   :  { %v1173_v45 = vmul.f32 %v5611_v29, %v5611_v29 }
 0x950   :  { %1175 = vadd.xlane.f32.xlu2 %v1173_v45  ;;  %v3672_v45 = vld [vmem:[#allocation20 + $0x68] sm:$0xf]  ;;  %1423 = vmatpush.bf16.msrb.mxu3 %v3649_v41  ;;  %v4599_v41 = vld [vmem:[%s5880_s11] ss:$0 sm:$0xff] }
 0x951   :  { %v1168_v30 = vpop.xlane.xlu1 %1167 }
 0x952   :  { %v1170_v31 = vmul.f32 %v1168_v30, %v5492_v56  ;;  %v4373_v30 = vld [vmem:[#allocation20 + $0x74] sm:$0xf0] }
 0x954   :  { %v5617_v32 = vsub.f32 %v5606_v26, %v1170_v31  ;;  %v3669_v31 = vor.u32 %v4370_v25, %v3666_v28  ;;  %1424 = vmatpush.bf16.msrb.mxu3 %v3633_v54  ;;  %v4420_v54 = vld [vmem:[#allocation21 + $0xf0] sm:$0xff] }
 0x956   :  { %v1174_v49 = vmul.f32 %v5617_v32, %v5617_v32  ;;  %1436 = vmatpush.bf16.msra.mxu0 %v3669_v31 }
 0x958   :  { %1177 = vadd.xlane.f32.xlu0 %v1174_v49  ;;  %v3673_v49 = vor.u32 %v4373_v30, %v3672_v45  ;;  %1425 = vmatpush.bf16.msrb.mxu3 %v3617_v8  ;;  %v4407_v8 = vld [vmem:[#allocation21 + $0x88] sm:$0xff] }
 0x95a   :  { %1450 = vmatpush.bf16.msrb.mxu1 %v3673_v49  ;;  %1437 = vmatpush.bf16.msra.mxu0 %v3653_v46 }
 0x95c   :  { %1806 = vmatpush.bf16.msra.mxu3 %v4397_v51 }
 0x95e   :  { %1451 = vmatpush.bf16.msrb.mxu1 %v3657_v47  ;;  %1438 = vmatpush.bf16.msra.mxu0 %v3637_v61  ;;  %v4405_v47 = vld [vmem:[#allocation21 + $0x78] sm:$0xff] }
 0x95f   :  { %v4401_v61 = vld [vmem:[#allocation21 + $0x58] sm:$0xff] }
 0x960   :  { %1807 = vmatpush.bf16.msra.mxu3 %v4396_v53 }
 0x962   :  { %1452 = vmatpush.bf16.msrb.mxu1 %v3641_v62  ;;  %1439 = vmatpush.bf16.msra.mxu0 %v3621_v3  ;;  %v4409_v62 = vld [vmem:[#allocation21 + $0x98] sm:$0xff]  ;;  %v4392_v3 = vld [vmem:[#allocation21 + $0x10] sm:$0xff] }
 0x964   :  { %1808 = vmatpush.bf16.msra.mxu3 %v4395_v58 }
 0x966   :  { %1453 = vmatpush.bf16.msrb.mxu1 %v3625_v14  ;;  %1820 = vmatpush.bf16.msrb.mxu0 %v4405_v47  ;;  %v1252_v14 = vperm.slane %v5628_v6, 2 }
 0x968   :  { %1809 = vmatpush.bf16.msra.mxu3 %v4394_v0 }
 0x96a   :  { %1834 = vmatpush.bf16.msra.mxu1 %v4413_v48 }
 0x96c   :  { %1810 = vmatpush.bf16.msra.mxu3 %v4393_v4 }
 0x96e   :  { %1835 = vmatpush.bf16.msra.mxu1 %v4412_v50 }
 0x970   :  { %1811 = vmatpush.bf16.msra.mxu3 %v4392_v3 }
 0x972   :  { %1836 = vmatpush.bf16.msra.mxu1 %v4411_v52 }
 0x974   :  { %1812 = vmatpush.bf16.msra.mxu3 %v4391_v15 }
 0x976   :  { %1837 = vmatpush.bf16.msra.mxu1 %v4410_v57 }
 0x97a   :  { %1838 = vmatpush.bf16.msra.mxu1 %v4409_v62 }
 0x9c3   :  { %v1176_v60 = vpop.xlane.xlu2 %1175 }
 0x9c4   :  { %v1179_v2 = vmul.f32 %v1176_v60, %v5492_v56  ;;  %v4419_v60 = vld [vmem:[#allocation21 + $0xe8] sm:$0xff] }
 0x9c6   :  { %v1181_v13 = vadd.f32 1e-05, %v1179_v2  ;;  %v4408_v2 = vld [vmem:[#allocation21 + $0x90] sm:$0xff] }
 0x9c7   :  { %1839 = vmatpush.bf16.msra.mxu1 %v4408_v2 }
 0x9c8   :  { %4647 = vrsqrt.f32 %v1181_v13  ;;  %vm1189_vm5 = vweird.f32 %v1181_v13 }
 0x9cb   :  { %v1178_v17 = vpop.xlane.xlu0 %1177  ;;  %1840 = vmatpush.bf16.msra.mxu1 %v4407_v8 }
 0x9cc   :  { %v1180_v18 = vmul.f32 %v1178_v17, %v5492_v56 }
 0x9ce   :  { %v4648_v19 = vpop.eup %4647  ;;  %v1182_v36 = vadd.f32 1e-05, %v1180_v18 }
 0x9cf   :  { %v1184_v20 = vmul.f32 %v4648_v19, %v1181_v13  ;;  %vm1190_vm4 = vweird.f32 %v4648_v19  ;;  %v1251_v13 = vperm.slane %v5628_v6, 1  ;;  %1841 = vmatpush.bf16.msra.mxu1 %v4406_v12 }
 0x9d0   :  { %4649 = vrsqrt.f32 %v1182_v36  ;;  %vm1191_vm6 = vmor %vm1189_vm5, %vm1190_vm4  ;;  %vm1199_vm8 = vweird.f32 %v1182_v36 }
 0x9d1   :  { %v1185_v21 = vmul.f32 %v4648_v19, %v1184_v20 }
 0x9d3   :  { %v1186_v22 = vmul.f32 0.5, %v1185_v21  ;;  %v1250_v21 = vperm.slane %v5628_v6, 0 }
 0x9d5   :  { %v1187_v24 = vsub.f32 1.5, %v1186_v22  ;;  %v4390_v22 = vld [vmem:[#allocation21] sm:$0xff] }
 0x9d6   :  { %v4650_v25 = vpop.eup %4649  ;;  %1813 = vmatpush.bf16.msra.mxu3 %v4390_v22 }
 0x9d7   :  { %v1188_v27 = vmul.f32 %v4648_v19, %v1187_v24  ;;  %v1194_v28 = vmul.f32 %v4650_v25, %v1182_v36  ;;  %vm1200_vm7 = vweird.f32 %v4650_v25  ;;  %v4414_v24 = vld [vmem:[#allocation21 + $0xc0] sm:$0xff] }
 0x9d8   :  { %vm1201_vm9 = vmor %vm1199_vm8, %vm1200_vm7 }
 0x9d9   :  { %v1195_v45 = vmul.f32 %v4650_v25, %v1194_v28  ;;  %v1192_v30 = vsel %vm1191_vm6, %v4648_v19, %v1188_v27  ;;  %v1253_v27 = vperm.slane %v5628_v6, 3 }
 0x9da   :  { %v1203_v33 = vmul.f32 %v1192_v30, %v5611_v29  ;;  %v4404_v29 = vld [vmem:[#allocation21 + $0x70] sm:$0xff] }
 0x9db   :  { %v1196_v31 = vmul.f32 0.5, %v1195_v45  ;;  %1821 = vmatpush.bf16.msrb.mxu0 %v4404_v29 }
 0x9dc   :  { %v1208_v40 = vmul.f32 %v4598_v34, %v1203_v33 }
 0x9dd   :  { %v1197_v49 = vsub.f32 1.5, %v1196_v31 }
 0x9de   :  { %v1213_v43 = vadd.f32 %v4599_v41, %v1208_v40 }
 0x9df   :  { %v1198_v37 = vmul.f32 %v4650_v25, %v1197_v49  ;;  %1822 = vmatpush.bf16.msrb.mxu0 %v4403_v59 }
 0x9e1   :  { %v1202_v38 = vsel %vm1201_vm9, %v4650_v25, %v1198_v37 }
 0x9e2   :  { %v1204_v39 = vmul.f32 %v1202_v38, %v5617_v32  ;;  %v4421_v32 = vld [vmem:[#allocation21 + $0xf8] sm:$0xff] }
 0x9e3   :  { %1848 = vmatpush.bf16.msrb.mxu2 %v4421_v32  ;;  %1823 = vmatpush.bf16.msrb.mxu0 %v4402_v55 }
 0x9e4   :  { %v1209_v42 = vmul.f32 %v4598_v34, %v1204_v39 }
 0x9e6   :  { %v1214_v44 = vadd.f32 %v4599_v41, %v1209_v42 }
 0x9e7   :  { %1849 = vmatpush.bf16.msrb.mxu2 %v4420_v54  ;;  %1824 = vmatpush.bf16.msrb.mxu0 %v4401_v61 }
 0x9e8   :  { %v1215_v46 = vpack.c.bf16 %v1214_v44, %v1213_v43 }
 0x9ea   :  { %1426 = vmatmul.bf16.vlgmr.msrb.gmra.mxu3 %v1215_v46  ;;  %1440 = vmatmul.bf16.vlgmr.msra.gmra.mxu0 %v1215_v46 }
 0x9eb   :  { %1454 = vmatmul.bf16.vlgmr.msrb.gmra.mxu1 %v1215_v46  ;;  %1468 = vmatmul.bf16.vlgmr.msra.gmra.mxu2 %v1215_v46 }
 0x9ec   :  { %1850 = vmatpush.bf16.msrb.mxu2 %v4419_v60  ;;  %1825 = vmatpush.bf16.msrb.mxu0 %v4400_v1 }
 0x9f0   :  { %1851 = vmatpush.bf16.msrb.mxu2 %v4418_v63  ;;  %1826 = vmatpush.bf16.msrb.mxu0 %v4399_v7 }
 0x9f4   :  { %1852 = vmatpush.bf16.msrb.mxu2 %v4417_v5  ;;  %1827 = vmatpush.bf16.msrb.mxu0 %v4398_v11 }
 0x9f8   :  { %1853 = vmatpush.bf16.msrb.mxu2 %v4416_v9 }
 0x9fc   :  { %1854 = vmatpush.bf16.msrb.mxu2 %v4415_v16 }
 0xa00   :  { %1855 = vmatpush.bf16.msrb.mxu2 %v4414_v24 }
 0xa67   :  { %v1441_v17 = vpop.f32.mrf.mxu0 }
 0xa68   :  { %v5632_v18 = vadd.f32 %v1441_v17, %v1251_v13  ;;  %v1455_v19 = vpop.f32.mrf.mxu1 }
 0xa69   :  { %v5634_v36 = vadd.f32 %v1455_v19, %v1252_v14 }
 0xa6a   :  { %v1483_v20 = vmul.f32 0.044715, %v5632_v18 }
 0xa6b   :  { %v1484_v25 = vmul.f32 0.044715, %v5634_v36 }
 0xa6c   :  { %v1491_v28 = vmul.f32 %v1483_v20, %v5632_v18 }
 0xa6d   :  { %v1492_v45 = vmul.f32 %v1484_v25, %v5634_v36  ;;  %v1427_v30 = vpop.f32.mrf.mxu3 }
 0xa6e   :  { %v1499_v31 = vmul.f32 %v1491_v28, %v5632_v18  ;;  %v5643_v49 = vadd.f32 %v1427_v30, %v1250_v21  ;;  %v1469_v33 = vpop.f32.mrf.mxu2 }
 0xa6f   :  { %v1500_v34 = vmul.f32 %v1492_v45, %v5634_v36  ;;  %v5646_v37 = vadd.f32 %v1469_v33, %v1253_v27  ;;  %v1443_v38 = vpop.f32.mrf.mxu0 }
 0xa70   :  { %v1507_v39 = vadd.f32 %v1499_v31, %v5632_v18  ;;  %v1482_v40 = vmul.f32 0.044715, %v5643_v49  ;;  %v1444_v41 = vadd.f32 %v1443_v38, %v1251_v13  ;;  %v1457_v42 = vpop.f32.mrf.mxu1  ;;  %v1476_v31 = vmul.f32 0.5, %v5634_v36 }
 0xa71   :  { %v1508_v43 = vadd.f32 %v1500_v34, %v5634_v36  ;;  %v1485_v44 = vmul.f32 0.044715, %v5646_v37  ;;  %v1458_v46 = vadd.f32 %v1457_v42, %v1252_v14  ;;  %v1477_v36 = vmul.f32 0.5, %v5646_v37 }
 0xa72   :  { %v1490_v47 = vmul.f32 %v1482_v40, %v5643_v49  ;;  %v1487_v48 = vmul.f32 0.044715, %v1444_v41  ;;  %v1515_v51 = vmul.f32 0.7978846, %v1507_v39  ;;  %v1479_v28 = vmul.f32 0.5, %v1444_v41 }
 0xa73   :  { %v1493_v29 = vmul.f32 %v1485_v44, %v5646_v37  ;;  %v1488_v50 = vmul.f32 0.044715, %v1458_v46  ;;  %v1516_v52 = vmul.f32 0.7978846, %v1508_v43  ;;  %v1480_v33 = vmul.f32 0.5, %v1458_v46 }
 0xa74   :  { %v1498_v32 = vmul.f32 %v1490_v47, %v5643_v49  ;;  %v1495_v59 = vmul.f32 %v1487_v48, %v1444_v41  ;;  %4651 = vtanh.f32 %v1515_v51 }
 0xa75   :  { %v1501_v53 = vmul.f32 %v1493_v29, %v5646_v37  ;;  %v1496_v54 = vmul.f32 %v1488_v50, %v1458_v46  ;;  %v1429_v55 = vpop.f32.mrf.mxu3  ;;  %4653 = vtanh.f32 %v1516_v52 }
 0xa76   :  { %v1506_v57 = vadd.f32 %v1498_v32, %v5643_v49  ;;  %v1503_v58 = vmul.f32 %v1495_v59, %v1444_v41  ;;  %v1430_v60 = vadd.f32 %v1429_v55, %v1250_v21  ;;  %v1471_v61 = vpop.f32.mrf.mxu2 }
 0xa77   :  { %v1509_v62 = vadd.f32 %v1501_v53, %v5646_v37  ;;  %v1504_v0 = vmul.f32 %v1496_v54, %v1458_v46  ;;  %v1472_v63 = vadd.f32 %v1471_v61, %v1253_v27  ;;  %v1475_v27 = vmul.f32 0.5, %v5632_v18 }
 0xa78   :  { %v1511_v1 = vadd.f32 %v1503_v58, %v1444_v41  ;;  %v1486_v2 = vmul.f32 0.044715, %v1430_v60  ;;  %v1514_v6 = vmul.f32 0.7978846, %v1506_v57  ;;  %v1474_v18 = vmul.f32 0.5, %v5643_v49 }
 0xa79   :  { %v1512_v4 = vadd.f32 %v1504_v0, %v1458_v46  ;;  %v1489_v5 = vmul.f32 0.044715, %v1472_v63  ;;  %v1517_v3 = vmul.f32 0.7978846, %v1509_v62  ;;  %v1478_v41 = vmul.f32 0.5, %v1430_v60 }
 0xa7a   :  { %v1519_v7 = vmul.f32 0.7978846, %v1511_v1  ;;  %v1494_v8 = vmul.f32 %v1486_v2, %v1430_v60  ;;  %v4652_v14 = vpop.eup %4651  ;;  %v1481_v46 = vmul.f32 0.5, %v1472_v63 }
 0xa7b   :  { %v1520_v9 = vmul.f32 0.7978846, %v1512_v4  ;;  %v1497_v11 = vmul.f32 %v1489_v5, %v1472_v63  ;;  %v4654_v16 = vpop.eup %4653  ;;  %v1531_v21 = vadd.f32 1.0, %v4652_v14  ;;  %v4600_v4 = vld [vmem:[%s5882_s27] ss:$0 sm:$0xff] }
 0xa7c   :  { %v1502_v12 = vmul.f32 %v1494_v8, %v1430_v60  ;;  %4655 = vtanh.f32 %v1519_v7  ;;  %v1532_v24 = vadd.f32 1.0, %v4654_v16 }
 0xa7d   :  { %v1505_v13 = vmul.f32 %v1497_v11, %v1472_v63  ;;  %4657 = vtanh.f32 %v1520_v9  ;;  %v1539_v39 = vmul.f32 %v1531_v21, %v1475_v27  ;;  %v3956_v21 = vld [vmem:[#allocation23 + $0xa8] sm:$0xf]  ;;  %v3958_v27 = vld [vmem:[#allocation23 + $0xb4] sm:$0xf0] }
 0xa7e   :  { %v1510_v15 = vadd.f32 %v1502_v12, %v1430_v60  ;;  %4659 = vtanh.f32 %v1514_v6  ;;  %v1540_v42 = vmul.f32 %v1532_v24, %v1476_v31  ;;  %v4443_v24 = vld [vmem:[#allocation23 + $0xac] sm:$0xf] }
 0xa7f   :  { %v1513_v17 = vadd.f32 %v1505_v13, %v1472_v63  ;;  %4661 = vtanh.f32 %v1517_v3 }
 0xa80   :  { %v1518_v19 = vmul.f32 0.7978846, %v1510_v15 }
 0xa81   :  { %v1521_v20 = vmul.f32 0.7978846, %v1513_v17 }
 0xa82   :  { %v4656_v22 = vpop.eup %4655  ;;  %4663 = vtanh.f32 %v1518_v19 }
 0xa83   :  { %v4658_v25 = vpop.eup %4657  ;;  %v1535_v45 = vadd.f32 1.0, %v4656_v22  ;;  %4665 = vtanh.f32 %v1521_v20  ;;  %v4444_v22 = vld [vmem:[#allocation23 + $0xb0] sm:$0xf0] }
 0xa84   :  { %v4660_v30 = vpop.eup %4659  ;;  %v1536_v34 = vadd.f32 1.0, %v4658_v25  ;;  %v3957_v25 = vor.u32 %v4444_v22, %v3956_v21  ;;  %v3886_v22 = vld [vmem:[#allocation23 + $0x24] sm:$0xf0] }
 0xa85   :  { %v4662_v38 = vpop.eup %4661  ;;  %v1543_v40 = vmul.f32 %v1535_v45, %v1479_v28  ;;  %v1530_v47 = vadd.f32 1.0, %v4660_v30  ;;  %v3964_v28 = vld [vmem:[#allocation23 + $0xb0] sm:$0xf]  ;;  %v4445_v45 = vld [vmem:[#allocation23 + $0xb8] sm:$0xf0]  ;;  %v3961_v30 = vor.u32 %v4443_v24, %v3958_v27 }
 0xa86   :  { %v1544_v43 = vmul.f32 %v1536_v34, %v1480_v33  ;;  %v1533_v50 = vadd.f32 1.0, %v4662_v38  ;;  %v3965_v31 = vor.u32 %v4445_v45, %v3964_v28  ;;  %2091 = vmatpush.bf16.msrb.mxu3 %v3957_v25  ;;  %v3944_v33 = vld [vmem:[#allocation23 + $0x90] sm:$0xf]  ;;  %v4441_v34 = vld [vmem:[#allocation23 + $0x98] sm:$0xf0] }
 0xa87   :  { %v1547_v44 = vpack.c.bf16 %v1543_v40, %v1539_v39  ;;  %v1538_v52 = vmul.f32 %v1530_v47, %v1474_v18  ;;  %2105 = vmatpush.bf16.msra.mxu0 %v3961_v30  ;;  %v4440_v38 = vld [vmem:[#allocation23 + $0x94] sm:$0xf]  ;;  %v3945_v39 = vor.u32 %v4441_v34, %v3944_v33  ;;  %v3946_v40 = vld [vmem:[#allocation23 + $0x9c] sm:$0xf0]  ;;  %v3934_v18 = vld [vmem:[#allocation23 + $0x84] sm:$0xf0] }
 0xa88   :  { %v4664_v48 = vpop.eup %4663  ;;  %v1548_v29 = vpack.c.bf16 %v1544_v43, %v1540_v42  ;;  %v1541_v54 = vmul.f32 %v1533_v50, %v1477_v36  ;;  %2119 = vmatpush.bf16.msrb.mxu1 %v3965_v31  ;;  %v3952_v42 = vld [vmem:[#allocation23 + $0x98] sm:$0xf]  ;;  %v4442_v43 = vld [vmem:[#allocation23 + $0xa0] sm:$0xf0]  ;;  %v4437_v50 = vld [vmem:[#allocation23 + $0x7c] sm:$0xf] }
 0xa89   :  { %v4666_v51 = vpop.eup %4665  ;;  %1828 = vmatmul.bf16.vlgmr.msrb.gmra.mxu0 %v1547_v44  ;;  %v1534_v32 = vadd.f32 1.0, %v4664_v48  ;;  %v3949_v44 = vor.u32 %v4440_v38, %v3946_v40  ;;  %v3953_v47 = vor.u32 %v4442_v43, %v3952_v42  ;;  %v3932_v48 = vld [vmem:[#allocation23 + $0x78] sm:$0xf]  ;;  %v3937_v36 = vor.u32 %v4437_v50, %v3934_v18  ;;  %v3892_v24 = vld [vmem:[#allocation23 + $0x20] sm:$0xf] }
 0xa8a   :  { %1842 = vmatmul.bf16.vlgmr.msra.gmra.mxu1 %v1548_v29  ;;  %v1537_v59 = vadd.f32 1.0, %v4666_v51  ;;  %2092 = vmatpush.bf16.msrb.mxu3 %v3945_v39  ;;  %v4438_v29 = vld [vmem:[#allocation23 + $0x80] sm:$0xf0]  ;;  %v4427_v25 = vld [vmem:[#allocation23 + $0x28] sm:$0xf0] }
 0xa8b   :  { %v1542_v53 = vmul.f32 %v1534_v32, %v1478_v41  ;;  %2106 = vmatpush.bf16.msra.mxu0 %v3949_v44  ;;  %v3933_v51 = vor.u32 %v4438_v29, %v3932_v48  ;;  %v3940_v41 = vld [vmem:[#allocation23 + $0x80] sm:$0xf]  ;;  %v4439_v32 = vld [vmem:[#allocation23 + $0x88] sm:$0xf0]  ;;  %v3893_v45 = vor.u32 %v4427_v25, %v3892_v24  ;;  %v4422_v33 = vld [vmem:[#allocation23 + $0x4] sm:$0xf] }
 0xa8c   :  { %v1545_v55 = vmul.f32 %v1537_v59, %v1481_v46  ;;  %2120 = vmatpush.bf16.msrb.mxu1 %v3953_v47  ;;  %v3941_v46 = vor.u32 %v4439_v32, %v3940_v41  ;;  %v3920_v59 = vld [vmem:[#allocation23 + $0x60] sm:$0xf]  ;;  %v4423_v31 = vld [vmem:[#allocation23 + $0x8] sm:$0xf0]  ;;  %v3874_v39 = vld [vmem:[#allocation23 + $0xc] sm:$0xf0] }
 0xa8d   :  { %v1546_v57 = vpack.c.bf16 %v1542_v53, %v1538_v52  ;;  %v4435_v52 = vld [vmem:[#allocation23 + $0x68] sm:$0xf0]  ;;  %v4434_v53 = vld [vmem:[#allocation23 + $0x64] sm:$0xf]  ;;  %v3872_v30 = vld [vmem:[#allocation23] sm:$0xf]  ;;  %v3877_v43 = vor.u32 %v4422_v33, %v3874_v39 }
 0xa8e   :  { %v1549_v58 = vpack.c.bf16 %v1545_v55, %v1541_v54  ;;  %2093 = vmatpush.bf16.msrb.mxu3 %v3933_v51  ;;  %v3921_v54 = vor.u32 %v4435_v52, %v3920_v59  ;;  %v3922_v55 = vld [vmem:[#allocation23 + $0x6c] sm:$0xf0]  ;;  %v3873_v38 = vor.u32 %v4423_v31, %v3872_v30  ;;  %v3880_v40 = vld [vmem:[#allocation23 + $0x8] sm:$0xf]  ;;  %v4424_v42 = vld [vmem:[#allocation23 + $0x10] sm:$0xf0] }
 0xa8f   :  { %1814 = vmatmul.bf16.vlgmr.msra.gmra.mxu3 %v1546_v57  ;;  %2107 = vmatpush.bf16.msra.mxu0 %v3937_v36  ;;  %v3928_v57 = vld [vmem:[#allocation23 + $0x68] sm:$0xf]  ;;  %v3881_v44 = vor.u32 %v4424_v42, %v3880_v40 }
 0xa90   :  { %1856 = vmatmul.bf16.vlgmr.msrb.gmra.mxu2 %v1549_v58  ;;  %2121 = vmatpush.bf16.msrb.mxu1 %v3941_v46  ;;  %v4436_v58 = vld [vmem:[#allocation23 + $0x70] sm:$0xf0] }
 0xa92   :  { %2094 = vmatpush.bf16.msrb.mxu3 %v3921_v54 }
 0xb06   :  { %v1829_v61 = vpop.f32.mrf.mxu0 }
 0xb07   :  { %v1843_v62 = vpop.f32.mrf.mxu1 }
 0xb0e   :  { %v1831_v63 = vpop.f32.mrf.mxu0 }
 0xb0f   :  { %v1845_v8 = vpop.f32.mrf.mxu1 }
 0xb12   :  { %v1815_v0 = vpop.f32.mrf.mxu3 }
 0xb13   :  { %v1830_v49 = vadd.f32 %v1829_v61, %v1815_v0  ;;  %v1857_v60 = vpop.f32.mrf.mxu2  ;;  %v3925_v61 = vor.u32 %v4434_v53, %v3922_v55  ;;  %v3908_v0 = vld [vmem:[#allocation23 + $0x48] sm:$0xf] }
 0xb15   :  { %v1844_v1 = vadd.f32 %v1843_v62, %v1830_v49  ;;  %v3929_v62 = vor.u32 %v4436_v58, %v3928_v57  ;;  %2108 = vmatpush.bf16.msra.mxu0 %v3925_v61  ;;  %v4432_v49 = vld [vmem:[#allocation23 + $0x50] sm:$0xf0]  ;;  %v4601_v61 = vld [vmem:[%s5883_s21] ss:$0 sm:$0xff] }
 0xb17   :  { %v1858_v2 = vadd.f32 %v1857_v60, %v1844_v1  ;;  %2122 = vmatpush.bf16.msrb.mxu1 %v3929_v62  ;;  %v4431_v60 = vld [vmem:[#allocation23 + $0x4c] sm:$0xf]  ;;  %v3909_v1 = vor.u32 %v4432_v49, %v3908_v0 }
 0xb19   :  { %v1862_v37 = vadd.f32 %v1858_v2, %v5602_v23  ;;  %v3910_v2 = vld [vmem:[#allocation23 + $0x54] sm:$0xf0]  ;;  %2095 = vmatpush.bf16.msrb.mxu3 %v3909_v1  ;;  %v4602_v1 = vld [vmem:[%s5884_s22] ss:$0 sm:$0xff] }
 0xb1a   :  { %v1817_v5 = vpop.f32.mrf.mxu3 }
 0xb1b   :  { %v1832_v6 = vadd.f32 %v1831_v63, %v1817_v5  ;;  %v5664_v7 = vadd.f32 %v4600_v4, %v1862_v37  ;;  %v1859_v9 = vpop.f32.mrf.mxu2  ;;  %v4433_v37 = vld [vmem:[#allocation23 + $0x58] sm:$0xf0]  ;;  %v3913_v63 = vor.u32 %v4431_v60, %v3910_v2 }
 0xb1d   :  { %v1846_v3 = vadd.f32 %v1845_v8, %v1832_v6  ;;  %1872 = vadd.xlane.f32.xlu1 %v5664_v7  ;;  %2109 = vmatpush.bf16.msra.mxu0 %v3913_v63  ;;  %v3896_v6 = vld [vmem:[#allocation23 + $0x30] sm:$0xf]  ;;  %v4429_v8 = vld [vmem:[#allocation23 + $0x38] sm:$0xf0] }
 0xb1f   :  { %v1860_v11 = vadd.f32 %v1859_v9, %v1846_v3  ;;  %v4428_v3 = vld [vmem:[#allocation23 + $0x34] sm:$0xf]  ;;  %v3897_v9 = vor.u32 %v4429_v8, %v3896_v6 }
 0xb21   :  { %v1863_v12 = vadd.f32 %v1860_v11, %v5606_v26  ;;  %v3898_v11 = vld [vmem:[#allocation23 + $0x3c] sm:$0xf0]  ;;  %2096 = vmatpush.bf16.msrb.mxu3 %v3897_v9 }
 0xb23   :  { %v5668_v13 = vadd.f32 %v4600_v4, %v1863_v12  ;;  %v3916_v4 = vld [vmem:[#allocation23 + $0x50] sm:$0xf]  ;;  %v3904_v12 = vld [vmem:[#allocation23 + $0x38] sm:$0xf] }
 0xb24   :  { %v3917_v5 = vor.u32 %v4433_v37, %v3916_v4 }
 0xb25   :  { %1874 = vadd.xlane.f32.xlu2 %v5668_v13 }
 0xb26   :  { %2123 = vmatpush.bf16.msrb.mxu1 %v3917_v5 }
 0xb90   :  { %v1873_v14 = vpop.xlane.xlu1 %1872 }
 0xb91   :  { %v1876_v23 = vmul.f32 %v1873_v14, %v5492_v56  ;;  %v4430_v14 = vld [vmem:[#allocation23 + $0x40] sm:$0xf0] }
 0xb93   :  { %v5673_v15 = vsub.f32 %v5664_v7, %v1876_v23  ;;  %v3901_v23 = vor.u32 %v4428_v3, %v3898_v11 }
 0xb95   :  { %v1880_v16 = vmul.f32 %v5673_v15, %v5673_v15  ;;  %2110 = vmatpush.bf16.msra.mxu0 %v3901_v23 }
 0xb97   :  { %1882 = vadd.xlane.f32.xlu0 %v1880_v16  ;;  %v3905_v16 = vor.u32 %v4430_v14, %v3904_v12 }
 0xb98   :  { %v1875_v17 = vpop.xlane.xlu2 %1874 }
 0xb99   :  { %v1877_v19 = vmul.f32 %v1875_v17, %v5492_v56  ;;  %2124 = vmatpush.bf16.msrb.mxu1 %v3905_v16  ;;  %v3884_v17 = vld [vmem:[#allocation23 + $0x18] sm:$0xf] }
 0xb9b   :  { %v5679_v20 = vsub.f32 %v5668_v13, %v1877_v19  ;;  %v4426_v19 = vld [vmem:[#allocation23 + $0x20] sm:$0xf0] }
 0xb9c   :  { %v3885_v21 = vor.u32 %v4426_v19, %v3884_v17 }
 0xb9d   :  { %v1881_v26 = vmul.f32 %v5679_v20, %v5679_v20  ;;  %2125 = vmatpush.bf16.msrb.mxu1 %v3893_v45 }
 0xb9e   :  { %2097 = vmatpush.bf16.msrb.mxu3 %v3885_v21 }
 0xb9f   :  { %1884 = vadd.xlane.f32.xlu1 %v1881_v26  ;;  %v4425_v26 = vld [vmem:[#allocation23 + $0x1c] sm:$0xf] }
 0xba0   :  { %v3889_v28 = vor.u32 %v4425_v26, %v3886_v22 }
 0xba1   :  { %2126 = vmatpush.bf16.msrb.mxu1 %v3881_v44 }
 0xba2   :  { %2111 = vmatpush.bf16.msra.mxu0 %v3889_v28  ;;  %2098 = vmatpush.bf16.msrb.mxu3 %v3873_v38 }
 0xba6   :  { %2112 = vmatpush.bf16.msra.mxu0 %v3877_v43 }
 0xc0a   :  { %v1883_v27 = vpop.xlane.xlu0 %1882 }
 0xc0b   :  { %v1886_v34 = vmul.f32 %v1883_v27, %v5492_v56 }
 0xc0d   :  { %v1888_v47 = vadd.f32 1e-05, %v1886_v34 }
 0xc0f   :  { %4667 = vrsqrt.f32 %v1888_v47  ;;  %vm1896_vm14 = vweird.f32 %v1888_v47 }
 0xc12   :  { %v1885_v48 = vpop.xlane.xlu1 %1884 }
 0xc13   :  { %v1887_v29 = vmul.f32 %v1885_v48, %v5492_v56 }
 0xc15   :  { %v4668_v50 = vpop.eup %4667  ;;  %v1889_v51 = vadd.f32 1e-05, %v1887_v29 }
 0xc16   :  { %v1891_v18 = vmul.f32 %v4668_v50, %v1888_v47  ;;  %vm1897_vm10 = vweird.f32 %v4668_v50 }
 0xc17   :  { %4669 = vrsqrt.f32 %v1889_v51  ;;  %vm1898_vm15 = vmor %vm1896_vm14, %vm1897_vm10  ;;  %vm1906_vm5 = vweird.f32 %v1889_v51 }
 0xc18   :  { %v1892_v41 = vmul.f32 %v4668_v50, %v1891_v18 }
 0xc1a   :  { %v1893_v32 = vmul.f32 0.5, %v1892_v41 }
 0xc1c   :  { %v1894_v36 = vsub.f32 1.5, %v1893_v32 }
 0xc1d   :  { %v4670_v46 = vpop.eup %4669 }
 0xc1e   :  { %v1895_v59 = vmul.f32 %v4668_v50, %v1894_v36  ;;  %v1901_v52 = vmul.f32 %v4670_v46, %v1889_v51  ;;  %vm1907_vm4 = vweird.f32 %v4670_v46 }
 0xc1f   :  { %vm1908_vm6 = vmor %vm1906_vm5, %vm1907_vm4 }
 0xc20   :  { %v1902_v53 = vmul.f32 %v4670_v46, %v1901_v52  ;;  %v1899_v54 = vsel %vm1898_vm15, %v4668_v50, %v1895_v59 }
 0xc21   :  { %v1910_v58 = vmul.f32 %v1899_v54, %v5673_v15  ;;  %v1955_v15 = vld [vmem:[%s5885_s18] sm:$0x7] }
 0xc22   :  { %v1903_v55 = vmul.f32 0.5, %v1902_v53  ;;  %v1958_v8 = vperm.slane %v1955_v15, 1  ;;  %v1959_v3 = vperm.slane %v1955_v15, 2  ;;  %v1957_v17 = vperm.slane %v1955_v15, 0 }
 0xc23   :  { %v1915_v60 = vmul.f32 %v4601_v61, %v1910_v58 }
 0xc24   :  { %v1904_v57 = vsub.f32 1.5, %v1903_v55 }
 0xc25   :  { %v1920_v4 = vadd.f32 %v4602_v1, %v1915_v60 }
 0xc26   :  { %v1905_v62 = vmul.f32 %v4670_v46, %v1904_v57 }
 0xc28   :  { %v1909_v0 = vsel %vm1908_vm6, %v4670_v46, %v1905_v62 }
 0xc29   :  { %v1911_v49 = vmul.f32 %v1909_v0, %v5679_v20 }
 0xc2b   :  { %v1916_v2 = vmul.f32 %v4601_v61, %v1911_v49 }
 0xc2d   :  { %v1921_v37 = vadd.f32 %v4602_v1, %v1916_v2 }
 0xc2f   :  { %v1922_v63 = vpack.c.bf16 %v1921_v37, %v1920_v4 }
 0xc31   :  { %2099 = vmatmul.bf16.vlgmr.msrb.gmra.mxu3 %v1922_v63  ;;  %2113 = vmatmul.bf16.vlgmr.msra.gmra.mxu0 %v1922_v63 }
 0xc32   :  { %2127 = vmatmul.bf16.vlgmr.msrb.gmra.mxu1 %v1922_v63 }
 0xcae   :  { %v2114_v5 = vpop.f32.mrf.mxu0 }
 0xcaf   :  { %v2128_v6 = vpop.f32.mrf.mxu1  ;;  %v2115_v12 = vadd.f32 %v2114_v5, %v1958_v8 }
 0xcb0   :  { %v2129_v20 = vadd.f32 %v2128_v6, %v1959_v3 }
 0xcb4   :  { %v2100_v9 = vpop.f32.mrf.mxu3 }
 0xcb5   :  { %v2101_v24 = vadd.f32 %v2100_v9, %v1957_v17 }
 0xcb6   :  { %v2116_v11 = vpop.f32.mrf.mxu0 }
 0xcb7   :  { %v2117_v14 = vadd.f32 %v2116_v11, %v1958_v8  ;;  %v2130_v23 = vpop.f32.mrf.mxu1 }
 0xcb8   :  { %v2131_v16 = vadd.f32 %v2130_v23, %v1959_v3 }
 0xcb9   :  { %v2134_v19 = vpack.c.bf16 %v2117_v14, %v2115_v12 }
 0xcba   :  { %v5690_v26 = vpack.c.bf16 %v2131_v16, %v2129_v20 }
 0xcbb   :  { %2284 = vrot.lane.b32.xlu0 %v2134_v19, %s5193_s7  ;;  %2204 = vrot.lane.b32.xlu2 %v2134_v19, %s5212_s16  ;;  %v2140_v21 = vsel %vm765_vm11, %v2134_v19, 0 }
 0xcbc   :  { %2191 = vmatpush.bf16.msra.mxu3 %v5690_v26  ;;  %v2102_v22 = vpop.f32.mrf.mxu3  ;;  %2149 = vmatpush.bf16.xpose.msra.mxu2 %v2140_v21 }
 0xcbd   :  { %v2103_v25 = vadd.f32 %v2102_v22, %v1957_v17 }
 0xcbf   :  { %v2133_v27 = vpack.c.bf16 %v2103_v25, %v2101_v24 }
 0xcc1   :  { %2201 = vrot.lane.b32.xlu1 %v2133_v27, %s5212_s16 }
 0xcc3   :  { %2363 = vrot.lane.b32.xlu2 %v2134_v19, %s5213_s28  ;;  %2282 = vrot.lane.b32.xlu0 %v2133_v27, %s5193_s7 }
 0xcc4   :  { %3966 = vmatmul.msk.bf16.vlgmr.msra.gmra.mxu2 %vm765_vm11, %v2133_v27 }
 0xccb   :  { %2361 = vrot.lane.b32.xlu0 %v2133_v27, %s5213_s28 }
 0xd15   :  { %v2205_v28 = vpop.permute.xlu2 %2204 }
 0xd16   :  { %v2210_v45 = vsel %vm765_vm11, %v2205_v28, 0 }
 0xd17   :  { %2219 = vmatpush.bf16.xpose.msrb.mxu0 %v2210_v45 }
 0xd1d   :  { %v2364_v30 = vpop.permute.xlu2 %2363 }
 0xd1e   :  { %v2369_v31 = vsel %vm765_vm11, %v2364_v30, 0 }
 0xd1f   :  { %2378 = vmatpush.bf16.xpose.msra.mxu0 %v2369_v31 }
 0xd2d   :  { %v2285_v33 = vpop.permute.xlu0 %2284 }
 0xd2e   :  { %v2290_v34 = vsel %vm765_vm11, %v2285_v33, 0 }
 0xd2f   :  { %2299 = vmatpush.bf16.xpose.msrb.mxu2 %v2290_v34 }
 0xd33   :  { %v2202_v38 = vpop.permute.xlu1 %2201 }
 0xd34   :  { %3968 = vmatmul.msk.bf16.vlgmr.msrb.gmra.mxu0 %vm765_vm11, %v2202_v38 }
 0xd35   :  { %v2283_v39 = vpop.permute.xlu0 %2282 }
 0xd36   :  { %3970 = vmatmul.msk.bf16.vlgmr.msrb.gmra.mxu2 %vm765_vm11, %v2283_v39 }
 0xd3d   :  { %v2362_v40 = vpop.permute.xlu0 %2361 }
 0xd44   :  { %3972 = vmatmul.msk.bf16.vlgmr.msra.gmra.mxu0 %vm765_vm11, %v2362_v40 }
 0xd47   :  { %v2151_v42 = vpop.f32.mrf.mxu2 }
 0xd48   :  { %v2156_v43 = vsel %vm5525_vm12, %v2151_v42, -1e+30 }
 0xd49   :  { %v2158_v44 = vsel %vm788_vm13, %v2156_v43, -inf }
 0xd4a   :  { %2159 = vmax.xlane.f32.xlu1 %v2158_v44 }
 0xd4f   :  { %v2153_v47 = vpop.f32.mrf.mxu2 }
 0xd50   :  { %v2157_v48 = vsel %vm5534_vm0, %v2153_v47, -1e+30 }
 0xd51   :  { %v2161_v29 = vsel %vm788_vm13, %v2157_v48, -inf }
 0xd52   :  { %2162 = vmax.xlane.f32.xlu2 %v2161_v29 }
 0xdb1   :  { %v2221_v50 = vpop.f32.mrf.mxu0 }
 0xdb2   :  { %v2226_v51 = vsel %vm5525_vm12, %v2221_v50, -1e+30 }
 0xdb3   :  { %v2228_v18 = vsel %vm788_vm13, %v2226_v51, -inf }
 0xdb4   :  { %2229 = vmax.xlane.f32.xlu0 %v2228_v18 }
 0xdb9   :  { %v2223_v41 = vpop.f32.mrf.mxu0  ;;  %v2301_v32 = vpop.f32.mrf.mxu2 }
 0xdba   :  { %v2227_v36 = vsel %vm5534_vm0, %v2223_v41, -1e+30  ;;  %v2306_v46 = vsel %vm5525_vm12, %v2301_v32, -1e+30 }
 0xdbb   :  { %v2308_v59 = vsel %vm788_vm13, %v2306_v46, -inf  ;;  %v2231_v52 = vsel %vm788_vm13, %v2227_v36, -inf }
 0xdbc   :  { %2309 = vmax.xlane.f32.xlu1 %v2308_v59  ;;  %2232 = vmax.xlane.f32.xlu2 %v2231_v52 }
 0xdbd   :  { %v2160_v53 = vpop.xlane.xlu1 %2159 }
 0xdbe   :  { %v2164_v54 = vsub.f32 %v2156_v43, %v2160_v53 }
 0xdc0   :  { %v2166_v55 = vmul.f32 1.442695, %v2164_v54 }
 0xdc1   :  { %v2303_v57 = vpop.f32.mrf.mxu2  ;;  %v2380_v58 = vpop.f32.mrf.mxu0 }
 0xdc2   :  { %4671 = vpow2.f32 %v2166_v55  ;;  %v2307_v61 = vsel %vm5534_vm0, %v2303_v57, -1e+30  ;;  %v2385_v62 = vsel %vm5525_vm12, %v2380_v58, -1e+30 }
 0xdc3   :  { %v2387_v0 = vsel %vm788_vm13, %v2385_v62, -inf  ;;  %v2311_v49 = vsel %vm788_vm13, %v2307_v61, -inf }
 0xdc4   :  { %2388 = vmax.xlane.f32.xlu0 %v2387_v0  ;;  %2312 = vmax.xlane.f32.xlu2 %v2311_v49 }
 0xdc5   :  { %v2163_v10 = vpop.xlane.xlu2 %2162 }
 0xdc6   :  { %v2165_v63 = vsub.f32 %v2157_v48, %v2163_v10 }
 0xdc8   :  { %v5728_v60 = vpop.eup %4671  ;;  %v2168_v5 = vmul.f32 1.442695, %v2165_v63 }
 0xdc9   :  { %v2382_v1 = vpop.f32.mrf.mxu0  ;;  %v2170_v37 = vsel %vm788_vm13, %v5728_v60, 0.0 }
 0xdca   :  { %v2386_v2 = vsel %vm5534_vm0, %v2382_v1, -1e+30  ;;  %4673 = vpow2.f32 %v2168_v5 }
 0xdcb   :  { %v2390_v4 = vsel %vm788_vm13, %v2386_v2, -inf }
 0xdcc   :  { %2391 = vmax.xlane.f32.xlu1 %v2390_v4  ;;  %2171 = vadd.xlane.f32.xlu2 %v2170_v37 }
 0xdd0   :  { %v4674_v6 = vpop.eup %4673 }
 0xdd1   :  { %v2173_v15 = vsel %vm788_vm13, %v4674_v6, 0.0 }
 0xdd8   :  { %2252 = vrot.lane.b32.xlu0 %v5690_v26, %s5212_s16 }
 0xe02   :  { %2174 = vadd.xlane.f32.xlu0 %v2173_v15 }
 0xe16   :  { %2410 = vrot.lane.b32.xlu0 %v5690_v26, %s5213_s28 }
 0xe27   :  { %v2230_v35 = vpop.xlane.xlu0 %2229 }
 0xe28   :  { %v2234_v8 = vsub.f32 %v2226_v51, %v2230_v35 }
 0xe2a   :  { %v2236_v3 = vmul.f32 1.442695, %v2234_v8 }
 0xe2c   :  { %4675 = vpow2.f32 %v2236_v3 }
 0xe2f   :  { %v2310_v9 = vpop.xlane.xlu1 %2309  ;;  %v2233_v11 = vpop.xlane.xlu2 %2232 }
 0xe30   :  { %v2314_v12 = vsub.f32 %v2306_v46, %v2310_v9  ;;  %v2235_v14 = vsub.f32 %v2227_v36, %v2233_v11 }
 0xe32   :  { %v4676_v23 = vpop.eup %4675  ;;  %v2316_v20 = vmul.f32 1.442695, %v2314_v12  ;;  %v2238_v16 = vmul.f32 1.442695, %v2235_v14 }
 0xe33   :  { %v2240_v17 = vsel %vm788_vm13, %v4676_v23, 0.0 }
 0xe34   :  { %4677 = vpow2.f32 %v2316_v20  ;;  %2241 = vadd.xlane.f32.xlu1 %v2240_v17  ;;  %v4452_v17 = vld [vmem:[#allocation24 + $0x30] sm:$0xff] }
 0xe35   :  { %4679 = vpow2.f32 %v2238_v16  ;;  %v4453_v16 = vld [vmem:[#allocation24 + $0x38] sm:$0xff] }
 0xe36   :  { %2507 = vmatpush.bf16.msra.mxu2 %v4453_v16 }
 0xe37   :  { %v2389_v19 = vpop.xlane.xlu0 %2388  ;;  %v2313_v21 = vpop.xlane.xlu2 %2312 }
 0xe38   :  { %v2393_v22 = vsub.f32 %v2385_v62, %v2389_v19  ;;  %v2315_v24 = vsub.f32 %v2307_v61, %v2313_v21  ;;  %v4451_v19 = vld [vmem:[#allocation24 + $0x28] sm:$0xff]  ;;  %v4450_v21 = vld [vmem:[#allocation24 + $0x20] sm:$0xff] }
 0xe3a   :  { %v5741_v25 = vpop.eup %4677  ;;  %v2395_v27 = vmul.f32 1.442695, %v2393_v22  ;;  %v2318_v28 = vmul.f32 1.442695, %v2315_v24  ;;  %2508 = vmatpush.bf16.msra.mxu2 %v4452_v17  ;;  %v4449_v22 = vld [vmem:[#allocation24 + $0x18] sm:$0xff]  ;;  %v4448_v24 = vld [vmem:[#allocation24 + $0x10] sm:$0xff] }
 0xe3b   :  { %v4680_v45 = vpop.eup %4679  ;;  %v2320_v30 = vsel %vm788_vm13, %v5741_v25, 0.0  ;;  %v4475_v17 = vld [vmem:[#allocation26 + $0xac] sm:$0xf] }
 0xe3c   :  { %4681 = vpow2.f32 %v2395_v27  ;;  %2321 = vadd.xlane.f32.xlu1 %v2320_v30  ;;  %v2243_v31 = vsel %vm788_vm13, %v4680_v45, 0.0  ;;  %v4447_v27 = vld [vmem:[#allocation24 + $0x8] sm:$0xff] }
 0xe3d   :  { %4683 = vpow2.f32 %v2318_v28  ;;  %2244 = vadd.xlane.f32.xlu2 %v2243_v31  ;;  %v4446_v28 = vld [vmem:[#allocation24] sm:$0xff] }
 0xe3e   :  { %2509 = vmatpush.bf16.msra.mxu2 %v4451_v19  ;;  %v4098_v19 = vld [vmem:[#allocation26 + $0xb8] sm:$0xf0] }
 0xe3f   :  { %v2392_v33 = vpop.xlane.xlu1 %2391  ;;  %v2172_v29 = vpop.xlane.xlu2 %2171 }
 0xe40   :  { %v2394_v34 = vsub.f32 %v2386_v2, %v2392_v33 }
 0xe42   :  { %v4682_v38 = vpop.eup %4681  ;;  %v2397_v39 = vmul.f32 1.442695, %v2394_v34  ;;  %2510 = vmatpush.bf16.msra.mxu2 %v4450_v21  ;;  %v4101_v21 = vor.u32 %v4475_v17, %v4098_v19  ;;  %v4016_v17 = vld [vmem:[#allocation26 + $0x8] sm:$0xf]  ;;  %v4457_v19 = vld [vmem:[#allocation26 + $0x14] sm:$0xf0] }
 0xe43   :  { %v4684_v40 = vpop.eup %4683  ;;  %v2399_v42 = vsel %vm788_vm13, %v4682_v38, 0.0 }
 0xe44   :  { %4685 = vpow2.f32 %v2397_v39  ;;  %2400 = vadd.xlane.f32.xlu1 %v2399_v42  ;;  %v2323_v43 = vsel %vm788_vm13, %v4684_v40, 0.0 }
 0xe45   :  { %2324 = vadd.xlane.f32.xlu2 %v2323_v43  ;;  %4687 = vrcp.f32 %v2172_v29 }
 0xe46   :  { %2511 = vmatpush.bf16.msra.mxu2 %v4449_v22  ;;  %v4072_v22 = vld [vmem:[#allocation26 + $0x80] sm:$0xf] }
 0xe4a   :  { %v4686_v44 = vpop.eup %4685  ;;  %v2253_v47 = vpop.permute.xlu0 %2252  ;;  %2512 = vmatpush.bf16.msra.mxu2 %v4448_v24  ;;  %v4472_v24 = vld [vmem:[#allocation26 + $0x8c] sm:$0xf0] }
 0xe4b   :  { %2265 = vmatpush.bf16.msra.mxu1 %v2253_v47  ;;  %v2402_v48 = vsel %vm788_vm13, %v4686_v44, 0.0  ;;  %v4688_v51 = vpop.eup %4687 }
 0xe4c   :  { %v2178_v41 = vmul.f32 %v4688_v51, %v5728_v60 }
 0xe4d   :  { %2403 = vadd.xlane.f32.xlu2 %v2402_v48 }
 0xe4e   :  { %2513 = vmatpush.bf16.msra.mxu2 %v4447_v27  ;;  %v4073_v27 = vor.u32 %v4472_v24, %v4072_v22  ;;  %v4017_v24 = vor.u32 %v4457_v19, %v4016_v17  ;;  %v4502_v17 = vld [vmem:[#allocation27 + $0x80] sm:$0xff] }
 0xe52   :  { %2514 = vmatpush.bf16.msra.mxu2 %v4446_v28  ;;  %v4074_v28 = vld [vmem:[#allocation26 + $0x90] sm:$0xf0] }
 0xe5d   :  { %2331 = vrot.lane.b32.xlu1 %v5690_v26, %s5193_s7 }
 0xe75   :  { %v2175_v50 = vpop.xlane.xlu0 %2174 }
 0xe76   :  { %4689 = vrcp.f32 %v2175_v50 }
 0xe7c   :  { %v4690_v18 = vpop.eup %4689 }
 0xe7d   :  { %v2179_v32 = vmul.f32 %v4690_v18, %v4674_v6 }
 0xe7f   :  { %v2180_v36 = vpack.c.bf16 %v2179_v32, %v2178_v41 }
 0xe81   :  { %3967 = vmatmul.msk.bf16.vlgmr.msra.gmra.mxu3 %vm788_vm13, %v2180_v36 }
 0xe88   :  { %v2411_v46 = vpop.permute.xlu0 %2410 }
 0xe89   :  { %2423 = vmatpush.bf16.msrb.mxu1 %v2411_v46  ;;  %v4120_v46 = vld [vmem:[#allocation26 + $0xe0] sm:$0xf] }
 0xea7   :  { %v2242_v59 = vpop.xlane.xlu1 %2241 }
 0xea8   :  { %4691 = vrcp.f32 %v2242_v59  ;;  %v4484_v59 = vld [vmem:[#allocation26 + $0xec] sm:$0xf0] }
 0xeae   :  { %v4692_v26 = vpop.eup %4691 }
 0xeaf   :  { %v2322_v53 = vpop.xlane.xlu1 %2321  ;;  %v2248_v55 = vmul.f32 %v4692_v26, %v4676_v23  ;;  %v4122_v26 = vld [vmem:[#allocation26 + $0xf0] sm:$0xf0] }
 0xeb0   :  { %v2245_v52 = vpop.xlane.xlu2 %2244 }
 0xeb1   :  { %4693 = vrcp.f32 %v2245_v52  ;;  %v4482_v52 = vld [vmem:[#allocation26 + $0xe4] sm:$0xf] }
 0xeb7   :  { %v4694_v54 = vpop.eup %4693  ;;  %v2401_v62 = vpop.xlane.xlu1 %2400 }
 0xeb8   :  { %v2249_v57 = vmul.f32 %v4694_v54, %v4680_v45  ;;  %v2325_v58 = vpop.xlane.xlu2 %2324  ;;  %4695 = vrcp.f32 %v2401_v62  ;;  %v4128_v54 = vld [vmem:[#allocation26 + $0xe8] sm:$0xf]  ;;  %v4130_v62 = vld [vmem:[#allocation26 + $0xf8] sm:$0xf0] }
 0xeba   :  { %v2250_v61 = vpack.c.bf16 %v2249_v57, %v2248_v55  ;;  %v4485_v55 = vld [vmem:[#allocation26 + $0xf4] sm:$0xf0]  ;;  %v4125_v57 = vor.u32 %v4482_v52, %v4122_v26  ;;  %v4464_v52 = vld [vmem:[#allocation26 + $0x4c] sm:$0xf0] }
 0xebc   :  { %3969 = vmatmul.msk.bf16.vlgmr.msra.gmra.mxu1 %vm788_vm13, %v2250_v61  ;;  %v4483_v61 = vld [vmem:[#allocation26 + $0xec] sm:$0xf]  ;;  %2798 = vmatpush.bf16.msrb.mxu0 %v4125_v57  ;;  %v4465_v57 = vld [vmem:[#allocation26 + $0x54] sm:$0xf0] }
 0xebe   :  { %v4696_v49 = vpop.eup %4695 }
 0xebf   :  { %v2407_v1 = vmul.f32 %v4696_v49, %v4682_v38  ;;  %v4104_v49 = vld [vmem:[#allocation26 + $0xc0] sm:$0xf] }
 0xec0   :  { %v2404_v0 = vpop.xlane.xlu2 %2403 }
 0xec1   :  { %4697 = vrcp.f32 %v2404_v0  ;;  %v4133_v0 = vor.u32 %v4483_v61, %v4130_v62  ;;  %v4463_v62 = vld [vmem:[#allocation26 + $0x4c] sm:$0xf] }
 0xec2   :  { %4699 = vrcp.f32 %v2325_v58  ;;  %v4129_v58 = vor.u32 %v4485_v55, %v4128_v54  ;;  %v4042_v54 = vld [vmem:[#allocation26 + $0x50] sm:$0xf0]  ;;  %v4048_v55 = vld [vmem:[#allocation26 + $0x48] sm:$0xf] }
 0xec3   :  { %4701 = vrcp.f32 %v2322_v53  ;;  %v4121_v53 = vor.u32 %v4484_v59, %v4120_v46  ;;  %2826 = vmatpush.bf16.msrb.mxu2 %v4133_v0  ;;  %v4040_v59 = vld [vmem:[#allocation26 + $0x40] sm:$0xf]  ;;  %v4049_v61 = vor.u32 %v4465_v57, %v4048_v55  ;;  %v4050_v0 = vld [vmem:[#allocation26 + $0x58] sm:$0xf0] }
 0xec4   :  { %2812 = vmatpush.bf16.msra.mxu1 %v4129_v58  ;;  %v4041_v26 = vor.u32 %v4464_v52, %v4040_v59  ;;  %v4605_v52 = vld [vmem:[%s5888_s23] ss:$0 sm:$0xff]  ;;  %v4501_v57 = vld [vmem:[#allocation27 + $0x78] sm:$0xff] }
 0xec7   :  { %v4698_v60 = vpop.eup %4697 }
 0xec8   :  { %v2408_v2 = vmul.f32 %v4698_v60, %v4686_v44  ;;  %v4700_v4 = vpop.eup %4699  ;;  %v4480_v60 = vld [vmem:[#allocation26 + $0xcc] sm:$0xf0] }
 0xec9   :  { %v4702_v10 = vpop.eup %4701  ;;  %v2329_v63 = vmul.f32 %v4700_v4, %v4684_v40  ;;  %v4106_v4 = vld [vmem:[#allocation26 + $0xd0] sm:$0xf0] }
 0xeca   :  { %v2409_v37 = vpack.c.bf16 %v2408_v2, %v2407_v1  ;;  %v2328_v5 = vmul.f32 %v4702_v10, %v5741_v25  ;;  %v4478_v1 = vld [vmem:[#allocation26 + $0xc4] sm:$0xf]  ;;  %v4105_v2 = vor.u32 %v4480_v60, %v4104_v49  ;;  %v4481_v10 = vld [vmem:[#allocation26 + $0xd4] sm:$0xf0]  ;;  %v4053_v49 = vor.u32 %v4463_v62, %v4050_v0  ;;  %v4024_v60 = vld [vmem:[#allocation26 + $0x20] sm:$0xf] }
 0xecb   :  { %v4493_v62 = vld [vmem:[#allocation27 + $0x38] sm:$0xff]  ;;  %v4499_v0 = vld [vmem:[#allocation27 + $0x68] sm:$0xff] }
 0xecc   :  { %3973 = vmatmul.msk.bf16.vlgmr.msrb.gmra.mxu1 %vm788_vm13, %v2409_v37  ;;  %v2330_v15 = vpack.c.bf16 %v2329_v63, %v2328_v5  ;;  %v4112_v37 = vld [vmem:[#allocation26 + $0xc8] sm:$0xf]  ;;  %v4109_v63 = vor.u32 %v4478_v1, %v4106_v4  ;;  %v4460_v1 = vld [vmem:[#allocation26 + $0x2c] sm:$0xf0] }
 0xecd   :  { %v4113_v5 = vor.u32 %v4481_v10, %v4112_v37  ;;  %v4025_v4 = vor.u32 %v4460_v1, %v4024_v60  ;;  %v4026_v37 = vld [vmem:[#allocation26 + $0x30] sm:$0xf0]  ;;  %v4032_v10 = vld [vmem:[#allocation26 + $0x28] sm:$0xf] }
 0xece   :  { %2799 = vmatpush.bf16.msrb.mxu0 %v4109_v63  ;;  %v4461_v63 = vld [vmem:[#allocation26 + $0x34] sm:$0xf0]  ;;  %v4492_v60 = vld [vmem:[#allocation27 + $0x30] sm:$0xff] }
 0xecf   :  { %v2332_v6 = vpop.permute.xlu1 %2331  ;;  %2813 = vmatpush.bf16.msra.mxu1 %v4113_v5  ;;  %v4516_v1 = vld [vmem:[#allocation27 + $0xf0] sm:$0xff] }
 0xed0   :  { %2344 = vmatpush.bf16.msrb.mxu3 %v2332_v6  ;;  %v4479_v6 = vld [vmem:[#allocation26 + $0xcc] sm:$0xf] }
 0xed3   :  { %3971 = vmatmul.msk.bf16.vlgmr.msrb.gmra.mxu3 %vm788_vm13, %v2330_v15  ;;  %v4114_v15 = vld [vmem:[#allocation26 + $0xd8] sm:$0xf0] }
 0xed4   :  { %2784 = vmatpush.bf16.msra.mxu3 %v4121_v53  ;;  %v4462_v53 = vld [vmem:[#allocation26 + $0x44] sm:$0xf] }
 0xed5   :  { %v4045_v58 = vor.u32 %v4462_v53, %v4042_v54 }
 0xed8   :  { %2785 = vmatpush.bf16.msra.mxu3 %v4105_v2  ;;  %v4458_v2 = vld [vmem:[#allocation26 + $0x24] sm:$0xf] }
 0xf04   :  { %v2193_v35 = vpop.f32.mrf.mxu3 }
 0xf05   :  { %2198 = vst.msk [vmem:[#allocation2] sm:$0xff] %vm765_vm11, %v2193_v35  ;;  %v4117_v35 = vor.u32 %v4479_v6, %v4114_v15  ;;  %v4029_v6 = vor.u32 %v4458_v2, %v4026_v37  ;;  %v4033_v15 = vor.u32 %v4461_v63, %v4032_v10  ;;  %v4498_v2 = vld [vmem:[#allocation27 + $0x60] sm:$0xff]  ;;  %v4491_v37 = vld [vmem:[#allocation27 + $0x28] sm:$0xff]  ;;  %v4497_v63 = vld [vmem:[#allocation27 + $0x58] sm:$0xff] }
 0xf06   :  { %v4515_v10 = vld [vmem:[#allocation27 + $0xe8] sm:$0xff] }
 0xf07   :  { %2827 = vmatpush.bf16.msrb.mxu2 %v4117_v35  ;;  %v4459_v35 = vld [vmem:[#allocation26 + $0x2c] sm:$0xf] }
 0xf0b   :  { %2828 = vmatpush.bf16.msrb.mxu2 %v4101_v21  ;;  %v4455_v21 = vld [vmem:[#allocation26 + $0xc] sm:$0xf] }
 0xf0c   :  { %v2195_v8 = vpop.f32.mrf.mxu3 }
 0xf0d   :  { %2199 = vst.msk [vmem:[#allocation2 + $0x8] sm:$0xff] %vm765_vm11, %v2195_v8  ;;  %v4088_v8 = vld [vmem:[#allocation26 + $0xa0] sm:$0xf] }
 0xf39   :  { %v2267_v3 = vpop.f32.mrf.mxu1 }
 0xf3a   :  { %2274 = vrot.lane.b32.xlu2 %v2267_v3, %s5213_s28  ;;  %v4476_v3 = vld [vmem:[#allocation26 + $0xac] sm:$0xf0] }
 0xf41   :  { %v2269_v9 = vpop.f32.mrf.mxu1 }
 0xf42   :  { %2276 = vrot.lane.b32.xlu0 %v2269_v9, %s5213_s28  ;;  %v4474_v9 = vld [vmem:[#allocation26 + $0xa4] sm:$0xf] }
 0xf49   :  { %v2425_v11 = vpop.f32.mrf.mxu1 }
 0xf51   :  { %v2427_v12 = vpop.f32.mrf.mxu1 }
 0xf52   :  { %2434 = vrot.lane.b32.xlu2 %v2427_v12, %s5212_s16  ;;  %v4090_v12 = vld [vmem:[#allocation26 + $0xb0] sm:$0xf0] }
 0xf56   :  { %v2346_v14 = vpop.f32.mrf.mxu3 }
 0xf57   :  { %2353 = vrot.lane.b32.xlu0 %v2346_v14, %s5193_s7  ;;  %v4096_v14 = vld [vmem:[#allocation26 + $0xa8] sm:$0xf] }
 0xf5e   :  { %v2348_v23 = vpop.f32.mrf.mxu3 }
 0xf5f   :  { %2355 = vrot.lane.b32.xlu1 %v2348_v23, %s5193_s7  ;;  %2432 = vrot.lane.b32.xlu0 %v2425_v11, %s5212_s16  ;;  %s5886_s7 = sld [smem:[#allocation49_spill]]  ;;  %v4089_v11 = vor.u32 %v4476_v3, %v4088_v8  ;;  %v4477_v23 = vld [vmem:[#allocation26 + $0xb4] sm:$0xf0]  ;;  %v4034_v8 = vld [vmem:[#allocation26 + $0x38] sm:$0xf0] }
 0xf60   :  { %v4097_v16 = vor.u32 %v4477_v23, %v4096_v14  ;;  %v4008_v3 = vld [vmem:[#allocation26] sm:$0xf]  ;;  %v4454_v14 = vld [vmem:[#allocation26 + $0x4] sm:$0xf]  ;;  %v4010_v23 = vld [vmem:[#allocation26 + $0x10] sm:$0xf0] }
 0xf61   :  { %2786 = vmatpush.bf16.msra.mxu3 %v4089_v11  ;;  %v4037_v11 = vor.u32 %v4459_v35, %v4034_v8  ;;  %v4496_v35 = vld [vmem:[#allocation27 + $0x50] sm:$0xff] }
 0xf62   :  { %2814 = vmatpush.bf16.msra.mxu1 %v4097_v16  ;;  %v4013_v16 = vor.u32 %v4454_v14, %v4010_v23  ;;  %v4504_v8 = vld [vmem:[#allocation27 + $0x90] sm:$0xff]  ;;  %v4503_v14 = vld [vmem:[#allocation27 + $0x88] sm:$0xff] }
 0xf63   :  { %v4488_v23 = vld [vmem:[#allocation27 + $0x10] sm:$0xff] }
 0xf65   :  { %v4603_v40 = vld [vmem:[%s5886_s7] ss:$0 sm:$0xff]  ;;  %2787 = vmatpush.bf16.msra.mxu3 %v4073_v27 }
 0xf94   :  { %v2275_v20 = vpop.permute.xlu2 %2274 }
 0xf95   :  { %2280 = vst.msk [vmem:[#allocation2] sm:$0xff] %vm911_vm1, %v2275_v20  ;;  %v4093_v20 = vor.u32 %v4474_v9, %v4090_v12  ;;  %v4456_v12 = vld [vmem:[#allocation26 + $0xc] sm:$0xf0] }
 0xf97   :  { %2800 = vmatpush.bf16.msrb.mxu0 %v4093_v20  ;;  %v4009_v20 = vor.u32 %v4456_v12, %v4008_v3  ;;  %v4489_v3 = vld [vmem:[#allocation27 + $0x18] sm:$0xff]  ;;  %v4495_v12 = vld [vmem:[#allocation27 + $0x48] sm:$0xff] }
 0xfac   :  { %v2435_v33 = vpop.permute.xlu2 %2434 }
 0xfb4   :  { %v2277_v25 = vpop.permute.xlu0 %2276 }
 0xfb5   :  { %2281 = vst.msk [vmem:[#allocation2 + $0x8] sm:$0xff] %vm911_vm1, %v2277_v25  ;;  %v4470_v25 = vld [vmem:[#allocation26 + $0x84] sm:$0xf] }
 0xfc9   :  { %v2354_v45 = vpop.permute.xlu0 %2353 }
 0xfca   :  { %2359 = vst.msk [vmem:[#allocation2] sm:$0xff] %vm991_vm2, %v2354_v45  ;;  %v4080_v45 = vld [vmem:[#allocation26 + $0x88] sm:$0xf] }
 0xfd1   :  { %v2356_v30 = vpop.permute.xlu1 %2355  ;;  %v2433_v31 = vpop.permute.xlu0 %2432 }
 0xfd2   :  { %2360 = vst.msk [vmem:[#allocation2 + $0x8] sm:$0xff] %vm991_vm2, %v2356_v30  ;;  %v4473_v30 = vld [vmem:[#allocation26 + $0x94] sm:$0xf0] }
 0xfd3   :  { %2439 = vst.msk [vmem:[#allocation2 + $0x8] sm:$0xff] %vm1071_vm3, %v2435_v33  ;;  %v4081_v33 = vor.u32 %v4473_v30, %v4080_v45 }
 0xfd4   :  { %2438 = vst.msk [vmem:[#allocation2] sm:$0xff] %vm1071_vm3, %v2433_v31  ;;  %v4077_v31 = vor.u32 %v4470_v25, %v4074_v28  ;;  %v4018_v25 = vld [vmem:[#allocation26 + $0x18] sm:$0xf0] }
 0xfd5   :  { %2815 = vmatpush.bf16.msra.mxu1 %v4081_v33  ;;  %v4021_v27 = vor.u32 %v4455_v21, %v4018_v25 }
 0xfd6   :  { %2801 = vmatpush.bf16.msrb.mxu0 %v4077_v31 }
 0xfda   :  { %v2441_v34 = vld [vmem:[#allocation2 + $0x8] sm:$0xff] }
 0xfdb   :  { %v2440_v38 = vld [vmem:[#allocation2] sm:$0xff] }
 0xfdc   :  { %v2442_v39 = vpack.c.bf16 %v2441_v34, %v2440_v38  ;;  %v4471_v34 = vld [vmem:[#allocation26 + $0x8c] sm:$0xf]  ;;  %v4082_v38 = vld [vmem:[#allocation26 + $0x98] sm:$0xf0] }
 0xfde   :  { %2515 = vmatmul.bf16.vlgmr.msra.gmra.mxu2 %v2442_v39  ;;  %v4085_v39 = vor.u32 %v4471_v34, %v4082_v38 }
 0xfe0   :  { %2829 = vmatpush.bf16.msrb.mxu2 %v4085_v39 }
0x1061   :  { %v2516_v42 = vpop.f32.mrf.mxu2 }
0x1062   :  { %v2521_v43 = vadd.f32 %v2516_v42, %v5664_v7  ;;  %v4468_v42 = vld [vmem:[#allocation26 + $0x6c] sm:$0xf0] }
0x1064   :  { %v5773_v44 = vadd.f32 %v4603_v40, %v2521_v43  ;;  %v4466_v43 = vld [vmem:[#allocation26 + $0x64] sm:$0xf] }
0x1066   :  { %2531 = vadd.xlane.f32.xlu1 %v5773_v44 }
0x1069   :  { %v2518_v47 = vpop.f32.mrf.mxu2 }
0x106a   :  { %v2522_v48 = vadd.f32 %v2518_v47, %v5668_v13 }
0x106c   :  { %v5777_v29 = vadd.f32 %v4603_v40, %v2522_v48  ;;  %v4056_v40 = vld [vmem:[#allocation26 + $0x60] sm:$0xf]  ;;  %v4058_v48 = vld [vmem:[#allocation26 + $0x70] sm:$0xf0] }
0x106d   :  { %v4057_v47 = vor.u32 %v4468_v42, %v4056_v40 }
0x106e   :  { %2533 = vadd.xlane.f32.xlu0 %v5777_v29 }
0x106f   :  { %2788 = vmatpush.bf16.msra.mxu3 %v4057_v47 }
0x1073   :  { %2789 = vmatpush.bf16.msra.mxu3 %v4041_v26 }
0x1077   :  { %2790 = vmatpush.bf16.msra.mxu3 %v4025_v4  ;;  %v4506_v4 = vld [vmem:[#allocation27 + $0xa0] sm:$0xff] }
0x107b   :  { %2791 = vmatpush.bf16.msra.mxu3 %v4009_v20  ;;  %v4512_v20 = vld [vmem:[#allocation27 + $0xd0] sm:$0xff] }
0x107f   :  { %3172 = vmatpush.bf16.msrb.mxu3 %v4493_v62 }
0x1083   :  { %3173 = vmatpush.bf16.msrb.mxu3 %v4492_v60 }
0x1087   :  { %3174 = vmatpush.bf16.msrb.mxu3 %v4491_v37 }
0x10d9   :  { %v2532_v50 = vpop.xlane.xlu1 %2531 }
0x10da   :  { %v2535_v51 = vmul.f32 %v2532_v50, %v5492_v56  ;;  %v4064_v50 = vld [vmem:[#allocation26 + $0x68] sm:$0xf] }
0x10dc   :  { %v5782_v18 = vsub.f32 %v5773_v44, %v2535_v51  ;;  %v4469_v51 = vld [vmem:[#allocation26 + $0x74] sm:$0xf0] }
0x10de   :  { %v2539_v7 = vmul.f32 %v5782_v18, %v5782_v18 }
0x10e0   :  { %2541 = vadd.xlane.f32.xlu2 %v2539_v7  ;;  %v4061_v7 = vor.u32 %v4466_v43, %v4058_v48 }
0x10e1   :  { %v2534_v41 = vpop.xlane.xlu0 %2533 }
0x10e2   :  { %v2536_v32 = vmul.f32 %v2534_v41, %v5492_v56  ;;  %v4065_v41 = vor.u32 %v4469_v51, %v4064_v50  ;;  %2802 = vmatpush.bf16.msrb.mxu0 %v4061_v7 }
0x10e4   :  { %v5788_v36 = vsub.f32 %v5777_v29, %v2536_v32  ;;  %v4467_v32 = vld [vmem:[#allocation26 + $0x6c] sm:$0xf]  ;;  %2816 = vmatpush.bf16.msra.mxu1 %v4065_v41  ;;  %v4604_v41 = vld [vmem:[%s5887_s12] ss:$0 sm:$0xff] }
0x10e6   :  { %v2540_v13 = vmul.f32 %v5788_v36, %v5788_v36  ;;  %2803 = vmatpush.bf16.msrb.mxu0 %v4045_v58  ;;  %v4509_v58 = vld [vmem:[#allocation27 + $0xb8] sm:$0xff] }
0x10e8   :  { %2543 = vadd.xlane.f32.xlu1 %v2540_v13  ;;  %v4066_v13 = vld [vmem:[#allocation26 + $0x78] sm:$0xf0]  ;;  %2817 = vmatpush.bf16.msra.mxu1 %v4049_v61  ;;  %v4508_v61 = vld [vmem:[#allocation27 + $0xb0] sm:$0xff] }
0x10e9   :  { %v4069_v46 = vor.u32 %v4467_v32, %v4066_v13 }
0x10ea   :  { %2804 = vmatpush.bf16.msrb.mxu0 %v4029_v6  ;;  %v4490_v6 = vld [vmem:[#allocation27 + $0x20] sm:$0xff] }
0x10eb   :  { %2830 = vmatpush.bf16.msrb.mxu2 %v4069_v46  ;;  %3175 = vmatpush.bf16.msrb.mxu3 %v4490_v6 }
0x10ec   :  { %2818 = vmatpush.bf16.msra.mxu1 %v4033_v15  ;;  %v4514_v15 = vld [vmem:[#allocation27 + $0xe0] sm:$0xff] }
0x10ee   :  { %2805 = vmatpush.bf16.msrb.mxu0 %v4013_v16  ;;  %v4494_v16 = vld [vmem:[#allocation27 + $0x40] sm:$0xff] }
0x10ef   :  { %2831 = vmatpush.bf16.msrb.mxu2 %v4053_v49  ;;  %v4507_v49 = vld [vmem:[#allocation27 + $0xa8] sm:$0xff]  ;;  %3176 = vmatpush.bf16.msrb.mxu3 %v4489_v3 }
0x10f0   :  { %2819 = vmatpush.bf16.msra.mxu1 %v4017_v24  ;;  %v4511_v24 = vld [vmem:[#allocation27 + $0xc8] sm:$0xff] }
0x10f2   :  { %3186 = vmatpush.bf16.msra.mxu0 %v4501_v57 }
0x10f3   :  { %2832 = vmatpush.bf16.msrb.mxu2 %v4037_v11  ;;  %v5799_v11 = vld [vmem:[%s5358_s20] sm:$0xf]  ;;  %3177 = vmatpush.bf16.msrb.mxu3 %v4488_v23  ;;  %s5214_s20 = smov [#allocation29]  }
0x10f4   :  { %3200 = vmatpush.bf16.msrb.mxu1 %v4509_v58  ;;  %v2617_v19 = vperm.slane %v5799_v11, 1  ;;  %v2618_v21 = vperm.slane %v5799_v11, 2 }
0x10f7   :  { %2833 = vmatpush.bf16.msrb.mxu2 %v4021_v27 }
0x10f8   :  { %3201 = vmatpush.bf16.msrb.mxu1 %v4508_v61 }
0x10fc   :  { %3202 = vmatpush.bf16.msrb.mxu1 %v4507_v49 }
0x1100   :  { %3203 = vmatpush.bf16.msrb.mxu1 %v4506_v4 }
0x1153   :  { %v2542_v5 = vpop.xlane.xlu2 %2541 }
0x1154   :  { %v2545_v9 = vmul.f32 %v2542_v5, %v5492_v56  ;;  %v4505_v5 = vld [vmem:[#allocation27 + $0x98] sm:$0xff] }
0x1155   :  { %3204 = vmatpush.bf16.msrb.mxu1 %v4505_v5 }
0x1156   :  { %v2547_v22 = vadd.f32 1e-05, %v2545_v9  ;;  %v4513_v9 = vld [vmem:[#allocation27 + $0xd8] sm:$0xff] }
0x1158   :  { %4703 = vrsqrt.f32 %v2547_v22  ;;  %vm2555_vm12 = vweird.f32 %v2547_v22 }
0x1159   :  { %3205 = vmatpush.bf16.msrb.mxu1 %v4504_v8 }
0x115b   :  { %v2544_v28 = vpop.xlane.xlu1 %2543 }
0x115c   :  { %v2546_v45 = vmul.f32 %v2544_v28, %v5492_v56 }
0x115d   :  { %3206 = vmatpush.bf16.msrb.mxu1 %v4503_v14 }
0x115e   :  { %v4704_v30 = vpop.eup %4703  ;;  %v2548_v31 = vadd.f32 1e-05, %v2546_v45 }
0x115f   :  { %v2550_v33 = vmul.f32 %v4704_v30, %v2547_v22  ;;  %vm2556_vm11 = vweird.f32 %v4704_v30  ;;  %v4487_v22 = vld [vmem:[#allocation27 + $0x8] sm:$0xff] }
0x1160   :  { %4705 = vrsqrt.f32 %v2548_v31  ;;  %vm2557_vm13 = vmor %vm2555_vm12, %vm2556_vm11  ;;  %vm2565_vm1 = vweird.f32 %v2548_v31  ;;  %3178 = vmatpush.bf16.msrb.mxu3 %v4487_v22 }
0x1161   :  { %v2551_v34 = vmul.f32 %v4704_v30, %v2550_v33  ;;  %3207 = vmatpush.bf16.msrb.mxu1 %v4502_v17  ;;  %v4486_v33 = vld [vmem:[#allocation27] sm:$0xff] }
0x1163   :  { %v2552_v38 = vmul.f32 0.5, %v2551_v34  ;;  %v4510_v34 = vld [vmem:[#allocation27 + $0xc0] sm:$0xff] }
0x1164   :  { %3179 = vmatpush.bf16.msrb.mxu3 %v4486_v33 }
0x1165   :  { %v2553_v39 = vsub.f32 1.5, %v2552_v38 }
0x1166   :  { %v4706_v40 = vpop.eup %4705 }
0x1167   :  { %v2554_v42 = vmul.f32 %v4704_v30, %v2553_v39  ;;  %v2560_v43 = vmul.f32 %v4706_v40, %v2548_v31  ;;  %vm2566_vm0 = vweird.f32 %v4706_v40  ;;  %v2616_v31 = vperm.slane %v5799_v11, 0 }
0x1168   :  { %vm2567_vm2 = vmor %vm2565_vm1, %vm2566_vm0  ;;  %v2619_v39 = vperm.slane %v5799_v11, 3 }
0x1169   :  { %v2561_v47 = vmul.f32 %v4706_v40, %v2560_v43  ;;  %v2558_v48 = vsel %vm2557_vm13, %v4704_v30, %v2554_v42 }
0x116a   :  { %v2569_v7 = vmul.f32 %v2558_v48, %v5782_v18  ;;  %v4500_v18 = vld [vmem:[#allocation27 + $0x70] sm:$0xff] }
0x116b   :  { %v2562_v50 = vmul.f32 0.5, %v2561_v47  ;;  %3187 = vmatpush.bf16.msra.mxu0 %v4500_v18 }
0x116c   :  { %v2574_v59 = vmul.f32 %v4604_v41, %v2569_v7 }
0x116d   :  { %v2563_v51 = vsub.f32 1.5, %v2562_v50 }
0x116e   :  { %v2579_v26 = vadd.f32 %v4605_v52, %v2574_v59 }
0x116f   :  { %v2564_v32 = vmul.f32 %v4706_v40, %v2563_v51  ;;  %3188 = vmatpush.bf16.msra.mxu0 %v4499_v0 }
0x1171   :  { %v2568_v13 = vsel %vm2567_vm2, %v4706_v40, %v2564_v32 }
0x1172   :  { %v2570_v46 = vmul.f32 %v2568_v13, %v5788_v36  ;;  %v4517_v36 = vld [vmem:[#allocation27 + $0xf8] sm:$0xff] }
0x1173   :  { %3214 = vmatpush.bf16.msra.mxu2 %v4517_v36  ;;  %3189 = vmatpush.bf16.msra.mxu0 %v4498_v2 }
0x1174   :  { %v2575_v53 = vmul.f32 %v4604_v41, %v2570_v46 }
0x1176   :  { %v2580_v54 = vadd.f32 %v4605_v52, %v2575_v53 }
0x1177   :  { %3215 = vmatpush.bf16.msra.mxu2 %v4516_v1  ;;  %3190 = vmatpush.bf16.msra.mxu0 %v4497_v63 }
0x1178   :  { %v2581_v55 = vpack.c.bf16 %v2580_v54, %v2579_v26 }
0x117a   :  { %2792 = vmatmul.bf16.vlgmr.msra.gmra.mxu3 %v2581_v55  ;;  %2806 = vmatmul.bf16.vlgmr.msrb.gmra.mxu0 %v2581_v55 }
0x117b   :  { %2820 = vmatmul.bf16.vlgmr.msra.gmra.mxu1 %v2581_v55  ;;  %2834 = vmatmul.bf16.vlgmr.msrb.gmra.mxu2 %v2581_v55 }
0x117c   :  { %3216 = vmatpush.bf16.msra.mxu2 %v4515_v10  ;;  %3191 = vmatpush.bf16.msra.mxu0 %v4496_v35 }
0x1180   :  { %3217 = vmatpush.bf16.msra.mxu2 %v4514_v15  ;;  %3192 = vmatpush.bf16.msra.mxu0 %v4495_v12 }
0x1184   :  { %3218 = vmatpush.bf16.msra.mxu2 %v4513_v9  ;;  %3193 = vmatpush.bf16.msra.mxu0 %v4494_v16 }
0x1188   :  { %3219 = vmatpush.bf16.msra.mxu2 %v4512_v20 }
0x118c   :  { %3220 = vmatpush.bf16.msra.mxu2 %v4511_v24 }
0x1190   :  { %3221 = vmatpush.bf16.msra.mxu2 %v4510_v34 }
0x11f7   :  { %v2807_v25 = vpop.f32.mrf.mxu0 }
0x11f8   :  { %v5803_v27 = vadd.f32 %v2807_v25, %v2617_v19  ;;  %v2821_v28 = vpop.f32.mrf.mxu1 }
0x11f9   :  { %v5805_v45 = vadd.f32 %v2821_v28, %v2618_v21 }
0x11fa   :  { %v2849_v30 = vmul.f32 0.044715, %v5803_v27  ;;  %v2841_v34 = vmul.f32 0.5, %v5803_v27 }
0x11fb   :  { %v2850_v38 = vmul.f32 0.044715, %v5805_v45 }
0x11fc   :  { %v2857_v40 = vmul.f32 %v2849_v30, %v5803_v27 }
0x11fd   :  { %v2858_v42 = vmul.f32 %v2850_v38, %v5805_v45  ;;  %v2793_v43 = vpop.f32.mrf.mxu3 }
0x11fe   :  { %v2865_v47 = vmul.f32 %v2857_v40, %v5803_v27  ;;  %v5814_v48 = vadd.f32 %v2793_v43, %v2616_v31  ;;  %v2835_v50 = vpop.f32.mrf.mxu2 }
0x11ff   :  { %v2866_v51 = vmul.f32 %v2858_v42, %v5805_v45  ;;  %v5817_v7 = vadd.f32 %v2835_v50, %v2619_v39  ;;  %v2809_v41 = vpop.f32.mrf.mxu0  ;;  %v2842_v42 = vmul.f32 0.5, %v5805_v45 }
0x1200   :  { %v2873_v32 = vadd.f32 %v2865_v47, %v5803_v27  ;;  %v2848_v13 = vmul.f32 0.044715, %v5814_v48  ;;  %v2810_v46 = vadd.f32 %v2809_v41, %v2617_v19  ;;  %v2823_v59 = vpop.f32.mrf.mxu1  ;;  %v2840_v27 = vmul.f32 0.5, %v5814_v48 }
0x1201   :  { %v2874_v52 = vadd.f32 %v2866_v51, %v5805_v45  ;;  %v2851_v53 = vmul.f32 0.044715, %v5817_v7  ;;  %v2824_v26 = vadd.f32 %v2823_v59, %v2618_v21  ;;  %v2843_v45 = vmul.f32 0.5, %v5817_v7 }
0x1202   :  { %v2856_v54 = vmul.f32 %v2848_v13, %v5814_v48  ;;  %v2853_v55 = vmul.f32 0.044715, %v2810_v46  ;;  %v2881_v18 = vmul.f32 0.7978846, %v2873_v32  ;;  %v2845_v38 = vmul.f32 0.5, %v2810_v46 }
0x1203   :  { %v2859_v57 = vmul.f32 %v2851_v53, %v5817_v7  ;;  %v2854_v58 = vmul.f32 0.044715, %v2824_v26  ;;  %v2882_v36 = vmul.f32 0.7978846, %v2874_v52  ;;  %v2846_v43 = vmul.f32 0.5, %v2824_v26 }
0x1204   :  { %v2864_v61 = vmul.f32 %v2856_v54, %v5814_v48  ;;  %v2861_v62 = vmul.f32 %v2853_v55, %v2810_v46  ;;  %4707 = vtanh.f32 %v2881_v18 }
0x1205   :  { %v2867_v0 = vmul.f32 %v2859_v57, %v5817_v7  ;;  %v2862_v49 = vmul.f32 %v2854_v58, %v2824_v26  ;;  %v2795_v60 = vpop.f32.mrf.mxu3  ;;  %4709 = vtanh.f32 %v2882_v36 }
0x1206   :  { %v2872_v1 = vadd.f32 %v2864_v61, %v5814_v48  ;;  %v2869_v2 = vmul.f32 %v2861_v62, %v2810_v46  ;;  %v2796_v4 = vadd.f32 %v2795_v60, %v2616_v31  ;;  %v2837_v37 = vpop.f32.mrf.mxu2 }
0x1207   :  { %v2875_v10 = vadd.f32 %v2867_v0, %v5817_v7  ;;  %v2870_v63 = vmul.f32 %v2862_v49, %v2824_v26  ;;  %v2838_v5 = vadd.f32 %v2837_v37, %v2619_v39 }
0x1208   :  { %v2877_v6 = vadd.f32 %v2869_v2, %v2810_v46  ;;  %v2852_v15 = vmul.f32 0.044715, %v2796_v4  ;;  %v2880_v3 = vmul.f32 0.7978846, %v2872_v1  ;;  %v2844_v46 = vmul.f32 0.5, %v2796_v4 }
0x1209   :  { %v2878_v35 = vadd.f32 %v2870_v63, %v2824_v26  ;;  %v2855_v8 = vmul.f32 0.044715, %v2838_v5  ;;  %v2883_v12 = vmul.f32 0.7978846, %v2875_v10  ;;  %v2847_v26 = vmul.f32 0.5, %v2838_v5 }
0x120a   :  { %v2885_v9 = vmul.f32 0.7978846, %v2877_v6  ;;  %v2860_v11 = vmul.f32 %v2852_v15, %v2796_v4  ;;  %v4708_v17 = vpop.eup %4707  ;;  %v4606_v6 = vld [vmem:[%s5368_s4] ss:$0 sm:$0xff]  ;;  %s3421_s4 = sshll.u32 %s5214_s20, 4  ;;  %s3422_s4 = int_to_ptr.vmem [resolvable:$true] %s3421_s4 }
0x120b   :  { %v2886_v14 = vmul.f32 0.7978846, %v2878_v35  ;;  %v2863_v23 = vmul.f32 %v2855_v8, %v2838_v5  ;;  %v4710_v21 = vpop.eup %4709  ;;  %v2897_v28 = vadd.f32 1.0, %v4708_v17 }
0x120c   :  { %v2868_v20 = vmul.f32 %v2860_v11, %v2796_v4  ;;  %4711 = vtanh.f32 %v2885_v9  ;;  %v2898_v31 = vadd.f32 1.0, %v4710_v21 }
0x120d   :  { %v2871_v16 = vmul.f32 %v2863_v23, %v2838_v5  ;;  %4713 = vtanh.f32 %v2886_v14  ;;  %v2905_v51 = vmul.f32 %v2897_v28, %v2841_v34  ;;  %v4532_v28 = vld [vmem:[#allocation6 + $0x74] sm:$0xf]  ;;  %v4312_v34 = vld [vmem:[#allocation6 + $0x60] sm:$0xf] }
0x120e   :  { %v2876_v19 = vadd.f32 %v2868_v20, %v2796_v4  ;;  %4715 = vtanh.f32 %v2880_v3  ;;  %v2906_v32 = vmul.f32 %v2898_v31, %v2842_v42  ;;  %v4322_v31 = vld [vmem:[#allocation6 + $0x78] sm:$0xf0]  ;;  %v4314_v42 = vld [vmem:[#allocation6 + $0x68] sm:$0xf0] }
0x120f   :  { %v2879_v22 = vadd.f32 %v2871_v16, %v2838_v5  ;;  %4717 = vtanh.f32 %v2883_v12 }
0x1210   :  { %v2884_v24 = vmul.f32 0.7978846, %v2876_v19 }
0x1211   :  { %v2887_v25 = vmul.f32 0.7978846, %v2879_v22 }
0x1212   :  { %v4712_v30 = vpop.eup %4711  ;;  %4719 = vtanh.f32 %v2884_v24 }
0x1213   :  { %v4714_v33 = vpop.eup %4713  ;;  %v2901_v39 = vadd.f32 1.0, %v4712_v30  ;;  %4721 = vtanh.f32 %v2887_v25  ;;  %v4533_v25 = vld [vmem:[#allocation6 + $0x74] sm:$0xf0] }
0x1214   :  { %v4716_v40 = vpop.eup %4715  ;;  %v2902_v47 = vadd.f32 1.0, %v4714_v33  ;;  %v4325_v33 = vor.u32 %v4532_v28, %v4322_v31 }
0x1215   :  { %v4718_v50 = vpop.eup %4717  ;;  %v2909_v41 = vmul.f32 %v2901_v39, %v2845_v38  ;;  %v2896_v52 = vadd.f32 1.0, %v4716_v40  ;;  %v4531_v38 = vld [vmem:[#allocation6 + $0x64] sm:$0xf0]  ;;  %v4530_v39 = vld [vmem:[#allocation6 + $0x64] sm:$0xf] }
0x1216   :  { %v2910_v13 = vmul.f32 %v2902_v47, %v2846_v43  ;;  %v2899_v55 = vadd.f32 1.0, %v4718_v50  ;;  %3399 = vmatpush.bf16.msrb.mxu0 %v4325_v33  ;;  %v4313_v40 = vor.u32 %v4531_v38, %v4312_v34  ;;  %v4317_v43 = vor.u32 %v4530_v39, %v4314_v42  ;;  %v4304_v47 = vld [vmem:[#allocation6 + $0x50] sm:$0xf]  ;;  %v4529_v50 = vld [vmem:[#allocation6 + $0x54] sm:$0xf0] }
0x1217   :  { %v2913_v59 = vpack.c.bf16 %v2909_v41, %v2905_v51  ;;  %v2904_v61 = vmul.f32 %v2896_v52, %v2840_v27  ;;  %v4528_v51 = vld [vmem:[#allocation6 + $0x54] sm:$0xf]  ;;  %v4305_v41 = vor.u32 %v4529_v50, %v4304_v47  ;;  %v4527_v52 = vld [vmem:[#allocation6 + $0x44] sm:$0xf0]  ;;  %v4288_v27 = vld [vmem:[#allocation6 + $0x30] sm:$0xf] }
0x1218   :  { %v4720_v53 = vpop.eup %4719  ;;  %v2914_v54 = vpack.c.bf16 %v2910_v13, %v2906_v32  ;;  %v2907_v36 = vmul.f32 %v2899_v55, %v2843_v45  ;;  %v4306_v32 = vld [vmem:[#allocation6 + $0x58] sm:$0xf0]  ;;  %v4298_v55 = vld [vmem:[#allocation6 + $0x48] sm:$0xf0]  ;;  %v4607_v33 = vld [vmem:[#allocation8] ss:$0 sm:$0xff] }
0x1219   :  { %v4722_v57 = vpop.eup %4721  ;;  %3194 = vmatmul.bf16.vlgmr.msra.gmra.mxu0 %v2913_v59  ;;  %v2900_v58 = vadd.f32 1.0, %v4720_v53  ;;  %v4309_v13 = vor.u32 %v4528_v51, %v4306_v32  ;;  %v4296_v59 = vld [vmem:[#allocation6 + $0x40] sm:$0xf]  ;;  %v4526_v53 = vld [vmem:[#allocation6 + $0x44] sm:$0xf] }
0x121a   :  { %3208 = vmatmul.bf16.vlgmr.msrb.gmra.mxu1 %v2914_v54  ;;  %v2903_v18 = vadd.f32 1.0, %v4722_v57  ;;  %3400 = vmatpush.bf16.msrb.mxu0 %v4317_v43  ;;  %v4297_v54 = vor.u32 %v4527_v52, %v4296_v59  ;;  %v4301_v57 = vor.u32 %v4526_v53, %v4298_v55  ;;  %v4608_v42 = vld [vmem:[#allocation9] ss:$0 sm:$0xff] }
0x121b   :  { %v2908_v62 = vmul.f32 %v2900_v58, %v2844_v46  ;;  %v4525_v46 = vld [vmem:[#allocation6 + $0x34] sm:$0xf0]  ;;  %v4524_v58 = vld [vmem:[#allocation6 + $0x34] sm:$0xf] }
0x121c   :  { %v2911_v0 = vmul.f32 %v2903_v18, %v2847_v26  ;;  %v4289_v45 = vor.u32 %v4525_v46, %v4288_v27  ;;  %v4290_v26 = vld [vmem:[#allocation6 + $0x38] sm:$0xf0] }
0x121d   :  { %v2912_v49 = vpack.c.bf16 %v2908_v62, %v2904_v61  ;;  %v4293_v18 = vor.u32 %v4524_v58, %v4290_v26  ;;  %v4280_v61 = vld [vmem:[#allocation6 + $0x20] sm:$0xf]  ;;  %v4523_v62 = vld [vmem:[#allocation6 + $0x24] sm:$0xf0] }
0x121e   :  { %v2915_v60 = vpack.c.bf16 %v2911_v0, %v2907_v36  ;;  %3401 = vmatpush.bf16.msrb.mxu0 %v4309_v13  ;;  %v4522_v36 = vld [vmem:[#allocation6 + $0x24] sm:$0xf]  ;;  %v4281_v0 = vor.u32 %v4523_v62, %v4280_v61 }
0x121f   :  { %3180 = vmatmul.bf16.vlgmr.msrb.gmra.mxu3 %v2912_v49  ;;  %v4282_v49 = vld [vmem:[#allocation6 + $0x28] sm:$0xf0] }
0x1220   :  { %3222 = vmatmul.bf16.vlgmr.msra.gmra.mxu2 %v2915_v60  ;;  %v4285_v60 = vor.u32 %v4522_v36, %v4282_v49 }
0x1222   :  { %3402 = vmatpush.bf16.msrb.mxu0 %v4301_v57 }
0x1226   :  { %3403 = vmatpush.bf16.msrb.mxu0 %v4293_v18 }
0x122a   :  { %3404 = vmatpush.bf16.msrb.mxu0 %v4285_v60 }
0x1296   :  { %v3195_v1 = vpop.f32.mrf.mxu0 }
0x1297   :  { %v3209_v2 = vpop.f32.mrf.mxu1 }
0x129e   :  { %v3197_v5 = vpop.f32.mrf.mxu0 }
0x129f   :  { %v3211_v3 = vpop.f32.mrf.mxu1 }
0x12a2   :  { %v3181_v37 = vpop.f32.mrf.mxu3 }
0x12a3   :  { %v3196_v48 = vadd.f32 %v3195_v1, %v3181_v37  ;;  %v3223_v4 = vpop.f32.mrf.mxu2  ;;  %v4272_v1 = vld [vmem:[#allocation6 + $0x10] sm:$0xf]  ;;  %v4520_v37 = vld [vmem:[#allocation6 + $0x14] sm:$0xf] }
0x12a5   :  { %v3210_v10 = vadd.f32 %v3209_v2, %v3196_v48  ;;  %v4521_v2 = vld [vmem:[#allocation6 + $0x14] sm:$0xf0] }
0x12a6   :  { %v4273_v48 = vor.u32 %v4521_v2, %v4272_v1 }
0x12a7   :  { %v3224_v63 = vadd.f32 %v3223_v4, %v3210_v10  ;;  %v4274_v4 = vld [vmem:[#allocation6 + $0x18] sm:$0xf0]  ;;  %v4264_v10 = vld [vmem:[#allocation6] sm:$0xf] }
0x12a9   :  { %v3228_v7 = vadd.f32 %v3224_v63, %v5773_v44  ;;  %v4519_v63 = vld [vmem:[#allocation6 + $0x4] sm:$0xf0] }
0x12aa   :  { %v3183_v15 = vpop.f32.mrf.mxu3 }
0x12ab   :  { %v3198_v35 = vadd.f32 %v3197_v5, %v3183_v15  ;;  %v3234_v8 = vadd.f32 %v4606_v6, %v3228_v7  ;;  %v3225_v11 = vpop.f32.mrf.mxu2  ;;  %v4277_v7 = vor.u32 %v4520_v37, %v4274_v4  ;;  %v4518_v5 = vld [vmem:[#allocation6 + $0x4] sm:$0xf]  ;;  %v4266_v15 = vld [vmem:[#allocation6 + $0x8] sm:$0xf0] }
0x12ad   :  { %v3212_v9 = vadd.f32 %v3211_v3, %v3198_v35  ;;  %3238 = vadd.xlane.f32.xlu0 %v3234_v8  ;;  %3405 = vmatpush.bf16.msrb.mxu0 %v4277_v7  ;;  %v4269_v3 = vor.u32 %v4518_v5, %v4266_v15 }
0x12af   :  { %v3226_v12 = vadd.f32 %v3225_v11, %v3212_v9 }
0x12b1   :  { %v3229_v14 = vadd.f32 %v3226_v12, %v5777_v29  ;;  %v4320_v29 = vld [vmem:[#allocation6 + $0x70] sm:$0xf]  ;;  %3406 = vmatpush.bf16.msrb.mxu0 %v4269_v3 }
0x12b2   :  { %v4321_v30 = vor.u32 %v4533_v25, %v4320_v29 }
0x12b3   :  { %v3235_v23 = vadd.f32 %v4606_v6, %v3229_v14 }
0x12b4   :  { %3385 = vmatpush.bf16.msra.mxu3 %v4321_v30 }
0x12b5   :  { %3240 = vadd.xlane.f32.xlu2 %v3235_v23 }
0x12b8   :  { %3386 = vmatpush.bf16.msra.mxu3 %v4313_v40 }
0x12bc   :  { %3387 = vmatpush.bf16.msra.mxu3 %v4305_v41 }
0x12c0   :  { %3388 = vmatpush.bf16.msra.mxu3 %v4297_v54 }
0x12c4   :  { %3389 = vmatpush.bf16.msra.mxu3 %v4289_v45 }
0x12c8   :  { %3390 = vmatpush.bf16.msra.mxu3 %v4281_v0 }
0x12cc   :  { %3391 = vmatpush.bf16.msra.mxu3 %v4273_v48 }
0x1320   :  { %v3239_v20 = vpop.xlane.xlu0 %3238 }
0x1321   :  { %v3242_v16 = vmul.f32 %v3239_v20, %v5492_v56 }
0x1323   :  { %v5837_v17 = vsub.f32 %v3234_v8, %v3242_v16  ;;  %v4265_v8 = vor.u32 %v4519_v63, %v4264_v10 }
0x1325   :  { %v3246_v44 = vmul.f32 %v5837_v17, %v5837_v17  ;;  %3392 = vmatpush.bf16.msra.mxu3 %v4265_v8 }
0x1327   :  { %3248 = vadd.xlane.f32.xlu1 %v3246_v44 }
0x1328   :  { %v3241_v19 = vpop.xlane.xlu2 %3240 }
0x1329   :  { %v3243_v21 = vmul.f32 %v3241_v19, %v5492_v56 }
0x132b   :  { %v5842_v22 = vsub.f32 %v3235_v23, %v3243_v21 }
0x132d   :  { %v3247_v24 = vmul.f32 %v5842_v22, %v5842_v22 }
0x132f   :  { %3250 = vadd.xlane.f32.xlu0 %v3247_v24 }
0x139a   :  { %v3249_v6 = vpop.xlane.xlu1 %3248 }
0x139b   :  { %v3252_v35 = vmul.f32 %v3249_v6, %v5492_v56 }
0x139d   :  { %v3254_v9 = vadd.f32 1e-05, %v3252_v35 }
0x139f   :  { %4723 = vrsqrt.f32 %v3254_v9  ;;  %vm3262_vm7 = vweird.f32 %v3254_v9 }
0x13a2   :  { %v3251_v11 = vpop.xlane.xlu0 %3250 }
0x13a3   :  { %v3253_v12 = vmul.f32 %v3251_v11, %v5492_v56 }
0x13a5   :  { %v4724_v14 = vpop.eup %4723  ;;  %v3255_v23 = vadd.f32 1e-05, %v3253_v12 }
0x13a6   :  { %v3257_v20 = vmul.f32 %v4724_v14, %v3254_v9  ;;  %vm3263_vm3 = vweird.f32 %v4724_v14 }
0x13a7   :  { %4725 = vrsqrt.f32 %v3255_v23  ;;  %vm3264_vm8 = vmor %vm3262_vm7, %vm3263_vm3  ;;  %vm3272_vm10 = vweird.f32 %v3255_v23 }
0x13a8   :  { %v3258_v16 = vmul.f32 %v4724_v14, %v3257_v20 }
0x13aa   :  { %v3259_v44 = vmul.f32 0.5, %v3258_v16 }
0x13ac   :  { %v3260_v19 = vsub.f32 1.5, %v3259_v44 }
0x13ad   :  { %v4726_v21 = vpop.eup %4725 }
0x13ae   :  { %v3261_v24 = vmul.f32 %v4724_v14, %v3260_v19  ;;  %v3267_v29 = vmul.f32 %v4726_v21, %v3255_v23  ;;  %vm3273_vm9 = vweird.f32 %v4726_v21 }
0x13af   :  { %vm3274_vm14 = vmor %vm3272_vm10, %vm3273_vm9 }
0x13b0   :  { %v3268_v25 = vmul.f32 %v4726_v21, %v3267_v29  ;;  %v3265_v28 = vsel %vm3264_vm8, %v4724_v14, %v3261_v24 }
0x13b1   :  { %v3276_v56 = vmul.f32 %v3265_v28, %v5837_v17 }
0x13b2   :  { %v3269_v30 = vmul.f32 0.5, %v3268_v25 }
0x13b3   :  { %v3281_v40 = vmul.f32 %v4607_v33, %v3276_v56 }
0x13b4   :  { %v3270_v31 = vsub.f32 1.5, %v3269_v30 }
0x13b5   :  { %v3286_v47 = vadd.f32 %v4608_v42, %v3281_v40 }
0x13b6   :  { %v3271_v34 = vmul.f32 %v4726_v21, %v3270_v31 }
0x13b8   :  { %v3275_v38 = vsel %vm3274_vm14, %v4726_v21, %v3271_v34 }
0x13b9   :  { %v3277_v39 = vmul.f32 %v3275_v38, %v5842_v22 }
0x13bb   :  { %v3282_v43 = vmul.f32 %v4607_v33, %v3277_v39 }
0x13bd   :  { %v3287_v50 = vadd.f32 %v4608_v42, %v3282_v43 }
0x13bf   :  { %v3288_v51 = vpack.c.bf16 %v3287_v50, %v3286_v47 }
0x13c1   :  { %3393 = vmatmul.bf16.vlgmr.msra.gmra.mxu3 %v3288_v51  ;;  %3407 = vmatmul.bf16.vlgmr.msrb.gmra.mxu0 %v3288_v51 }
0x143e   :  { %v3408_v41 = vpop.f32.mrf.mxu0 }
0x143f   :  { %3414 = vst [vmem:[#allocation29 + $0x8] sm:$0xff] %v3408_v41 }
0x1444   :  { %v3394_v17 = vpop.f32.mrf.mxu3 }
0x1445   :  { %3413 = vst [vmem:[#allocation29] sm:$0xff] %v3394_v17 }
0x1446   :  { %v3410_v32 = vpop.f32.mrf.mxu0 }
0x1447   :  { %3416 = vst [vmem:[#allocation29 + $0x18] sm:$0xff] %v3410_v32 }
0x144c   :  { %v3396_v22 = vpop.f32.mrf.mxu3 }
0x144d   :  { %3415 = vst [vmem:[#allocation29 + $0x10] sm:$0xff] %v3396_v22 }
0x144e   :  { %5134 = shalt.err (!%p5131_p0)
}
0x144f   :  { %3429 = dma.vmem_to_hbm [thread:$0]  %s3422_s4, 512, %s3424_s26, [#allocation5], %s5204_s3, %s5204_s3, %s5205_s10  }
0x1450   :  { %5153 = dma.done.wait [#allocation5], 512  }
0x1451   :  { %5154 = vsyncadd [#allocation5], 4294966784 }
0x1452   :  { %3434 = vsyncpa [#allocation4], 1 }
0x1453   :  { %3435 = vsyncpa [#allocation7], 1 }
0x1454   :  { %3436 = vsyncpa [#allocation10], 1 }
0x1455   :  { %3437 = vsyncpa [#allocation13], 1 }
0x1456   :  { %3438 = vsyncpa [#allocation16], 1 }
0x1457   :  { %3439 = vsyncpa [#allocation19], 1 }
0x1458   :  { %3440 = vsyncpa [#allocation22], 1 }
0x1459   :  { %3441 = vsyncpa [#allocation25], 1 }
0x145a   :  { %3442 = vsyncpa [#allocation28], 1 }
0x145b   :  { %3443 = vsyncpa [#allocation5], 1 }

</bundles_post_ra>
